<compile_context>
chip_gen: v6e
topology: v6e:2x2x1
jax: 0.10.0
libtpu: 0.0.40
codegen_flags: <defaults>
</compile_context>

<pallas_src>
import functools

import jax
import jax.numpy as jnp
from jax.experimental import pallas as pl
from jax.experimental.pallas import tpu as pltpu


# ----------------------------------------------------------------------------
# Config (mirrors the fields MicroController reads from `config`)
# ----------------------------------------------------------------------------
class Config:
    lstm_size = 32
    num_lstm_layer = 2
    num_branches = 5
    node_num = 2
    temperature = 5.0
    tanh_constant = 1.10
    op_tanh_constant = 1.10 / 2.5


_LANES = 128          # lane-dense width for logits / arc outputs
_NEG = -1e30          # "minus infinity" for padded / invalid lanes

_VMEM = pl.BlockSpec(memory_space=pltpu.MemorySpace.VMEM)


# ----------------------------------------------------------------------------
# Single fused kernel: whole MicroController.forward
# ----------------------------------------------------------------------------
def _controller_kernel(prev_h_ref, prev_c_ref,
                       lstm_w_ref, lstm_b_ref,
                       g_emb_ref, w_emb_ref,
                       w1_ref, w2_ref, ws_ref,
                       bias_ref, gumbel_ref,
                       h_out_ref, c_out_ref, arc_ref, logits_ref,
                       *, num_layers, hidden, num_branches, node_num,
                       temperature, tanh_constant, op_tanh_constant):
    H = hidden
    NL = num_layers
    B = num_branches

    lane = jax.lax.broadcasted_iota(jnp.int32, (1, _LANES), 1)

    # ---- consolidated bias pack rows ----------------------------------------
    w1b = bias_ref[0:1, 0:H]          # w_attn_1 bias          (1, H)
    w2b = bias_ref[1:2, 0:H]          # w_attn_2 bias          (1, H)
    v_row = bias_ref[2:3, 0:H]        # v_attn weight row      (1, H)
    vb = bias_ref[3:4, 0:1]           # v_attn bias            (1, 1)
    wsb = bias_ref[4:5, :]            # w_soft bias (padded)   (1, 128)
    bs = bias_ref[5:6, :]             # b_soft (padded)        (1, 128)
    bsnl = bias_ref[6:7, :]           # b_soft_no_learn        (1, 128)

    # ---- single-timestep multi-layer LSTM (x@Wih + h@Whh, no concat) -------
    def lstm_step(x, h_list, c_list):
        new_h, new_c = [], []
        for l in range(NL):
            w = lstm_w_ref[l]                                       # (2H, 4H)
            gates = (jnp.dot(x, w[:H, :], preferred_element_type=jnp.float32)
                     + jnp.dot(h_list[l], w[H:, :],
                               preferred_element_type=jnp.float32)
                     + lstm_b_ref[l:l + 1, :])                      # (1, 4H)
            sig = jax.nn.sigmoid(gates)     # one EUP pass over the full vreg
            tnh = jnp.tanh(gates)           # one EUP pass over the full vreg
            i_g = sig[:, 0 * H:1 * H]
            f_g = sig[:, 1 * H:2 * H]
            g_g = tnh[:, 2 * H:3 * H]
            o_g = sig[:, 3 * H:4 * H]
            c_new = f_g * c_list[l] + i_g * g_g
            h_new = o_g * jnp.tanh(c_new)
            new_h.append(h_new)
            new_c.append(c_new)
            x = h_new
        return x, new_h, new_c              # x == h[-1]

    def attn1(h_last):                      # w_attn_1(h[-1]) -> (1, H)
        return (jnp.dot(h_last, w1_ref[...],
                        preferred_element_type=jnp.float32) + w1b)

    # ---- index-sampler logits: batched tanh + single lane reduce -----------
    def index_logits_row(h_last, anchors_w_list):
        n_valid = len(anchors_w_list)
        hw = (jnp.dot(h_last, w2_ref[...],
                      preferred_element_type=jnp.float32) + w2b)    # (1, H)
        q = jnp.concatenate(anchors_w_list, axis=0)                 # (nv, H)
        t = jnp.tanh(q + hw)                                        # (nv, H)
        lj = jnp.sum(t * v_row, axis=-1, keepdims=True) + vb        # (nv, 1)
        if temperature is not None:
            lj = lj / temperature
        if tanh_constant is not None:
            lj = tanh_constant * jnp.tanh(lj)
        row = jnp.full((1, _LANES), _NEG, jnp.float32)
        for j in range(n_valid):            # cheap VPU selects
            row = jnp.where(lane == j, lj[j:j + 1, :], row)
        return row

    # ---- op-sampler logits, lane-dense (1, 128) -----------------------------
    def opt_logits_row(h_last):
        logits = (jnp.dot(h_last, ws_ref[...],
                          preferred_element_type=jnp.float32)
                  + wsb + bs)                                       # (1, 128)
        if temperature is not None:
            logits = logits / temperature
        if op_tanh_constant is not None:
            logits = op_tanh_constant * jnp.tanh(logits)
        logits = logits + bsnl
        row_samp = jnp.where(lane < B, logits, _NEG)
        return logits, row_samp

    # ---- Gumbel-max sampling with a SINGLE lane reduction -------------------
    # (float bits -> monotone int key, (127 - lane) packed in the low 7 bits)
    def sample(row, g_row):
        scores = row + g_row
        bits = jax.lax.bitcast_convert_type(scores, jnp.int32)
        keys = jnp.where(bits < 0,
                         jnp.bitwise_xor(bits, jnp.int32(0x7FFFFFFF)),
                         bits)
        keys = jnp.bitwise_or(jnp.bitwise_and(keys, jnp.int32(-_LANES)),
                              (_LANES - 1) - lane)
        win = jnp.max(keys, axis=-1, keepdims=True)                 # (1, 1)
        idx = (_LANES - 1) - jnp.bitwise_and(win, jnp.int32(_LANES - 1))
        return idx.astype(jnp.int32)                                # (1, 1)

    def select_anchor(idx, anchors):
        sel = anchors[0]
        for j in range(1, len(anchors)):
            sel = jnp.where(idx == j, anchors[j], sel)
        return sel

    def select_w_emb(idx):
        rows = jax.lax.broadcasted_iota(jnp.int32, (B, H), 0)
        return jnp.sum(jnp.where(rows == idx, w_emb_ref[...], 0.0),
                       axis=0, keepdims=True)

    # ------------------- forward (statically unrolled) ----------------------
    h = [prev_h_ref[l:l + 1, :] for l in range(NL)]
    c = [prev_c_ref[l:l + 1, :] for l in range(NL)]
    g_emb = g_emb_ref[...]

    anchors, anchors_w = [], []
    arc_rows, logit_rows = [], []

    # _sample_input_nodes: 2 LSTM steps, seed two zero anchors
    for _ in range(2):
        top, h, c = lstm_step(g_emb, h, c)
        anchors.append(jnp.zeros((1, H), jnp.float32))
        anchors_w.append(attn1(top))

    step = 0
    for _node in range(node_num):
        inputs = g_emb

        # two index-sampling steps
        for _ in range(2):
            top, h, c = lstm_step(inputs, h, c)
            row = index_logits_row(top, anchors_w)
            idx = sample(row, gumbel_ref[step:step + 1, :])
            logit_rows.append(row)
            arc_rows.append(jnp.broadcast_to(idx, (1, _LANES)))
            inputs = select_anchor(idx, anchors)
            step += 1

        # two operation-sampling steps
        for _ in range(2):
            top, h, c = lstm_step(inputs, h, c)
            row_out, row_samp = opt_logits_row(top)
            idx = sample(row_samp, gumbel_ref[step:step + 1, :])
            logit_rows.append(row_out)
            arc_rows.append(jnp.broadcast_to(idx, (1, _LANES)))
            inputs = select_w_emb(idx)
            step += 1

        # _add_node_to_anchors: one more LSTM step, record h[-1]
        top, h, c = lstm_step(inputs, h, c)
        anchors.append(top)
        anchors_w.append(attn1(top))

    # single full-tile stores at kernel end
    h_out_ref[...] = jnp.concatenate(h, axis=0)
    c_out_ref[...] = jnp.concatenate(c, axis=0)
    arc_ref[...] = jnp.concatenate(arc_rows, axis=0)
    logits_ref[...] = jnp.concatenate(logit_rows, axis=0)


# ----------------------------------------------------------------------------
# Deterministic parameter initialization (synthetic — no checkpoint load)
# ----------------------------------------------------------------------------
def init_params(key, cfg):
    H, NL, B = cfg.lstm_size, cfg.num_lstm_layer, cfg.num_branches
    ks = jax.random.split(key, 16)
    s = 0.1

    def rnd(k, shape):
        return s * jax.random.normal(k, shape, jnp.float32)

    # nn.LSTM weights per layer, pre-transposed and stacked as [W_ih; W_hh]
    # -> (NL, 2H, 4H); the two bias vectors are summed -> (NL, 4H).
    lstm_w = jnp.stack([jnp.concatenate([rnd(ks[0 + l], (H, 4 * H)),
                                         rnd(ks[2 + l], (H, 4 * H))], axis=0)
                        for l in range(NL)])
    lstm_b = jnp.stack([rnd(ks[4 + l], (4 * H,)) + rnd(ks[6 + l], (4 * H,))
                        for l in range(NL)])

    w1b = rnd(ks[11], (H,))
    w2b = rnd(ks[13], (H,))
    v_w = rnd(ks[14], (H,))
    v_b = rnd(ks[15], (1,))
    w_soft_wt = rnd(jax.random.fold_in(key, 100), (H, B))
    w_soft_b = rnd(jax.random.fold_in(key, 101), (B,))
    b_soft = jnp.array([10.0] * 2 + [0.0] * (B - 2), jnp.float32)
    b_soft_nl = jnp.array([0.25] * 2 + [-0.25] * (B - 2), jnp.float32)

    # consolidated (8, 128) bias/row pack
    bias_pack = jnp.zeros((8, _LANES), jnp.float32)
    bias_pack = bias_pack.at[0, :H].set(w1b)            # w_attn_1 bias
    bias_pack = bias_pack.at[1, :H].set(w2b)            # w_attn_2 bias
    bias_pack = bias_pack.at[2, :H].set(v_w)            # v_attn weight row
    bias_pack = bias_pack.at[3, 0].set(v_b[0])          # v_attn bias
    bias_pack = bias_pack.at[4, :B].set(w_soft_b)       # w_soft bias
    bias_pack = bias_pack.at[5, :B].set(b_soft)         # b_soft
    bias_pack = bias_pack.at[6, :B].set(b_soft_nl)      # b_soft_no_learn

    return {
        "lstm_w": lstm_w,                                  # (NL, 2H, 4H)
        "lstm_b": lstm_b,                                  # (NL, 4H)
        "g_emb": rnd(ks[8], (1, H)),
        "w_emb": rnd(ks[9], (B, H)),
        "w_attn_1_wt": rnd(ks[10], (H, H)),
        "w_attn_2_wt": rnd(ks[12], (H, H)),
        # op-sampler weights padded to lane width 128 for lane-dense logits
        "w_soft_wt": jnp.zeros((H, _LANES), jnp.float32).at[:, :B].set(w_soft_wt),
        "bias_pack": bias_pack,                            # (8, 128)
    }


# ----------------------------------------------------------------------------
# MicroController.forward — one jitted device function, one fused pallas_call,
# a single device->host sync (the sampled arc sequence).
# ----------------------------------------------------------------------------
def _make_forward(cfg):
    NL, H, B = cfg.num_lstm_layer, cfg.lstm_size, cfg.num_branches
    node_num = cfg.node_num
    n_steps = 4 * node_num

    kernel = functools.partial(
        _controller_kernel,
        num_layers=NL, hidden=H, num_branches=B, node_num=node_num,
        temperature=cfg.temperature, tanh_constant=cfg.tanh_constant,
        op_tanh_constant=cfg.op_tanh_constant)

    @jax.jit
    def fwd(params, prev_h, prev_c, sample_key):
        # Gumbel noise precomputed outside the kernel / recurrence.
        gumbel = jax.random.gumbel(sample_key, (n_steps, _LANES), jnp.float32)

        h2, c2, arc_rows, logits_rows = pl.pallas_call(
            kernel,
            out_shape=(jax.ShapeDtypeStruct((NL, H), jnp.float32),
                       jax.ShapeDtypeStruct((NL, H), jnp.float32),
                       jax.ShapeDtypeStruct((n_steps, _LANES), jnp.int32),
                       jax.ShapeDtypeStruct((n_steps, _LANES), jnp.float32)),
            in_specs=[_VMEM] * 11,
            out_specs=(_VMEM, _VMEM, _VMEM, _VMEM),
        )(prev_h[:, 0, :], prev_c[:, 0, :],
          params["lstm_w"], params["lstm_b"],
          params["g_emb"], params["w_emb"],
          params["w_attn_1_wt"], params["w_attn_2_wt"], params["w_soft_wt"],
          params["bias_pack"], gumbel)

        h = h2[:, None, :]                  # (NL, 1, H) — torch LSTM layout
        c = c2[:, None, :]
        arc = arc_rows[:, 0]                # (n_steps,) int32

        logits = []
        s = 0
        for node in range(node_num):
            nv = 2 + node
            logits.append([logits_rows[s + 0:s + 1, :nv],
                           logits_rows[s + 1:s + 2, :nv],
                           logits_rows[s + 2:s + 3, :B],
                           logits_rows[s + 3:s + 4, :B]])
            s += 4
        return h, c, arc, logits

    return fwd


class MicroControllerPallas:
    def __init__(self, cfg, param_key):
        self.cfg = cfg
        self.params = init_params(param_key, cfg)
        self._fwd = _make_forward(cfg)

    def forward(self, prev_h=None, prev_c=None, sample_key=None):
        cfg = self.cfg
        NL, H = cfg.num_lstm_layer, cfg.lstm_size
        if prev_h is None and prev_c is None:
            prev_h = jnp.zeros((NL, 1, H), jnp.float32)
            prev_c = jnp.zeros((NL, 1, H), jnp.float32)
        else:
            assert prev_h is not None and prev_c is not None, \
                "prev_c and prev_h must both be None or both be given"
        if sample_key is None:
            sample_key = jax.random.PRNGKey(0)

        h, c, arc, logits = self._fwd(self.params, prev_h, prev_c, sample_key)

        # single device->host transfer for the sampled architecture sequence
        arc_seq = [int(v) for v in jax.device_get(arc)]
        assert len(arc_seq) // 4 == len(logits)
        return (h, c), arc_seq, logits


# ----------------------------------------------------------------------------
if __name__ == "__main__":
    cfg = Config()
    root = jax.random.PRNGKey(0)
    kp, ks1, ks2 = jax.random.split(root, 3)

    controller = MicroControllerPallas(cfg, kp)

    # normal cell: no previous state (zeros)
    (h, c), arc_seq, logits = controller.forward(sample_key=ks1)

    # reduction cell: feed back the previous LSTM state
    (h, c), arc_seq2, logits2 = controller.forward(h, c, ks2)

    jax.block_until_ready(h)
    jax.block_until_ready(c)
    jax.block_until_ready(logits)
    jax.block_until_ready(logits2)

    assert len(arc_seq) == 4 * cfg.node_num == len(arc_seq2)
    assert len(logits) == cfg.node_num == len(logits2)
    for n in range(cfg.node_num):
        assert logits[n][0].shape == (1, 2 + n)
        assert logits[n][1].shape == (1, 2 + n)
        assert logits[n][2].shape == (1, cfg.num_branches)
        assert logits[n][3].shape == (1, cfg.num_branches)
        assert 0 <= arc_seq[4 * n + 0] < 2 + n
        assert 0 <= arc_seq[4 * n + 1] < 2 + n
        assert 0 <= arc_seq[4 * n + 2] < cfg.num_branches
        assert 0 <= arc_seq[4 * n + 3] < cfg.num_branches
        assert 0 <= arc_seq2[4 * n + 0] < 2 + n
        assert 0 <= arc_seq2[4 * n + 1] < 2 + n
        assert 0 <= arc_seq2[4 * n + 2] < cfg.num_branches
        assert 0 <= arc_seq2[4 * n + 3] < cfg.num_branches
    print("KERNEL_OK")
</pallas_src>

<mosaic_0001>
module attributes {stable_mosaic.version = 11 : i64} {
  func.func @_controller_kernel(%arg0: memref<2x32xf32, #tpu.memory_space<vmem>>, %arg1: memref<2x32xf32, #tpu.memory_space<vmem>>, %arg2: memref<2x64x128xf32, #tpu.memory_space<vmem>>, %arg3: memref<2x128xf32, #tpu.memory_space<vmem>>, %arg4: memref<1x32xf32, #tpu.memory_space<vmem>>, %arg5: memref<5x32xf32, #tpu.memory_space<vmem>>, %arg6: memref<32x32xf32, #tpu.memory_space<vmem>>, %arg7: memref<32x32xf32, #tpu.memory_space<vmem>>, %arg8: memref<32x128xf32, #tpu.memory_space<vmem>>, %arg9: memref<8x128xf32, #tpu.memory_space<vmem>>, %arg10: memref<8x128xf32, #tpu.memory_space<vmem>>, %arg11: memref<2x32xf32, #tpu.memory_space<vmem>>, %arg12: memref<2x32xf32, #tpu.memory_space<vmem>>, %arg13: memref<8x128xi32, #tpu.memory_space<vmem>>, %arg14: memref<8x128xf32, #tpu.memory_space<vmem>>) attributes {dimension_semantics = [], scalar_prefetch = 0 : i64, scratch_operands = 0 : i64, tpu.core_type = #tpu.core_type<tc>} {
    %0 = tpu.iota {dimensions = array<i32: 1>} : vector<1x128xi32>
    %c0 = arith.constant 0 : index
    %c0_0 = arith.constant 0 : index
    %1 = vector.load %arg9[%c0, %c0_0] : memref<8x128xf32, #tpu.memory_space<vmem>>, vector<1x32xf32>
    %c1 = arith.constant 1 : index
    %c0_1 = arith.constant 0 : index
    %2 = vector.load %arg9[%c1, %c0_1] : memref<8x128xf32, #tpu.memory_space<vmem>>, vector<1x32xf32>
    %c2 = arith.constant 2 : index
    %c0_2 = arith.constant 0 : index
    %3 = vector.load %arg9[%c2, %c0_2] : memref<8x128xf32, #tpu.memory_space<vmem>>, vector<1x32xf32>
    %c3 = arith.constant 3 : index
    %c0_3 = arith.constant 0 : index
    %4 = vector.load %arg9[%c3, %c0_3] : memref<8x128xf32, #tpu.memory_space<vmem>>, vector<1x1xf32>
    %c4 = arith.constant 4 : index
    %c0_4 = arith.constant 0 : index
    %5 = vector.load %arg9[%c4, %c0_4] : memref<8x128xf32, #tpu.memory_space<vmem>>, vector<1x128xf32>
    %c5 = arith.constant 5 : index
    %c0_5 = arith.constant 0 : index
    %6 = vector.load %arg9[%c5, %c0_5] : memref<8x128xf32, #tpu.memory_space<vmem>>, vector<1x128xf32>
    %c6 = arith.constant 6 : index
    %c0_6 = arith.constant 0 : index
    %7 = vector.load %arg9[%c6, %c0_6] : memref<8x128xf32, #tpu.memory_space<vmem>>, vector<1x128xf32>
    %c0_7 = arith.constant 0 : index
    %c0_8 = arith.constant 0 : index
    %8 = vector.load %arg0[%c0_7, %c0_8] : memref<2x32xf32, #tpu.memory_space<vmem>>, vector<1x32xf32>
    %c1_9 = arith.constant 1 : index
    %c0_10 = arith.constant 0 : index
    %9 = vector.load %arg0[%c1_9, %c0_10] : memref<2x32xf32, #tpu.memory_space<vmem>>, vector<1x32xf32>
    %c0_11 = arith.constant 0 : index
    %c0_12 = arith.constant 0 : index
    %10 = vector.load %arg1[%c0_11, %c0_12] : memref<2x32xf32, #tpu.memory_space<vmem>>, vector<1x32xf32>
    %c1_13 = arith.constant 1 : index
    %c0_14 = arith.constant 0 : index
    %11 = vector.load %arg1[%c1_13, %c0_14] : memref<2x32xf32, #tpu.memory_space<vmem>>, vector<1x32xf32>
    %c0_15 = arith.constant 0 : index
    %c0_16 = arith.constant 0 : index
    %12 = vector.load %arg4[%c0_15, %c0_16] : memref<1x32xf32, #tpu.memory_space<vmem>>, vector<1x32xf32>
    %c0_17 = arith.constant 0 : index
    %c0_18 = arith.constant 0 : index
    %c0_19 = arith.constant 0 : index
    %13 = vector.load %arg2[%c0_17, %c0_18, %c0_19] : memref<2x64x128xf32, #tpu.memory_space<vmem>>, vector<1x64x128xf32>
    %14 = vector.shape_cast %13 : vector<1x64x128xf32> to vector<64x128xf32>
    %15 = vector.extract_strided_slice %14 {offsets = [0, 0], sizes = [32, 128], strides = [1, 1]} : vector<64x128xf32> to vector<32x128xf32>
    %cst = arith.constant dense<0.000000e+00> : vector<1x128xf32>
    %16 = tpu.matmul %12, %15, %cst {dimension_numbers = #tpu.dot_dimension_numbers<[1], [0], [0], [1], [0, 0, 1, 1], [], []>} : vector<1x32xf32>, vector<32x128xf32>, vector<1x128xf32> -> vector<1x128xf32>
    %17 = vector.extract_strided_slice %14 {offsets = [32, 0], sizes = [32, 128], strides = [1, 1]} : vector<64x128xf32> to vector<32x128xf32>
    %cst_20 = arith.constant dense<0.000000e+00> : vector<1x128xf32>
    %18 = tpu.matmul %8, %17, %cst_20 {dimension_numbers = #tpu.dot_dimension_numbers<[1], [0], [0], [1], [0, 0, 1, 1], [], []>} : vector<1x32xf32>, vector<32x128xf32>, vector<1x128xf32> -> vector<1x128xf32>
    %19 = arith.addf %16, %18 : vector<1x128xf32>
    %c0_21 = arith.constant 0 : index
    %c0_22 = arith.constant 0 : index
    %20 = vector.load %arg3[%c0_21, %c0_22] : memref<2x128xf32, #tpu.memory_space<vmem>>, vector<1x128xf32>
    %21 = arith.addf %19, %20 : vector<1x128xf32>
    %22 = arith.negf %21 : vector<1x128xf32>
    %23 = math.exp %22 : vector<1x128xf32>
    %cst_23 = arith.constant 1.000000e+00 : f32
    %24 = vector.broadcast %cst_23 : f32 to vector<1x128xf32>
    %25 = arith.addf %24, %23 : vector<1x128xf32>
    %26 = arith.divf %24, %25 : vector<1x128xf32>
    %27 = math.tanh %21 : vector<1x128xf32>
    %28 = vector.extract_strided_slice %26 {offsets = [0, 0], sizes = [1, 32], strides = [1, 1]} : vector<1x128xf32> to vector<1x32xf32>
    %29 = vector.extract_strided_slice %26 {offsets = [0, 32], sizes = [1, 32], strides = [1, 1]} : vector<1x128xf32> to vector<1x32xf32>
    %30 = vector.extract_strided_slice %27 {offsets = [0, 64], sizes = [1, 32], strides = [1, 1]} : vector<1x128xf32> to vector<1x32xf32>
    %31 = vector.extract_strided_slice %26 {offsets = [0, 96], sizes = [1, 32], strides = [1, 1]} : vector<1x128xf32> to vector<1x32xf32>
    %32 = arith.mulf %29, %10 : vector<1x32xf32>
    %33 = arith.mulf %28, %30 : vector<1x32xf32>
    %34 = arith.addf %32, %33 : vector<1x32xf32>
    %35 = math.tanh %34 : vector<1x32xf32>
    %36 = arith.mulf %31, %35 : vector<1x32xf32>
    %c1_24 = arith.constant 1 : index
    %c0_25 = arith.constant 0 : index
    %c0_26 = arith.constant 0 : index
    %37 = vector.load %arg2[%c1_24, %c0_25, %c0_26] : memref<2x64x128xf32, #tpu.memory_space<vmem>>, vector<1x64x128xf32>
    %38 = vector.shape_cast %37 : vector<1x64x128xf32> to vector<64x128xf32>
    %39 = vector.extract_strided_slice %38 {offsets = [0, 0], sizes = [32, 128], strides = [1, 1]} : vector<64x128xf32> to vector<32x128xf32>
    %cst_27 = arith.constant dense<0.000000e+00> : vector<1x128xf32>
    %40 = tpu.matmul %36, %39, %cst_27 {dimension_numbers = #tpu.dot_dimension_numbers<[1], [0], [0], [1], [0, 0, 1, 1], [], []>} : vector<1x32xf32>, vector<32x128xf32>, vector<1x128xf32> -> vector<1x128xf32>
    %41 = vector.extract_strided_slice %38 {offsets = [32, 0], sizes = [32, 128], strides = [1, 1]} : vector<64x128xf32> to vector<32x128xf32>
    %cst_28 = arith.constant dense<0.000000e+00> : vector<1x128xf32>
    %42 = tpu.matmul %9, %41, %cst_28 {dimension_numbers = #tpu.dot_dimension_numbers<[1], [0], [0], [1], [0, 0, 1, 1], [], []>} : vector<1x32xf32>, vector<32x128xf32>, vector<1x128xf32> -> vector<1x128xf32>
    %43 = arith.addf %40, %42 : vector<1x128xf32>
    %c1_29 = arith.constant 1 : index
    %c0_30 = arith.constant 0 : index
    %44 = vector.load %arg3[%c1_29, %c0_30] : memref<2x128xf32, #tpu.memory_space<vmem>>, vector<1x128xf32>
    %45 = arith.addf %43, %44 : vector<1x128xf32>
    %46 = arith.negf %45 : vector<1x128xf32>
    %47 = math.exp %46 : vector<1x128xf32>
    %cst_31 = arith.constant 1.000000e+00 : f32
    %48 = vector.broadcast %cst_31 : f32 to vector<1x128xf32>
    %49 = arith.addf %48, %47 : vector<1x128xf32>
    %50 = arith.divf %48, %49 : vector<1x128xf32>
    %51 = math.tanh %45 : vector<1x128xf32>
    %52 = vector.extract_strided_slice %50 {offsets = [0, 0], sizes = [1, 32], strides = [1, 1]} : vector<1x128xf32> to vector<1x32xf32>
    %53 = vector.extract_strided_slice %50 {offsets = [0, 32], sizes = [1, 32], strides = [1, 1]} : vector<1x128xf32> to vector<1x32xf32>
    %54 = vector.extract_strided_slice %51 {offsets = [0, 64], sizes = [1, 32], strides = [1, 1]} : vector<1x128xf32> to vector<1x32xf32>
    %55 = vector.extract_strided_slice %50 {offsets = [0, 96], sizes = [1, 32], strides = [1, 1]} : vector<1x128xf32> to vector<1x32xf32>
    %56 = arith.mulf %53, %11 : vector<1x32xf32>
    %57 = arith.mulf %52, %54 : vector<1x32xf32>
    %58 = arith.addf %56, %57 : vector<1x32xf32>
    %59 = math.tanh %58 : vector<1x32xf32>
    %60 = arith.mulf %55, %59 : vector<1x32xf32>
    %cst_32 = arith.constant 0.000000e+00 : f32
    %61 = vector.broadcast %cst_32 : f32 to vector<1x32xf32>
    %c0_33 = arith.constant 0 : index
    %c0_34 = arith.constant 0 : index
    %62 = vector.load %arg6[%c0_33, %c0_34] : memref<32x32xf32, #tpu.memory_space<vmem>>, vector<32x32xf32>
    %cst_35 = arith.constant dense<0.000000e+00> : vector<1x32xf32>
    %63 = tpu.matmul %60, %62, %cst_35 {dimension_numbers = #tpu.dot_dimension_numbers<[1], [0], [0], [1], [0, 0, 1, 1], [], []>} : vector<1x32xf32>, vector<32x32xf32>, vector<1x32xf32> -> vector<1x32xf32>
    %64 = arith.addf %63, %1 : vector<1x32xf32>
    %c0_36 = arith.constant 0 : index
    %c0_37 = arith.constant 0 : index
    %c0_38 = arith.constant 0 : index
    %65 = vector.load %arg2[%c0_36, %c0_37, %c0_38] : memref<2x64x128xf32, #tpu.memory_space<vmem>>, vector<1x64x128xf32>
    %66 = vector.shape_cast %65 : vector<1x64x128xf32> to vector<64x128xf32>
    %67 = vector.extract_strided_slice %66 {offsets = [0, 0], sizes = [32, 128], strides = [1, 1]} : vector<64x128xf32> to vector<32x128xf32>
    %cst_39 = arith.constant dense<0.000000e+00> : vector<1x128xf32>
    %68 = tpu.matmul %12, %67, %cst_39 {dimension_numbers = #tpu.dot_dimension_numbers<[1], [0], [0], [1], [0, 0, 1, 1], [], []>} : vector<1x32xf32>, vector<32x128xf32>, vector<1x128xf32> -> vector<1x128xf32>
    %69 = vector.extract_strided_slice %66 {offsets = [32, 0], sizes = [32, 128], strides = [1, 1]} : vector<64x128xf32> to vector<32x128xf32>
    %cst_40 = arith.constant dense<0.000000e+00> : vector<1x128xf32>
    %70 = tpu.matmul %36, %69, %cst_40 {dimension_numbers = #tpu.dot_dimension_numbers<[1], [0], [0], [1], [0, 0, 1, 1], [], []>} : vector<1x32xf32>, vector<32x128xf32>, vector<1x128xf32> -> vector<1x128xf32>
    %71 = arith.addf %68, %70 : vector<1x128xf32>
    %c0_41 = arith.constant 0 : index
    %c0_42 = arith.constant 0 : index
    %72 = vector.load %arg3[%c0_41, %c0_42] : memref<2x128xf32, #tpu.memory_space<vmem>>, vector<1x128xf32>
    %73 = arith.addf %71, %72 : vector<1x128xf32>
    %74 = arith.negf %73 : vector<1x128xf32>
    %75 = math.exp %74 : vector<1x128xf32>
    %cst_43 = arith.constant 1.000000e+00 : f32
    %76 = vector.broadcast %cst_43 : f32 to vector<1x128xf32>
    %77 = arith.addf %76, %75 : vector<1x128xf32>
    %78 = arith.divf %76, %77 : vector<1x128xf32>
    %79 = math.tanh %73 : vector<1x128xf32>
    %80 = vector.extract_strided_slice %78 {offsets = [0, 0], sizes = [1, 32], strides = [1, 1]} : vector<1x128xf32> to vector<1x32xf32>
    %81 = vector.extract_strided_slice %78 {offsets = [0, 32], sizes = [1, 32], strides = [1, 1]} : vector<1x128xf32> to vector<1x32xf32>
    %82 = vector.extract_strided_slice %79 {offsets = [0, 64], sizes = [1, 32], strides = [1, 1]} : vector<1x128xf32> to vector<1x32xf32>
    %83 = vector.extract_strided_slice %78 {offsets = [0, 96], sizes = [1, 32], strides = [1, 1]} : vector<1x128xf32> to vector<1x32xf32>
    %84 = arith.mulf %81, %34 : vector<1x32xf32>
    %85 = arith.mulf %80, %82 : vector<1x32xf32>
    %86 = arith.addf %84, %85 : vector<1x32xf32>
    %87 = math.tanh %86 : vector<1x32xf32>
    %88 = arith.mulf %83, %87 : vector<1x32xf32>
    %c1_44 = arith.constant 1 : index
    %c0_45 = arith.constant 0 : index
    %c0_46 = arith.constant 0 : index
    %89 = vector.load %arg2[%c1_44, %c0_45, %c0_46] : memref<2x64x128xf32, #tpu.memory_space<vmem>>, vector<1x64x128xf32>
    %90 = vector.shape_cast %89 : vector<1x64x128xf32> to vector<64x128xf32>
    %91 = vector.extract_strided_slice %90 {offsets = [0, 0], sizes = [32, 128], strides = [1, 1]} : vector<64x128xf32> to vector<32x128xf32>
    %cst_47 = arith.constant dense<0.000000e+00> : vector<1x128xf32>
    %92 = tpu.matmul %88, %91, %cst_47 {dimension_numbers = #tpu.dot_dimension_numbers<[1], [0], [0], [1], [0, 0, 1, 1], [], []>} : vector<1x32xf32>, vector<32x128xf32>, vector<1x128xf32> -> vector<1x128xf32>
    %93 = vector.extract_strided_slice %90 {offsets = [32, 0], sizes = [32, 128], strides = [1, 1]} : vector<64x128xf32> to vector<32x128xf32>
    %cst_48 = arith.constant dense<0.000000e+00> : vector<1x128xf32>
    %94 = tpu.matmul %60, %93, %cst_48 {dimension_numbers = #tpu.dot_dimension_numbers<[1], [0], [0], [1], [0, 0, 1, 1], [], []>} : vector<1x32xf32>, vector<32x128xf32>, vector<1x128xf32> -> vector<1x128xf32>
    %95 = arith.addf %92, %94 : vector<1x128xf32>
    %c1_49 = arith.constant 1 : index
    %c0_50 = arith.constant 0 : index
    %96 = vector.load %arg3[%c1_49, %c0_50] : memref<2x128xf32, #tpu.memory_space<vmem>>, vector<1x128xf32>
    %97 = arith.addf %95, %96 : vector<1x128xf32>
    %98 = arith.negf %97 : vector<1x128xf32>
    %99 = math.exp %98 : vector<1x128xf32>
    %cst_51 = arith.constant 1.000000e+00 : f32
    %100 = vector.broadcast %cst_51 : f32 to vector<1x128xf32>
    %101 = arith.addf %100, %99 : vector<1x128xf32>
    %102 = arith.divf %100, %101 : vector<1x128xf32>
    %103 = math.tanh %97 : vector<1x128xf32>
    %104 = vector.extract_strided_slice %102 {offsets = [0, 0], sizes = [1, 32], strides = [1, 1]} : vector<1x128xf32> to vector<1x32xf32>
    %105 = vector.extract_strided_slice %102 {offsets = [0, 32], sizes = [1, 32], strides = [1, 1]} : vector<1x128xf32> to vector<1x32xf32>
    %106 = vector.extract_strided_slice %103 {offsets = [0, 64], sizes = [1, 32], strides = [1, 1]} : vector<1x128xf32> to vector<1x32xf32>
    %107 = vector.extract_strided_slice %102 {offsets = [0, 96], sizes = [1, 32], strides = [1, 1]} : vector<1x128xf32> to vector<1x32xf32>
    %108 = arith.mulf %105, %58 : vector<1x32xf32>
    %109 = arith.mulf %104, %106 : vector<1x32xf32>
    %110 = arith.addf %108, %109 : vector<1x32xf32>
    %111 = math.tanh %110 : vector<1x32xf32>
    %112 = arith.mulf %107, %111 : vector<1x32xf32>
    %cst_52 = arith.constant 0.000000e+00 : f32
    %113 = vector.broadcast %cst_52 : f32 to vector<1x32xf32>
    %c0_53 = arith.constant 0 : index
    %c0_54 = arith.constant 0 : index
    %114 = vector.load %arg6[%c0_53, %c0_54] : memref<32x32xf32, #tpu.memory_space<vmem>>, vector<32x32xf32>
    %cst_55 = arith.constant dense<0.000000e+00> : vector<1x32xf32>
    %115 = tpu.matmul %112, %114, %cst_55 {dimension_numbers = #tpu.dot_dimension_numbers<[1], [0], [0], [1], [0, 0, 1, 1], [], []>} : vector<1x32xf32>, vector<32x32xf32>, vector<1x32xf32> -> vector<1x32xf32>
    %116 = arith.addf %115, %1 : vector<1x32xf32>
    %c0_56 = arith.constant 0 : index
    %c0_57 = arith.constant 0 : index
    %c0_58 = arith.constant 0 : index
    %117 = vector.load %arg2[%c0_56, %c0_57, %c0_58] : memref<2x64x128xf32, #tpu.memory_space<vmem>>, vector<1x64x128xf32>
    %118 = vector.shape_cast %117 : vector<1x64x128xf32> to vector<64x128xf32>
    %119 = vector.extract_strided_slice %118 {offsets = [0, 0], sizes = [32, 128], strides = [1, 1]} : vector<64x128xf32> to vector<32x128xf32>
    %cst_59 = arith.constant dense<0.000000e+00> : vector<1x128xf32>
    %120 = tpu.matmul %12, %119, %cst_59 {dimension_numbers = #tpu.dot_dimension_numbers<[1], [0], [0], [1], [0, 0, 1, 1], [], []>} : vector<1x32xf32>, vector<32x128xf32>, vector<1x128xf32> -> vector<1x128xf32>
    %121 = vector.extract_strided_slice %118 {offsets = [32, 0], sizes = [32, 128], strides = [1, 1]} : vector<64x128xf32> to vector<32x128xf32>
    %cst_60 = arith.constant dense<0.000000e+00> : vector<1x128xf32>
    %122 = tpu.matmul %88, %121, %cst_60 {dimension_numbers = #tpu.dot_dimension_numbers<[1], [0], [0], [1], [0, 0, 1, 1], [], []>} : vector<1x32xf32>, vector<32x128xf32>, vector<1x128xf32> -> vector<1x128xf32>
    %123 = arith.addf %120, %122 : vector<1x128xf32>
    %c0_61 = arith.constant 0 : index
    %c0_62 = arith.constant 0 : index
    %124 = vector.load %arg3[%c0_61, %c0_62] : memref<2x128xf32, #tpu.memory_space<vmem>>, vector<1x128xf32>
    %125 = arith.addf %123, %124 : vector<1x128xf32>
    %126 = arith.negf %125 : vector<1x128xf32>
    %127 = math.exp %126 : vector<1x128xf32>
    %cst_63 = arith.constant 1.000000e+00 : f32
    %128 = vector.broadcast %cst_63 : f32 to vector<1x128xf32>
    %129 = arith.addf %128, %127 : vector<1x128xf32>
    %130 = arith.divf %128, %129 : vector<1x128xf32>
    %131 = math.tanh %125 : vector<1x128xf32>
    %132 = vector.extract_strided_slice %130 {offsets = [0, 0], sizes = [1, 32], strides = [1, 1]} : vector<1x128xf32> to vector<1x32xf32>
    %133 = vector.extract_strided_slice %130 {offsets = [0, 32], sizes = [1, 32], strides = [1, 1]} : vector<1x128xf32> to vector<1x32xf32>
    %134 = vector.extract_strided_slice %131 {offsets = [0, 64], sizes = [1, 32], strides = [1, 1]} : vector<1x128xf32> to vector<1x32xf32>
    %135 = vector.extract_strided_slice %130 {offsets = [0, 96], sizes = [1, 32], strides = [1, 1]} : vector<1x128xf32> to vector<1x32xf32>
    %136 = arith.mulf %133, %86 : vector<1x32xf32>
    %137 = arith.mulf %132, %134 : vector<1x32xf32>
    %138 = arith.addf %136, %137 : vector<1x32xf32>
    %139 = math.tanh %138 : vector<1x32xf32>
    %140 = arith.mulf %135, %139 : vector<1x32xf32>
    %c1_64 = arith.constant 1 : index
    %c0_65 = arith.constant 0 : index
    %c0_66 = arith.constant 0 : index
    %141 = vector.load %arg2[%c1_64, %c0_65, %c0_66] : memref<2x64x128xf32, #tpu.memory_space<vmem>>, vector<1x64x128xf32>
    %142 = vector.shape_cast %141 : vector<1x64x128xf32> to vector<64x128xf32>
    %143 = vector.extract_strided_slice %142 {offsets = [0, 0], sizes = [32, 128], strides = [1, 1]} : vector<64x128xf32> to vector<32x128xf32>
    %cst_67 = arith.constant dense<0.000000e+00> : vector<1x128xf32>
    %144 = tpu.matmul %140, %143, %cst_67 {dimension_numbers = #tpu.dot_dimension_numbers<[1], [0], [0], [1], [0, 0, 1, 1], [], []>} : vector<1x32xf32>, vector<32x128xf32>, vector<1x128xf32> -> vector<1x128xf32>
    %145 = vector.extract_strided_slice %142 {offsets = [32, 0], sizes = [32, 128], strides = [1, 1]} : vector<64x128xf32> to vector<32x128xf32>
    %cst_68 = arith.constant dense<0.000000e+00> : vector<1x128xf32>
    %146 = tpu.matmul %112, %145, %cst_68 {dimension_numbers = #tpu.dot_dimension_numbers<[1], [0], [0], [1], [0, 0, 1, 1], [], []>} : vector<1x32xf32>, vector<32x128xf32>, vector<1x128xf32> -> vector<1x128xf32>
    %147 = arith.addf %144, %146 : vector<1x128xf32>
    %c1_69 = arith.constant 1 : index
    %c0_70 = arith.constant 0 : index
    %148 = vector.load %arg3[%c1_69, %c0_70] : memref<2x128xf32, #tpu.memory_space<vmem>>, vector<1x128xf32>
    %149 = arith.addf %147, %148 : vector<1x128xf32>
    %150 = arith.negf %149 : vector<1x128xf32>
    %151 = math.exp %150 : vector<1x128xf32>
    %cst_71 = arith.constant 1.000000e+00 : f32
    %152 = vector.broadcast %cst_71 : f32 to vector<1x128xf32>
    %153 = arith.addf %152, %151 : vector<1x128xf32>
    %154 = arith.divf %152, %153 : vector<1x128xf32>
    %155 = math.tanh %149 : vector<1x128xf32>
    %156 = vector.extract_strided_slice %154 {offsets = [0, 0], sizes = [1, 32], strides = [1, 1]} : vector<1x128xf32> to vector<1x32xf32>
    %157 = vector.extract_strided_slice %154 {offsets = [0, 32], sizes = [1, 32], strides = [1, 1]} : vector<1x128xf32> to vector<1x32xf32>
    %158 = vector.extract_strided_slice %155 {offsets = [0, 64], sizes = [1, 32], strides = [1, 1]} : vector<1x128xf32> to vector<1x32xf32>
    %159 = vector.extract_strided_slice %154 {offsets = [0, 96], sizes = [1, 32], strides = [1, 1]} : vector<1x128xf32> to vector<1x32xf32>
    %160 = arith.mulf %157, %110 : vector<1x32xf32>
    %161 = arith.mulf %156, %158 : vector<1x32xf32>
    %162 = arith.addf %160, %161 : vector<1x32xf32>
    %163 = math.tanh %162 : vector<1x32xf32>
    %164 = arith.mulf %159, %163 : vector<1x32xf32>
    %c0_72 = arith.constant 0 : index
    %c0_73 = arith.constant 0 : index
    %165 = vector.load %arg7[%c0_72, %c0_73] : memref<32x32xf32, #tpu.memory_space<vmem>>, vector<32x32xf32>
    %cst_74 = arith.constant dense<0.000000e+00> : vector<1x32xf32>
    %166 = tpu.matmul %164, %165, %cst_74 {dimension_numbers = #tpu.dot_dimension_numbers<[1], [0], [0], [1], [0, 0, 1, 1], [], []>} : vector<1x32xf32>, vector<32x32xf32>, vector<1x32xf32> -> vector<1x32xf32>
    %167 = arith.addf %166, %2 : vector<1x32xf32>
    %168 = tpu.concatenate %64, %116 in 0 : vector<1x32xf32>, vector<1x32xf32> -> vector<2x32xf32>
    %169 = vector.broadcast %167 : vector<1x32xf32> to vector<2x32xf32>
    %170 = arith.addf %168, %169 : vector<2x32xf32>
    %171 = math.tanh %170 : vector<2x32xf32>
    %172 = vector.broadcast %3 : vector<1x32xf32> to vector<2x32xf32>
    %173 = arith.mulf %171, %172 : vector<2x32xf32>
    %cst_75 = arith.constant dense<0.000000e+00> : vector<2xf32>
    %174 = vector.multi_reduction <add>, %173, %cst_75 [1] : vector<2x32xf32> to vector<2xf32>
    %175 = vector.shape_cast %174 : vector<2xf32> to vector<2x1xf32>
    %176 = vector.broadcast %4 : vector<1x1xf32> to vector<2x1xf32>
    %177 = arith.addf %175, %176 : vector<2x1xf32>
    %cst_76 = arith.constant 5.000000e+00 : f32
    %178 = vector.broadcast %cst_76 : f32 to vector<2x1xf32>
    %179 = arith.divf %177, %178 : vector<2x1xf32>
    %180 = math.tanh %179 : vector<2x1xf32>
    %cst_77 = arith.constant 1.100000e+00 : f32
    %181 = vector.broadcast %cst_77 : f32 to vector<2x1xf32>
    %182 = arith.mulf %181, %180 : vector<2x1xf32>
    %cst_78 = arith.constant -1.000000e+30 : f32
    %183 = vector.broadcast %cst_78 : f32 to vector<1x128xf32>
    %c0_i32 = arith.constant 0 : i32
    %184 = vector.broadcast %c0_i32 : i32 to vector<1x128xi32>
    %185 = arith.cmpi eq, %0, %184 : vector<1x128xi32>
    %186 = vector.extract_strided_slice %182 {offsets = [0, 0], sizes = [1, 1], strides = [1, 1]} : vector<2x1xf32> to vector<1x1xf32>
    %187 = vector.shape_cast %186 : vector<1x1xf32> to vector<1x1xf32>
    %188 = vector.broadcast %187 : vector<1x1xf32> to vector<1x128xf32>
    %189 = arith.select %185, %188, %183 : vector<1x128xi1>, vector<1x128xf32>
    %c1_i32 = arith.constant 1 : i32
    %190 = vector.broadcast %c1_i32 : i32 to vector<1x128xi32>
    %191 = arith.cmpi eq, %0, %190 : vector<1x128xi32>
    %192 = vector.extract_strided_slice %182 {offsets = [1, 0], sizes = [1, 1], strides = [1, 1]} : vector<2x1xf32> to vector<1x1xf32>
    %193 = vector.shape_cast %192 : vector<1x1xf32> to vector<1x1xf32>
    %194 = vector.broadcast %193 : vector<1x1xf32> to vector<1x128xf32>
    %195 = arith.select %191, %194, %189 : vector<1x128xi1>, vector<1x128xf32>
    %c0_79 = arith.constant 0 : index
    %c0_80 = arith.constant 0 : index
    %196 = vector.load %arg10[%c0_79, %c0_80] : memref<8x128xf32, #tpu.memory_space<vmem>>, vector<1x128xf32>
    %197 = arith.addf %195, %196 : vector<1x128xf32>
    %198 = tpu.bitcast %197 : vector<1x128xf32> -> vector<1x128xi32>
    %c0_i32_81 = arith.constant 0 : i32
    %199 = vector.broadcast %c0_i32_81 : i32 to vector<1x128xi32>
    %200 = arith.cmpi slt, %198, %199 : vector<1x128xi32>
    %c2147483647_i32 = arith.constant 2147483647 : i32
    %201 = vector.broadcast %c2147483647_i32 : i32 to vector<1x128xi32>
    %202 = arith.xori %198, %201 : vector<1x128xi32>
    %203 = arith.select %200, %202, %198 : vector<1x128xi1>, vector<1x128xi32>
    %c-128_i32 = arith.constant -128 : i32
    %204 = vector.broadcast %c-128_i32 : i32 to vector<1x128xi32>
    %205 = arith.andi %203, %204 : vector<1x128xi32>
    %c127_i32 = arith.constant 127 : i32
    %206 = vector.broadcast %c127_i32 : i32 to vector<1x128xi32>
    %207 = arith.subi %206, %0 : vector<1x128xi32>
    %208 = arith.ori %205, %207 : vector<1x128xi32>
    %cst_82 = arith.constant dense<-2147483648> : vector<1xi32>
    %209 = vector.multi_reduction <maxsi>, %208, %cst_82 [1] : vector<1x128xi32> to vector<1xi32>
    %210 = vector.shape_cast %209 : vector<1xi32> to vector<1x1xi32>
    %c127_i32_83 = arith.constant 127 : i32
    %211 = vector.broadcast %c127_i32_83 : i32 to vector<1x1xi32>
    %212 = arith.andi %210, %211 : vector<1x1xi32>
    %c127_i32_84 = arith.constant 127 : i32
    %213 = vector.broadcast %c127_i32_84 : i32 to vector<1x1xi32>
    %214 = arith.subi %213, %212 : vector<1x1xi32>
    %215 = vector.shape_cast %214 : vector<1x1xi32> to vector<1x1xi32>
    %216 = vector.broadcast %215 : vector<1x1xi32> to vector<1x128xi32>
    %c1_i32_85 = arith.constant 1 : i32
    %217 = vector.broadcast %c1_i32_85 : i32 to vector<1x1xi32>
    %218 = arith.cmpi eq, %214, %217 : vector<1x1xi32>
    %219 = vector.shape_cast %218 : vector<1x1xi1> to vector<1x1xi1>
    %220 = vector.broadcast %219 : vector<1x1xi1> to vector<1x32xi1>
    %221 = arith.select %220, %113, %61 : vector<1x32xi1>, vector<1x32xf32>
    %c0_86 = arith.constant 0 : index
    %c0_87 = arith.constant 0 : index
    %c0_88 = arith.constant 0 : index
    %222 = vector.load %arg2[%c0_86, %c0_87, %c0_88] : memref<2x64x128xf32, #tpu.memory_space<vmem>>, vector<1x64x128xf32>
    %223 = vector.shape_cast %222 : vector<1x64x128xf32> to vector<64x128xf32>
    %224 = vector.extract_strided_slice %223 {offsets = [0, 0], sizes = [32, 128], strides = [1, 1]} : vector<64x128xf32> to vector<32x128xf32>
    %cst_89 = arith.constant dense<0.000000e+00> : vector<1x128xf32>
    %225 = tpu.matmul %221, %224, %cst_89 {dimension_numbers = #tpu.dot_dimension_numbers<[1], [0], [0], [1], [0, 0, 1, 1], [], []>} : vector<1x32xf32>, vector<32x128xf32>, vector<1x128xf32> -> vector<1x128xf32>
    %226 = vector.extract_strided_slice %223 {offsets = [32, 0], sizes = [32, 128], strides = [1, 1]} : vector<64x128xf32> to vector<32x128xf32>
    %cst_90 = arith.constant dense<0.000000e+00> : vector<1x128xf32>
    %227 = tpu.matmul %140, %226, %cst_90 {dimension_numbers = #tpu.dot_dimension_numbers<[1], [0], [0], [1], [0, 0, 1, 1], [], []>} : vector<1x32xf32>, vector<32x128xf32>, vector<1x128xf32> -> vector<1x128xf32>
    %228 = arith.addf %225, %227 : vector<1x128xf32>
    %c0_91 = arith.constant 0 : index
    %c0_92 = arith.constant 0 : index
    %229 = vector.load %arg3[%c0_91, %c0_92] : memref<2x128xf32, #tpu.memory_space<vmem>>, vector<1x128xf32>
    %230 = arith.addf %228, %229 : vector<1x128xf32>
    %231 = arith.negf %230 : vector<1x128xf32>
    %232 = math.exp %231 : vector<1x128xf32>
    %cst_93 = arith.constant 1.000000e+00 : f32
    %233 = vector.broadcast %cst_93 : f32 to vector<1x128xf32>
    %234 = arith.addf %233, %232 : vector<1x128xf32>
    %235 = arith.divf %233, %234 : vector<1x128xf32>
    %236 = math.tanh %230 : vector<1x128xf32>
    %237 = vector.extract_strided_slice %235 {offsets = [0, 0], sizes = [1, 32], strides = [1, 1]} : vector<1x128xf32> to vector<1x32xf32>
    %238 = vector.extract_strided_slice %235 {offsets = [0, 32], sizes = [1, 32], strides = [1, 1]} : vector<1x128xf32> to vector<1x32xf32>
    %239 = vector.extract_strided_slice %236 {offsets = [0, 64], sizes = [1, 32], strides = [1, 1]} : vector<1x128xf32> to vector<1x32xf32>
    %240 = vector.extract_strided_slice %235 {offsets = [0, 96], sizes = [1, 32], strides = [1, 1]} : vector<1x128xf32> to vector<1x32xf32>
    %241 = arith.mulf %238, %138 : vector<1x32xf32>
    %242 = arith.mulf %237, %239 : vector<1x32xf32>
    %243 = arith.addf %241, %242 : vector<1x32xf32>
    %244 = math.tanh %243 : vector<1x32xf32>
    %245 = arith.mulf %240, %244 : vector<1x32xf32>
    %c1_94 = arith.constant 1 : index
    %c0_95 = arith.constant 0 : index
    %c0_96 = arith.constant 0 : index
    %246 = vector.load %arg2[%c1_94, %c0_95, %c0_96] : memref<2x64x128xf32, #tpu.memory_space<vmem>>, vector<1x64x128xf32>
    %247 = vector.shape_cast %246 : vector<1x64x128xf32> to vector<64x128xf32>
    %248 = vector.extract_strided_slice %247 {offsets = [0, 0], sizes = [32, 128], strides = [1, 1]} : vector<64x128xf32> to vector<32x128xf32>
    %cst_97 = arith.constant dense<0.000000e+00> : vector<1x128xf32>
    %249 = tpu.matmul %245, %248, %cst_97 {dimension_numbers = #tpu.dot_dimension_numbers<[1], [0], [0], [1], [0, 0, 1, 1], [], []>} : vector<1x32xf32>, vector<32x128xf32>, vector<1x128xf32> -> vector<1x128xf32>
    %250 = vector.extract_strided_slice %247 {offsets = [32, 0], sizes = [32, 128], strides = [1, 1]} : vector<64x128xf32> to vector<32x128xf32>
    %cst_98 = arith.constant dense<0.000000e+00> : vector<1x128xf32>
    %251 = tpu.matmul %164, %250, %cst_98 {dimension_numbers = #tpu.dot_dimension_numbers<[1], [0], [0], [1], [0, 0, 1, 1], [], []>} : vector<1x32xf32>, vector<32x128xf32>, vector<1x128xf32> -> vector<1x128xf32>
    %252 = arith.addf %249, %251 : vector<1x128xf32>
    %c1_99 = arith.constant 1 : index
    %c0_100 = arith.constant 0 : index
    %253 = vector.load %arg3[%c1_99, %c0_100] : memref<2x128xf32, #tpu.memory_space<vmem>>, vector<1x128xf32>
    %254 = arith.addf %252, %253 : vector<1x128xf32>
    %255 = arith.negf %254 : vector<1x128xf32>
    %256 = math.exp %255 : vector<1x128xf32>
    %cst_101 = arith.constant 1.000000e+00 : f32
    %257 = vector.broadcast %cst_101 : f32 to vector<1x128xf32>
    %258 = arith.addf %257, %256 : vector<1x128xf32>
    %259 = arith.divf %257, %258 : vector<1x128xf32>
    %260 = math.tanh %254 : vector<1x128xf32>
    %261 = vector.extract_strided_slice %259 {offsets = [0, 0], sizes = [1, 32], strides = [1, 1]} : vector<1x128xf32> to vector<1x32xf32>
    %262 = vector.extract_strided_slice %259 {offsets = [0, 32], sizes = [1, 32], strides = [1, 1]} : vector<1x128xf32> to vector<1x32xf32>
    %263 = vector.extract_strided_slice %260 {offsets = [0, 64], sizes = [1, 32], strides = [1, 1]} : vector<1x128xf32> to vector<1x32xf32>
    %264 = vector.extract_strided_slice %259 {offsets = [0, 96], sizes = [1, 32], strides = [1, 1]} : vector<1x128xf32> to vector<1x32xf32>
    %265 = arith.mulf %262, %162 : vector<1x32xf32>
    %266 = arith.mulf %261, %263 : vector<1x32xf32>
    %267 = arith.addf %265, %266 : vector<1x32xf32>
    %268 = math.tanh %267 : vector<1x32xf32>
    %269 = arith.mulf %264, %268 : vector<1x32xf32>
    %c0_102 = arith.constant 0 : index
    %c0_103 = arith.constant 0 : index
    %270 = vector.load %arg7[%c0_102, %c0_103] : memref<32x32xf32, #tpu.memory_space<vmem>>, vector<32x32xf32>
    %cst_104 = arith.constant dense<0.000000e+00> : vector<1x32xf32>
    %271 = tpu.matmul %269, %270, %cst_104 {dimension_numbers = #tpu.dot_dimension_numbers<[1], [0], [0], [1], [0, 0, 1, 1], [], []>} : vector<1x32xf32>, vector<32x32xf32>, vector<1x32xf32> -> vector<1x32xf32>
    %272 = arith.addf %271, %2 : vector<1x32xf32>
    %273 = tpu.concatenate %64, %116 in 0 : vector<1x32xf32>, vector<1x32xf32> -> vector<2x32xf32>
    %274 = vector.broadcast %272 : vector<1x32xf32> to vector<2x32xf32>
    %275 = arith.addf %273, %274 : vector<2x32xf32>
    %276 = math.tanh %275 : vector<2x32xf32>
    %277 = vector.broadcast %3 : vector<1x32xf32> to vector<2x32xf32>
    %278 = arith.mulf %276, %277 : vector<2x32xf32>
    %cst_105 = arith.constant dense<0.000000e+00> : vector<2xf32>
    %279 = vector.multi_reduction <add>, %278, %cst_105 [1] : vector<2x32xf32> to vector<2xf32>
    %280 = vector.shape_cast %279 : vector<2xf32> to vector<2x1xf32>
    %281 = vector.broadcast %4 : vector<1x1xf32> to vector<2x1xf32>
    %282 = arith.addf %280, %281 : vector<2x1xf32>
    %cst_106 = arith.constant 5.000000e+00 : f32
    %283 = vector.broadcast %cst_106 : f32 to vector<2x1xf32>
    %284 = arith.divf %282, %283 : vector<2x1xf32>
    %285 = math.tanh %284 : vector<2x1xf32>
    %cst_107 = arith.constant 1.100000e+00 : f32
    %286 = vector.broadcast %cst_107 : f32 to vector<2x1xf32>
    %287 = arith.mulf %286, %285 : vector<2x1xf32>
    %cst_108 = arith.constant -1.000000e+30 : f32
    %288 = vector.broadcast %cst_108 : f32 to vector<1x128xf32>
    %c0_i32_109 = arith.constant 0 : i32
    %289 = vector.broadcast %c0_i32_109 : i32 to vector<1x128xi32>
    %290 = arith.cmpi eq, %0, %289 : vector<1x128xi32>
    %291 = vector.extract_strided_slice %287 {offsets = [0, 0], sizes = [1, 1], strides = [1, 1]} : vector<2x1xf32> to vector<1x1xf32>
    %292 = vector.shape_cast %291 : vector<1x1xf32> to vector<1x1xf32>
    %293 = vector.broadcast %292 : vector<1x1xf32> to vector<1x128xf32>
    %294 = arith.select %290, %293, %288 : vector<1x128xi1>, vector<1x128xf32>
    %c1_i32_110 = arith.constant 1 : i32
    %295 = vector.broadcast %c1_i32_110 : i32 to vector<1x128xi32>
    %296 = arith.cmpi eq, %0, %295 : vector<1x128xi32>
    %297 = vector.extract_strided_slice %287 {offsets = [1, 0], sizes = [1, 1], strides = [1, 1]} : vector<2x1xf32> to vector<1x1xf32>
    %298 = vector.shape_cast %297 : vector<1x1xf32> to vector<1x1xf32>
    %299 = vector.broadcast %298 : vector<1x1xf32> to vector<1x128xf32>
    %300 = arith.select %296, %299, %294 : vector<1x128xi1>, vector<1x128xf32>
    %c1_111 = arith.constant 1 : index
    %c0_112 = arith.constant 0 : index
    %301 = vector.load %arg10[%c1_111, %c0_112] : memref<8x128xf32, #tpu.memory_space<vmem>>, vector<1x128xf32>
    %302 = arith.addf %300, %301 : vector<1x128xf32>
    %303 = tpu.bitcast %302 : vector<1x128xf32> -> vector<1x128xi32>
    %c0_i32_113 = arith.constant 0 : i32
    %304 = vector.broadcast %c0_i32_113 : i32 to vector<1x128xi32>
    %305 = arith.cmpi slt, %303, %304 : vector<1x128xi32>
    %c2147483647_i32_114 = arith.constant 2147483647 : i32
    %306 = vector.broadcast %c2147483647_i32_114 : i32 to vector<1x128xi32>
    %307 = arith.xori %303, %306 : vector<1x128xi32>
    %308 = arith.select %305, %307, %303 : vector<1x128xi1>, vector<1x128xi32>
    %c-128_i32_115 = arith.constant -128 : i32
    %309 = vector.broadcast %c-128_i32_115 : i32 to vector<1x128xi32>
    %310 = arith.andi %308, %309 : vector<1x128xi32>
    %c127_i32_116 = arith.constant 127 : i32
    %311 = vector.broadcast %c127_i32_116 : i32 to vector<1x128xi32>
    %312 = arith.subi %311, %0 : vector<1x128xi32>
    %313 = arith.ori %310, %312 : vector<1x128xi32>
    %cst_117 = arith.constant dense<-2147483648> : vector<1xi32>
    %314 = vector.multi_reduction <maxsi>, %313, %cst_117 [1] : vector<1x128xi32> to vector<1xi32>
    %315 = vector.shape_cast %314 : vector<1xi32> to vector<1x1xi32>
    %c127_i32_118 = arith.constant 127 : i32
    %316 = vector.broadcast %c127_i32_118 : i32 to vector<1x1xi32>
    %317 = arith.andi %315, %316 : vector<1x1xi32>
    %c127_i32_119 = arith.constant 127 : i32
    %318 = vector.broadcast %c127_i32_119 : i32 to vector<1x1xi32>
    %319 = arith.subi %318, %317 : vector<1x1xi32>
    %320 = vector.shape_cast %319 : vector<1x1xi32> to vector<1x1xi32>
    %321 = vector.broadcast %320 : vector<1x1xi32> to vector<1x128xi32>
    %c1_i32_120 = arith.constant 1 : i32
    %322 = vector.broadcast %c1_i32_120 : i32 to vector<1x1xi32>
    %323 = arith.cmpi eq, %319, %322 : vector<1x1xi32>
    %324 = vector.shape_cast %323 : vector<1x1xi1> to vector<1x1xi1>
    %325 = vector.broadcast %324 : vector<1x1xi1> to vector<1x32xi1>
    %326 = arith.select %325, %113, %61 : vector<1x32xi1>, vector<1x32xf32>
    %c0_121 = arith.constant 0 : index
    %c0_122 = arith.constant 0 : index
    %c0_123 = arith.constant 0 : index
    %327 = vector.load %arg2[%c0_121, %c0_122, %c0_123] : memref<2x64x128xf32, #tpu.memory_space<vmem>>, vector<1x64x128xf32>
    %328 = vector.shape_cast %327 : vector<1x64x128xf32> to vector<64x128xf32>
    %329 = vector.extract_strided_slice %328 {offsets = [0, 0], sizes = [32, 128], strides = [1, 1]} : vector<64x128xf32> to vector<32x128xf32>
    %cst_124 = arith.constant dense<0.000000e+00> : vector<1x128xf32>
    %330 = tpu.matmul %326, %329, %cst_124 {dimension_numbers = #tpu.dot_dimension_numbers<[1], [0], [0], [1], [0, 0, 1, 1], [], []>} : vector<1x32xf32>, vector<32x128xf32>, vector<1x128xf32> -> vector<1x128xf32>
    %331 = vector.extract_strided_slice %328 {offsets = [32, 0], sizes = [32, 128], strides = [1, 1]} : vector<64x128xf32> to vector<32x128xf32>
    %cst_125 = arith.constant dense<0.000000e+00> : vector<1x128xf32>
    %332 = tpu.matmul %245, %331, %cst_125 {dimension_numbers = #tpu.dot_dimension_numbers<[1], [0], [0], [1], [0, 0, 1, 1], [], []>} : vector<1x32xf32>, vector<32x128xf32>, vector<1x128xf32> -> vector<1x128xf32>
    %333 = arith.addf %330, %332 : vector<1x128xf32>
    %c0_126 = arith.constant 0 : index
    %c0_127 = arith.constant 0 : index
    %334 = vector.load %arg3[%c0_126, %c0_127] : memref<2x128xf32, #tpu.memory_space<vmem>>, vector<1x128xf32>
    %335 = arith.addf %333, %334 : vector<1x128xf32>
    %336 = arith.negf %335 : vector<1x128xf32>
    %337 = math.exp %336 : vector<1x128xf32>
    %cst_128 = arith.constant 1.000000e+00 : f32
    %338 = vector.broadcast %cst_128 : f32 to vector<1x128xf32>
    %339 = arith.addf %338, %337 : vector<1x128xf32>
    %340 = arith.divf %338, %339 : vector<1x128xf32>
    %341 = math.tanh %335 : vector<1x128xf32>
    %342 = vector.extract_strided_slice %340 {offsets = [0, 0], sizes = [1, 32], strides = [1, 1]} : vector<1x128xf32> to vector<1x32xf32>
    %343 = vector.extract_strided_slice %340 {offsets = [0, 32], sizes = [1, 32], strides = [1, 1]} : vector<1x128xf32> to vector<1x32xf32>
    %344 = vector.extract_strided_slice %341 {offsets = [0, 64], sizes = [1, 32], strides = [1, 1]} : vector<1x128xf32> to vector<1x32xf32>
    %345 = vector.extract_strided_slice %340 {offsets = [0, 96], sizes = [1, 32], strides = [1, 1]} : vector<1x128xf32> to vector<1x32xf32>
    %346 = arith.mulf %343, %243 : vector<1x32xf32>
    %347 = arith.mulf %342, %344 : vector<1x32xf32>
    %348 = arith.addf %346, %347 : vector<1x32xf32>
    %349 = math.tanh %348 : vector<1x32xf32>
    %350 = arith.mulf %345, %349 : vector<1x32xf32>
    %c1_129 = arith.constant 1 : index
    %c0_130 = arith.constant 0 : index
    %c0_131 = arith.constant 0 : index
    %351 = vector.load %arg2[%c1_129, %c0_130, %c0_131] : memref<2x64x128xf32, #tpu.memory_space<vmem>>, vector<1x64x128xf32>
    %352 = vector.shape_cast %351 : vector<1x64x128xf32> to vector<64x128xf32>
    %353 = vector.extract_strided_slice %352 {offsets = [0, 0], sizes = [32, 128], strides = [1, 1]} : vector<64x128xf32> to vector<32x128xf32>
    %cst_132 = arith.constant dense<0.000000e+00> : vector<1x128xf32>
    %354 = tpu.matmul %350, %353, %cst_132 {dimension_numbers = #tpu.dot_dimension_numbers<[1], [0], [0], [1], [0, 0, 1, 1], [], []>} : vector<1x32xf32>, vector<32x128xf32>, vector<1x128xf32> -> vector<1x128xf32>
    %355 = vector.extract_strided_slice %352 {offsets = [32, 0], sizes = [32, 128], strides = [1, 1]} : vector<64x128xf32> to vector<32x128xf32>
    %cst_133 = arith.constant dense<0.000000e+00> : vector<1x128xf32>
    %356 = tpu.matmul %269, %355, %cst_133 {dimension_numbers = #tpu.dot_dimension_numbers<[1], [0], [0], [1], [0, 0, 1, 1], [], []>} : vector<1x32xf32>, vector<32x128xf32>, vector<1x128xf32> -> vector<1x128xf32>
    %357 = arith.addf %354, %356 : vector<1x128xf32>
    %c1_134 = arith.constant 1 : index
    %c0_135 = arith.constant 0 : index
    %358 = vector.load %arg3[%c1_134, %c0_135] : memref<2x128xf32, #tpu.memory_space<vmem>>, vector<1x128xf32>
    %359 = arith.addf %357, %358 : vector<1x128xf32>
    %360 = arith.negf %359 : vector<1x128xf32>
    %361 = math.exp %360 : vector<1x128xf32>
    %cst_136 = arith.constant 1.000000e+00 : f32
    %362 = vector.broadcast %cst_136 : f32 to vector<1x128xf32>
    %363 = arith.addf %362, %361 : vector<1x128xf32>
    %364 = arith.divf %362, %363 : vector<1x128xf32>
    %365 = math.tanh %359 : vector<1x128xf32>
    %366 = vector.extract_strided_slice %364 {offsets = [0, 0], sizes = [1, 32], strides = [1, 1]} : vector<1x128xf32> to vector<1x32xf32>
    %367 = vector.extract_strided_slice %364 {offsets = [0, 32], sizes = [1, 32], strides = [1, 1]} : vector<1x128xf32> to vector<1x32xf32>
    %368 = vector.extract_strided_slice %365 {offsets = [0, 64], sizes = [1, 32], strides = [1, 1]} : vector<1x128xf32> to vector<1x32xf32>
    %369 = vector.extract_strided_slice %364 {offsets = [0, 96], sizes = [1, 32], strides = [1, 1]} : vector<1x128xf32> to vector<1x32xf32>
    %370 = arith.mulf %367, %267 : vector<1x32xf32>
    %371 = arith.mulf %366, %368 : vector<1x32xf32>
    %372 = arith.addf %370, %371 : vector<1x32xf32>
    %373 = math.tanh %372 : vector<1x32xf32>
    %374 = arith.mulf %369, %373 : vector<1x32xf32>
    %c0_137 = arith.constant 0 : index
    %c0_138 = arith.constant 0 : index
    %375 = vector.load %arg8[%c0_137, %c0_138] : memref<32x128xf32, #tpu.memory_space<vmem>>, vector<32x128xf32>
    %cst_139 = arith.constant dense<0.000000e+00> : vector<1x128xf32>
    %376 = tpu.matmul %374, %375, %cst_139 {dimension_numbers = #tpu.dot_dimension_numbers<[1], [0], [0], [1], [0, 0, 1, 1], [], []>} : vector<1x32xf32>, vector<32x128xf32>, vector<1x128xf32> -> vector<1x128xf32>
    %377 = arith.addf %376, %5 : vector<1x128xf32>
    %378 = arith.addf %377, %6 : vector<1x128xf32>
    %cst_140 = arith.constant 5.000000e+00 : f32
    %379 = vector.broadcast %cst_140 : f32 to vector<1x128xf32>
    %380 = arith.divf %378, %379 : vector<1x128xf32>
    %381 = math.tanh %380 : vector<1x128xf32>
    %cst_141 = arith.constant 4.400000e-01 : f32
    %382 = vector.broadcast %cst_141 : f32 to vector<1x128xf32>
    %383 = arith.mulf %382, %381 : vector<1x128xf32>
    %384 = arith.addf %383, %7 : vector<1x128xf32>
    %c5_i32 = arith.constant 5 : i32
    %385 = vector.broadcast %c5_i32 : i32 to vector<1x128xi32>
    %386 = arith.cmpi slt, %0, %385 : vector<1x128xi32>
    %cst_142 = arith.constant -1.000000e+30 : f32
    %387 = vector.broadcast %cst_142 : f32 to vector<1x128xf32>
    %388 = arith.select %386, %384, %387 : vector<1x128xi1>, vector<1x128xf32>
    %c2_143 = arith.constant 2 : index
    %c0_144 = arith.constant 0 : index
    %389 = vector.load %arg10[%c2_143, %c0_144] : memref<8x128xf32, #tpu.memory_space<vmem>>, vector<1x128xf32>
    %390 = arith.addf %388, %389 : vector<1x128xf32>
    %391 = tpu.bitcast %390 : vector<1x128xf32> -> vector<1x128xi32>
    %c0_i32_145 = arith.constant 0 : i32
    %392 = vector.broadcast %c0_i32_145 : i32 to vector<1x128xi32>
    %393 = arith.cmpi slt, %391, %392 : vector<1x128xi32>
    %c2147483647_i32_146 = arith.constant 2147483647 : i32
    %394 = vector.broadcast %c2147483647_i32_146 : i32 to vector<1x128xi32>
    %395 = arith.xori %391, %394 : vector<1x128xi32>
    %396 = arith.select %393, %395, %391 : vector<1x128xi1>, vector<1x128xi32>
    %c-128_i32_147 = arith.constant -128 : i32
    %397 = vector.broadcast %c-128_i32_147 : i32 to vector<1x128xi32>
    %398 = arith.andi %396, %397 : vector<1x128xi32>
    %c127_i32_148 = arith.constant 127 : i32
    %399 = vector.broadcast %c127_i32_148 : i32 to vector<1x128xi32>
    %400 = arith.subi %399, %0 : vector<1x128xi32>
    %401 = arith.ori %398, %400 : vector<1x128xi32>
    %cst_149 = arith.constant dense<-2147483648> : vector<1xi32>
    %402 = vector.multi_reduction <maxsi>, %401, %cst_149 [1] : vector<1x128xi32> to vector<1xi32>
    %403 = vector.shape_cast %402 : vector<1xi32> to vector<1x1xi32>
    %c127_i32_150 = arith.constant 127 : i32
    %404 = vector.broadcast %c127_i32_150 : i32 to vector<1x1xi32>
    %405 = arith.andi %403, %404 : vector<1x1xi32>
    %c127_i32_151 = arith.constant 127 : i32
    %406 = vector.broadcast %c127_i32_151 : i32 to vector<1x1xi32>
    %407 = arith.subi %406, %405 : vector<1x1xi32>
    %408 = vector.shape_cast %407 : vector<1x1xi32> to vector<1x1xi32>
    %409 = vector.broadcast %408 : vector<1x1xi32> to vector<1x128xi32>
    %410 = tpu.iota {dimensions = array<i32: 0>} : vector<5x32xi32>
    %411 = vector.broadcast %407 : vector<1x1xi32> to vector<5x32xi32>
    %412 = arith.cmpi eq, %410, %411 : vector<5x32xi32>
    %c0_152 = arith.constant 0 : index
    %c0_153 = arith.constant 0 : index
    %413 = vector.load %arg5[%c0_152, %c0_153] : memref<5x32xf32, #tpu.memory_space<vmem>>, vector<5x32xf32>
    %cst_154 = arith.constant 0.000000e+00 : f32
    %414 = vector.broadcast %cst_154 : f32 to vector<5x32xf32>
    %415 = arith.select %412, %413, %414 : vector<5x32xi1>, vector<5x32xf32>
    %cst_155 = arith.constant dense<0.000000e+00> : vector<32xf32>
    %416 = vector.multi_reduction <add>, %415, %cst_155 [0] : vector<5x32xf32> to vector<32xf32>
    %417 = vector.shape_cast %416 : vector<32xf32> to vector<1x32xf32>
    %c0_156 = arith.constant 0 : index
    %c0_157 = arith.constant 0 : index
    %c0_158 = arith.constant 0 : index
    %418 = vector.load %arg2[%c0_156, %c0_157, %c0_158] : memref<2x64x128xf32, #tpu.memory_space<vmem>>, vector<1x64x128xf32>
    %419 = vector.shape_cast %418 : vector<1x64x128xf32> to vector<64x128xf32>
    %420 = vector.extract_strided_slice %419 {offsets = [0, 0], sizes = [32, 128], strides = [1, 1]} : vector<64x128xf32> to vector<32x128xf32>
    %cst_159 = arith.constant dense<0.000000e+00> : vector<1x128xf32>
    %421 = tpu.matmul %417, %420, %cst_159 {dimension_numbers = #tpu.dot_dimension_numbers<[1], [0], [0], [1], [0, 0, 1, 1], [], []>} : vector<1x32xf32>, vector<32x128xf32>, vector<1x128xf32> -> vector<1x128xf32>
    %422 = vector.extract_strided_slice %419 {offsets = [32, 0], sizes = [32, 128], strides = [1, 1]} : vector<64x128xf32> to vector<32x128xf32>
    %cst_160 = arith.constant dense<0.000000e+00> : vector<1x128xf32>
    %423 = tpu.matmul %350, %422, %cst_160 {dimension_numbers = #tpu.dot_dimension_numbers<[1], [0], [0], [1], [0, 0, 1, 1], [], []>} : vector<1x32xf32>, vector<32x128xf32>, vector<1x128xf32> -> vector<1x128xf32>
    %424 = arith.addf %421, %423 : vector<1x128xf32>
    %c0_161 = arith.constant 0 : index
    %c0_162 = arith.constant 0 : index
    %425 = vector.load %arg3[%c0_161, %c0_162] : memref<2x128xf32, #tpu.memory_space<vmem>>, vector<1x128xf32>
    %426 = arith.addf %424, %425 : vector<1x128xf32>
    %427 = arith.negf %426 : vector<1x128xf32>
    %428 = math.exp %427 : vector<1x128xf32>
    %cst_163 = arith.constant 1.000000e+00 : f32
    %429 = vector.broadcast %cst_163 : f32 to vector<1x128xf32>
    %430 = arith.addf %429, %428 : vector<1x128xf32>
    %431 = arith.divf %429, %430 : vector<1x128xf32>
    %432 = math.tanh %426 : vector<1x128xf32>
    %433 = vector.extract_strided_slice %431 {offsets = [0, 0], sizes = [1, 32], strides = [1, 1]} : vector<1x128xf32> to vector<1x32xf32>
    %434 = vector.extract_strided_slice %431 {offsets = [0, 32], sizes = [1, 32], strides = [1, 1]} : vector<1x128xf32> to vector<1x32xf32>
    %435 = vector.extract_strided_slice %432 {offsets = [0, 64], sizes = [1, 32], strides = [1, 1]} : vector<1x128xf32> to vector<1x32xf32>
    %436 = vector.extract_strided_slice %431 {offsets = [0, 96], sizes = [1, 32], strides = [1, 1]} : vector<1x128xf32> to vector<1x32xf32>
    %437 = arith.mulf %434, %348 : vector<1x32xf32>
    %438 = arith.mulf %433, %435 : vector<1x32xf32>
    %439 = arith.addf %437, %438 : vector<1x32xf32>
    %440 = math.tanh %439 : vector<1x32xf32>
    %441 = arith.mulf %436, %440 : vector<1x32xf32>
    %c1_164 = arith.constant 1 : index
    %c0_165 = arith.constant 0 : index
    %c0_166 = arith.constant 0 : index
    %442 = vector.load %arg2[%c1_164, %c0_165, %c0_166] : memref<2x64x128xf32, #tpu.memory_space<vmem>>, vector<1x64x128xf32>
    %443 = vector.shape_cast %442 : vector<1x64x128xf32> to vector<64x128xf32>
    %444 = vector.extract_strided_slice %443 {offsets = [0, 0], sizes = [32, 128], strides = [1, 1]} : vector<64x128xf32> to vector<32x128xf32>
    %cst_167 = arith.constant dense<0.000000e+00> : vector<1x128xf32>
    %445 = tpu.matmul %441, %444, %cst_167 {dimension_numbers = #tpu.dot_dimension_numbers<[1], [0], [0], [1], [0, 0, 1, 1], [], []>} : vector<1x32xf32>, vector<32x128xf32>, vector<1x128xf32> -> vector<1x128xf32>
    %446 = vector.extract_strided_slice %443 {offsets = [32, 0], sizes = [32, 128], strides = [1, 1]} : vector<64x128xf32> to vector<32x128xf32>
    %cst_168 = arith.constant dense<0.000000e+00> : vector<1x128xf32>
    %447 = tpu.matmul %374, %446, %cst_168 {dimension_numbers = #tpu.dot_dimension_numbers<[1], [0], [0], [1], [0, 0, 1, 1], [], []>} : vector<1x32xf32>, vector<32x128xf32>, vector<1x128xf32> -> vector<1x128xf32>
    %448 = arith.addf %445, %447 : vector<1x128xf32>
    %c1_169 = arith.constant 1 : index
    %c0_170 = arith.constant 0 : index
    %449 = vector.load %arg3[%c1_169, %c0_170] : memref<2x128xf32, #tpu.memory_space<vmem>>, vector<1x128xf32>
    %450 = arith.addf %448, %449 : vector<1x128xf32>
    %451 = arith.negf %450 : vector<1x128xf32>
    %452 = math.exp %451 : vector<1x128xf32>
    %cst_171 = arith.constant 1.000000e+00 : f32
    %453 = vector.broadcast %cst_171 : f32 to vector<1x128xf32>
    %454 = arith.addf %453, %452 : vector<1x128xf32>
    %455 = arith.divf %453, %454 : vector<1x128xf32>
    %456 = math.tanh %450 : vector<1x128xf32>
    %457 = vector.extract_strided_slice %455 {offsets = [0, 0], sizes = [1, 32], strides = [1, 1]} : vector<1x128xf32> to vector<1x32xf32>
    %458 = vector.extract_strided_slice %455 {offsets = [0, 32], sizes = [1, 32], strides = [1, 1]} : vector<1x128xf32> to vector<1x32xf32>
    %459 = vector.extract_strided_slice %456 {offsets = [0, 64], sizes = [1, 32], strides = [1, 1]} : vector<1x128xf32> to vector<1x32xf32>
    %460 = vector.extract_strided_slice %455 {offsets = [0, 96], sizes = [1, 32], strides = [1, 1]} : vector<1x128xf32> to vector<1x32xf32>
    %461 = arith.mulf %458, %372 : vector<1x32xf32>
    %462 = arith.mulf %457, %459 : vector<1x32xf32>
    %463 = arith.addf %461, %462 : vector<1x32xf32>
    %464 = math.tanh %463 : vector<1x32xf32>
    %465 = arith.mulf %460, %464 : vector<1x32xf32>
    %c0_172 = arith.constant 0 : index
    %c0_173 = arith.constant 0 : index
    %466 = vector.load %arg8[%c0_172, %c0_173] : memref<32x128xf32, #tpu.memory_space<vmem>>, vector<32x128xf32>
    %cst_174 = arith.constant dense<0.000000e+00> : vector<1x128xf32>
    %467 = tpu.matmul %465, %466, %cst_174 {dimension_numbers = #tpu.dot_dimension_numbers<[1], [0], [0], [1], [0, 0, 1, 1], [], []>} : vector<1x32xf32>, vector<32x128xf32>, vector<1x128xf32> -> vector<1x128xf32>
    %468 = arith.addf %467, %5 : vector<1x128xf32>
    %469 = arith.addf %468, %6 : vector<1x128xf32>
    %cst_175 = arith.constant 5.000000e+00 : f32
    %470 = vector.broadcast %cst_175 : f32 to vector<1x128xf32>
    %471 = arith.divf %469, %470 : vector<1x128xf32>
    %472 = math.tanh %471 : vector<1x128xf32>
    %cst_176 = arith.constant 4.400000e-01 : f32
    %473 = vector.broadcast %cst_176 : f32 to vector<1x128xf32>
    %474 = arith.mulf %473, %472 : vector<1x128xf32>
    %475 = arith.addf %474, %7 : vector<1x128xf32>
    %c5_i32_177 = arith.constant 5 : i32
    %476 = vector.broadcast %c5_i32_177 : i32 to vector<1x128xi32>
    %477 = arith.cmpi slt, %0, %476 : vector<1x128xi32>
    %cst_178 = arith.constant -1.000000e+30 : f32
    %478 = vector.broadcast %cst_178 : f32 to vector<1x128xf32>
    %479 = arith.select %477, %475, %478 : vector<1x128xi1>, vector<1x128xf32>
    %c3_179 = arith.constant 3 : index
    %c0_180 = arith.constant 0 : index
    %480 = vector.load %arg10[%c3_179, %c0_180] : memref<8x128xf32, #tpu.memory_space<vmem>>, vector<1x128xf32>
    %481 = arith.addf %479, %480 : vector<1x128xf32>
    %482 = tpu.bitcast %481 : vector<1x128xf32> -> vector<1x128xi32>
    %c0_i32_181 = arith.constant 0 : i32
    %483 = vector.broadcast %c0_i32_181 : i32 to vector<1x128xi32>
    %484 = arith.cmpi slt, %482, %483 : vector<1x128xi32>
    %c2147483647_i32_182 = arith.constant 2147483647 : i32
    %485 = vector.broadcast %c2147483647_i32_182 : i32 to vector<1x128xi32>
    %486 = arith.xori %482, %485 : vector<1x128xi32>
    %487 = arith.select %484, %486, %482 : vector<1x128xi1>, vector<1x128xi32>
    %c-128_i32_183 = arith.constant -128 : i32
    %488 = vector.broadcast %c-128_i32_183 : i32 to vector<1x128xi32>
    %489 = arith.andi %487, %488 : vector<1x128xi32>
    %c127_i32_184 = arith.constant 127 : i32
    %490 = vector.broadcast %c127_i32_184 : i32 to vector<1x128xi32>
    %491 = arith.subi %490, %0 : vector<1x128xi32>
    %492 = arith.ori %489, %491 : vector<1x128xi32>
    %cst_185 = arith.constant dense<-2147483648> : vector<1xi32>
    %493 = vector.multi_reduction <maxsi>, %492, %cst_185 [1] : vector<1x128xi32> to vector<1xi32>
    %494 = vector.shape_cast %493 : vector<1xi32> to vector<1x1xi32>
    %c127_i32_186 = arith.constant 127 : i32
    %495 = vector.broadcast %c127_i32_186 : i32 to vector<1x1xi32>
    %496 = arith.andi %494, %495 : vector<1x1xi32>
    %c127_i32_187 = arith.constant 127 : i32
    %497 = vector.broadcast %c127_i32_187 : i32 to vector<1x1xi32>
    %498 = arith.subi %497, %496 : vector<1x1xi32>
    %499 = vector.shape_cast %498 : vector<1x1xi32> to vector<1x1xi32>
    %500 = vector.broadcast %499 : vector<1x1xi32> to vector<1x128xi32>
    %501 = tpu.iota {dimensions = array<i32: 0>} : vector<5x32xi32>
    %502 = vector.broadcast %498 : vector<1x1xi32> to vector<5x32xi32>
    %503 = arith.cmpi eq, %501, %502 : vector<5x32xi32>
    %c0_188 = arith.constant 0 : index
    %c0_189 = arith.constant 0 : index
    %504 = vector.load %arg5[%c0_188, %c0_189] : memref<5x32xf32, #tpu.memory_space<vmem>>, vector<5x32xf32>
    %cst_190 = arith.constant 0.000000e+00 : f32
    %505 = vector.broadcast %cst_190 : f32 to vector<5x32xf32>
    %506 = arith.select %503, %504, %505 : vector<5x32xi1>, vector<5x32xf32>
    %cst_191 = arith.constant dense<0.000000e+00> : vector<32xf32>
    %507 = vector.multi_reduction <add>, %506, %cst_191 [0] : vector<5x32xf32> to vector<32xf32>
    %508 = vector.shape_cast %507 : vector<32xf32> to vector<1x32xf32>
    %c0_192 = arith.constant 0 : index
    %c0_193 = arith.constant 0 : index
    %c0_194 = arith.constant 0 : index
    %509 = vector.load %arg2[%c0_192, %c0_193, %c0_194] : memref<2x64x128xf32, #tpu.memory_space<vmem>>, vector<1x64x128xf32>
    %510 = vector.shape_cast %509 : vector<1x64x128xf32> to vector<64x128xf32>
    %511 = vector.extract_strided_slice %510 {offsets = [0, 0], sizes = [32, 128], strides = [1, 1]} : vector<64x128xf32> to vector<32x128xf32>
    %cst_195 = arith.constant dense<0.000000e+00> : vector<1x128xf32>
    %512 = tpu.matmul %508, %511, %cst_195 {dimension_numbers = #tpu.dot_dimension_numbers<[1], [0], [0], [1], [0, 0, 1, 1], [], []>} : vector<1x32xf32>, vector<32x128xf32>, vector<1x128xf32> -> vector<1x128xf32>
    %513 = vector.extract_strided_slice %510 {offsets = [32, 0], sizes = [32, 128], strides = [1, 1]} : vector<64x128xf32> to vector<32x128xf32>
    %cst_196 = arith.constant dense<0.000000e+00> : vector<1x128xf32>
    %514 = tpu.matmul %441, %513, %cst_196 {dimension_numbers = #tpu.dot_dimension_numbers<[1], [0], [0], [1], [0, 0, 1, 1], [], []>} : vector<1x32xf32>, vector<32x128xf32>, vector<1x128xf32> -> vector<1x128xf32>
    %515 = arith.addf %512, %514 : vector<1x128xf32>
    %c0_197 = arith.constant 0 : index
    %c0_198 = arith.constant 0 : index
    %516 = vector.load %arg3[%c0_197, %c0_198] : memref<2x128xf32, #tpu.memory_space<vmem>>, vector<1x128xf32>
    %517 = arith.addf %515, %516 : vector<1x128xf32>
    %518 = arith.negf %517 : vector<1x128xf32>
    %519 = math.exp %518 : vector<1x128xf32>
    %cst_199 = arith.constant 1.000000e+00 : f32
    %520 = vector.broadcast %cst_199 : f32 to vector<1x128xf32>
    %521 = arith.addf %520, %519 : vector<1x128xf32>
    %522 = arith.divf %520, %521 : vector<1x128xf32>
    %523 = math.tanh %517 : vector<1x128xf32>
    %524 = vector.extract_strided_slice %522 {offsets = [0, 0], sizes = [1, 32], strides = [1, 1]} : vector<1x128xf32> to vector<1x32xf32>
    %525 = vector.extract_strided_slice %522 {offsets = [0, 32], sizes = [1, 32], strides = [1, 1]} : vector<1x128xf32> to vector<1x32xf32>
    %526 = vector.extract_strided_slice %523 {offsets = [0, 64], sizes = [1, 32], strides = [1, 1]} : vector<1x128xf32> to vector<1x32xf32>
    %527 = vector.extract_strided_slice %522 {offsets = [0, 96], sizes = [1, 32], strides = [1, 1]} : vector<1x128xf32> to vector<1x32xf32>
    %528 = arith.mulf %525, %439 : vector<1x32xf32>
    %529 = arith.mulf %524, %526 : vector<1x32xf32>
    %530 = arith.addf %528, %529 : vector<1x32xf32>
    %531 = math.tanh %530 : vector<1x32xf32>
    %532 = arith.mulf %527, %531 : vector<1x32xf32>
    %c1_200 = arith.constant 1 : index
    %c0_201 = arith.constant 0 : index
    %c0_202 = arith.constant 0 : index
    %533 = vector.load %arg2[%c1_200, %c0_201, %c0_202] : memref<2x64x128xf32, #tpu.memory_space<vmem>>, vector<1x64x128xf32>
    %534 = vector.shape_cast %533 : vector<1x64x128xf32> to vector<64x128xf32>
    %535 = vector.extract_strided_slice %534 {offsets = [0, 0], sizes = [32, 128], strides = [1, 1]} : vector<64x128xf32> to vector<32x128xf32>
    %cst_203 = arith.constant dense<0.000000e+00> : vector<1x128xf32>
    %536 = tpu.matmul %532, %535, %cst_203 {dimension_numbers = #tpu.dot_dimension_numbers<[1], [0], [0], [1], [0, 0, 1, 1], [], []>} : vector<1x32xf32>, vector<32x128xf32>, vector<1x128xf32> -> vector<1x128xf32>
    %537 = vector.extract_strided_slice %534 {offsets = [32, 0], sizes = [32, 128], strides = [1, 1]} : vector<64x128xf32> to vector<32x128xf32>
    %cst_204 = arith.constant dense<0.000000e+00> : vector<1x128xf32>
    %538 = tpu.matmul %465, %537, %cst_204 {dimension_numbers = #tpu.dot_dimension_numbers<[1], [0], [0], [1], [0, 0, 1, 1], [], []>} : vector<1x32xf32>, vector<32x128xf32>, vector<1x128xf32> -> vector<1x128xf32>
    %539 = arith.addf %536, %538 : vector<1x128xf32>
    %c1_205 = arith.constant 1 : index
    %c0_206 = arith.constant 0 : index
    %540 = vector.load %arg3[%c1_205, %c0_206] : memref<2x128xf32, #tpu.memory_space<vmem>>, vector<1x128xf32>
    %541 = arith.addf %539, %540 : vector<1x128xf32>
    %542 = arith.negf %541 : vector<1x128xf32>
    %543 = math.exp %542 : vector<1x128xf32>
    %cst_207 = arith.constant 1.000000e+00 : f32
    %544 = vector.broadcast %cst_207 : f32 to vector<1x128xf32>
    %545 = arith.addf %544, %543 : vector<1x128xf32>
    %546 = arith.divf %544, %545 : vector<1x128xf32>
    %547 = math.tanh %541 : vector<1x128xf32>
    %548 = vector.extract_strided_slice %546 {offsets = [0, 0], sizes = [1, 32], strides = [1, 1]} : vector<1x128xf32> to vector<1x32xf32>
    %549 = vector.extract_strided_slice %546 {offsets = [0, 32], sizes = [1, 32], strides = [1, 1]} : vector<1x128xf32> to vector<1x32xf32>
    %550 = vector.extract_strided_slice %547 {offsets = [0, 64], sizes = [1, 32], strides = [1, 1]} : vector<1x128xf32> to vector<1x32xf32>
    %551 = vector.extract_strided_slice %546 {offsets = [0, 96], sizes = [1, 32], strides = [1, 1]} : vector<1x128xf32> to vector<1x32xf32>
    %552 = arith.mulf %549, %463 : vector<1x32xf32>
    %553 = arith.mulf %548, %550 : vector<1x32xf32>
    %554 = arith.addf %552, %553 : vector<1x32xf32>
    %555 = math.tanh %554 : vector<1x32xf32>
    %556 = arith.mulf %551, %555 : vector<1x32xf32>
    %c0_208 = arith.constant 0 : index
    %c0_209 = arith.constant 0 : index
    %557 = vector.load %arg6[%c0_208, %c0_209] : memref<32x32xf32, #tpu.memory_space<vmem>>, vector<32x32xf32>
    %cst_210 = arith.constant dense<0.000000e+00> : vector<1x32xf32>
    %558 = tpu.matmul %556, %557, %cst_210 {dimension_numbers = #tpu.dot_dimension_numbers<[1], [0], [0], [1], [0, 0, 1, 1], [], []>} : vector<1x32xf32>, vector<32x32xf32>, vector<1x32xf32> -> vector<1x32xf32>
    %559 = arith.addf %558, %1 : vector<1x32xf32>
    %c0_211 = arith.constant 0 : index
    %c0_212 = arith.constant 0 : index
    %c0_213 = arith.constant 0 : index
    %560 = vector.load %arg2[%c0_211, %c0_212, %c0_213] : memref<2x64x128xf32, #tpu.memory_space<vmem>>, vector<1x64x128xf32>
    %561 = vector.shape_cast %560 : vector<1x64x128xf32> to vector<64x128xf32>
    %562 = vector.extract_strided_slice %561 {offsets = [0, 0], sizes = [32, 128], strides = [1, 1]} : vector<64x128xf32> to vector<32x128xf32>
    %cst_214 = arith.constant dense<0.000000e+00> : vector<1x128xf32>
    %563 = tpu.matmul %12, %562, %cst_214 {dimension_numbers = #tpu.dot_dimension_numbers<[1], [0], [0], [1], [0, 0, 1, 1], [], []>} : vector<1x32xf32>, vector<32x128xf32>, vector<1x128xf32> -> vector<1x128xf32>
    %564 = vector.extract_strided_slice %561 {offsets = [32, 0], sizes = [32, 128], strides = [1, 1]} : vector<64x128xf32> to vector<32x128xf32>
    %cst_215 = arith.constant dense<0.000000e+00> : vector<1x128xf32>
    %565 = tpu.matmul %532, %564, %cst_215 {dimension_numbers = #tpu.dot_dimension_numbers<[1], [0], [0], [1], [0, 0, 1, 1], [], []>} : vector<1x32xf32>, vector<32x128xf32>, vector<1x128xf32> -> vector<1x128xf32>
    %566 = arith.addf %563, %565 : vector<1x128xf32>
    %c0_216 = arith.constant 0 : index
    %c0_217 = arith.constant 0 : index
    %567 = vector.load %arg3[%c0_216, %c0_217] : memref<2x128xf32, #tpu.memory_space<vmem>>, vector<1x128xf32>
    %568 = arith.addf %566, %567 : vector<1x128xf32>
    %569 = arith.negf %568 : vector<1x128xf32>
    %570 = math.exp %569 : vector<1x128xf32>
    %cst_218 = arith.constant 1.000000e+00 : f32
    %571 = vector.broadcast %cst_218 : f32 to vector<1x128xf32>
    %572 = arith.addf %571, %570 : vector<1x128xf32>
    %573 = arith.divf %571, %572 : vector<1x128xf32>
    %574 = math.tanh %568 : vector<1x128xf32>
    %575 = vector.extract_strided_slice %573 {offsets = [0, 0], sizes = [1, 32], strides = [1, 1]} : vector<1x128xf32> to vector<1x32xf32>
    %576 = vector.extract_strided_slice %573 {offsets = [0, 32], sizes = [1, 32], strides = [1, 1]} : vector<1x128xf32> to vector<1x32xf32>
    %577 = vector.extract_strided_slice %574 {offsets = [0, 64], sizes = [1, 32], strides = [1, 1]} : vector<1x128xf32> to vector<1x32xf32>
    %578 = vector.extract_strided_slice %573 {offsets = [0, 96], sizes = [1, 32], strides = [1, 1]} : vector<1x128xf32> to vector<1x32xf32>
    %579 = arith.mulf %576, %530 : vector<1x32xf32>
    %580 = arith.mulf %575, %577 : vector<1x32xf32>
    %581 = arith.addf %579, %580 : vector<1x32xf32>
    %582 = math.tanh %581 : vector<1x32xf32>
    %583 = arith.mulf %578, %582 : vector<1x32xf32>
    %c1_219 = arith.constant 1 : index
    %c0_220 = arith.constant 0 : index
    %c0_221 = arith.constant 0 : index
    %584 = vector.load %arg2[%c1_219, %c0_220, %c0_221] : memref<2x64x128xf32, #tpu.memory_space<vmem>>, vector<1x64x128xf32>
    %585 = vector.shape_cast %584 : vector<1x64x128xf32> to vector<64x128xf32>
    %586 = vector.extract_strided_slice %585 {offsets = [0, 0], sizes = [32, 128], strides = [1, 1]} : vector<64x128xf32> to vector<32x128xf32>
    %cst_222 = arith.constant dense<0.000000e+00> : vector<1x128xf32>
    %587 = tpu.matmul %583, %586, %cst_222 {dimension_numbers = #tpu.dot_dimension_numbers<[1], [0], [0], [1], [0, 0, 1, 1], [], []>} : vector<1x32xf32>, vector<32x128xf32>, vector<1x128xf32> -> vector<1x128xf32>
    %588 = vector.extract_strided_slice %585 {offsets = [32, 0], sizes = [32, 128], strides = [1, 1]} : vector<64x128xf32> to vector<32x128xf32>
    %cst_223 = arith.constant dense<0.000000e+00> : vector<1x128xf32>
    %589 = tpu.matmul %556, %588, %cst_223 {dimension_numbers = #tpu.dot_dimension_numbers<[1], [0], [0], [1], [0, 0, 1, 1], [], []>} : vector<1x32xf32>, vector<32x128xf32>, vector<1x128xf32> -> vector<1x128xf32>
    %590 = arith.addf %587, %589 : vector<1x128xf32>
    %c1_224 = arith.constant 1 : index
    %c0_225 = arith.constant 0 : index
    %591 = vector.load %arg3[%c1_224, %c0_225] : memref<2x128xf32, #tpu.memory_space<vmem>>, vector<1x128xf32>
    %592 = arith.addf %590, %591 : vector<1x128xf32>
    %593 = arith.negf %592 : vector<1x128xf32>
    %594 = math.exp %593 : vector<1x128xf32>
    %cst_226 = arith.constant 1.000000e+00 : f32
    %595 = vector.broadcast %cst_226 : f32 to vector<1x128xf32>
    %596 = arith.addf %595, %594 : vector<1x128xf32>
    %597 = arith.divf %595, %596 : vector<1x128xf32>
    %598 = math.tanh %592 : vector<1x128xf32>
    %599 = vector.extract_strided_slice %597 {offsets = [0, 0], sizes = [1, 32], strides = [1, 1]} : vector<1x128xf32> to vector<1x32xf32>
    %600 = vector.extract_strided_slice %597 {offsets = [0, 32], sizes = [1, 32], strides = [1, 1]} : vector<1x128xf32> to vector<1x32xf32>
    %601 = vector.extract_strided_slice %598 {offsets = [0, 64], sizes = [1, 32], strides = [1, 1]} : vector<1x128xf32> to vector<1x32xf32>
    %602 = vector.extract_strided_slice %597 {offsets = [0, 96], sizes = [1, 32], strides = [1, 1]} : vector<1x128xf32> to vector<1x32xf32>
    %603 = arith.mulf %600, %554 : vector<1x32xf32>
    %604 = arith.mulf %599, %601 : vector<1x32xf32>
    %605 = arith.addf %603, %604 : vector<1x32xf32>
    %606 = math.tanh %605 : vector<1x32xf32>
    %607 = arith.mulf %602, %606 : vector<1x32xf32>
    %c0_227 = arith.constant 0 : index
    %c0_228 = arith.constant 0 : index
    %608 = vector.load %arg7[%c0_227, %c0_228] : memref<32x32xf32, #tpu.memory_space<vmem>>, vector<32x32xf32>
    %cst_229 = arith.constant dense<0.000000e+00> : vector<1x32xf32>
    %609 = tpu.matmul %607, %608, %cst_229 {dimension_numbers = #tpu.dot_dimension_numbers<[1], [0], [0], [1], [0, 0, 1, 1], [], []>} : vector<1x32xf32>, vector<32x32xf32>, vector<1x32xf32> -> vector<1x32xf32>
    %610 = arith.addf %609, %2 : vector<1x32xf32>
    %611 = tpu.concatenate %64, %116, %559 in 0 : vector<1x32xf32>, vector<1x32xf32>, vector<1x32xf32> -> vector<3x32xf32>
    %612 = vector.broadcast %610 : vector<1x32xf32> to vector<3x32xf32>
    %613 = arith.addf %611, %612 : vector<3x32xf32>
    %614 = math.tanh %613 : vector<3x32xf32>
    %615 = vector.broadcast %3 : vector<1x32xf32> to vector<3x32xf32>
    %616 = arith.mulf %614, %615 : vector<3x32xf32>
    %cst_230 = arith.constant dense<0.000000e+00> : vector<3xf32>
    %617 = vector.multi_reduction <add>, %616, %cst_230 [1] : vector<3x32xf32> to vector<3xf32>
    %618 = vector.shape_cast %617 : vector<3xf32> to vector<3x1xf32>
    %619 = vector.broadcast %4 : vector<1x1xf32> to vector<3x1xf32>
    %620 = arith.addf %618, %619 : vector<3x1xf32>
    %cst_231 = arith.constant 5.000000e+00 : f32
    %621 = vector.broadcast %cst_231 : f32 to vector<3x1xf32>
    %622 = arith.divf %620, %621 : vector<3x1xf32>
    %623 = math.tanh %622 : vector<3x1xf32>
    %cst_232 = arith.constant 1.100000e+00 : f32
    %624 = vector.broadcast %cst_232 : f32 to vector<3x1xf32>
    %625 = arith.mulf %624, %623 : vector<3x1xf32>
    %cst_233 = arith.constant -1.000000e+30 : f32
    %626 = vector.broadcast %cst_233 : f32 to vector<1x128xf32>
    %c0_i32_234 = arith.constant 0 : i32
    %627 = vector.broadcast %c0_i32_234 : i32 to vector<1x128xi32>
    %628 = arith.cmpi eq, %0, %627 : vector<1x128xi32>
    %629 = vector.extract_strided_slice %625 {offsets = [0, 0], sizes = [1, 1], strides = [1, 1]} : vector<3x1xf32> to vector<1x1xf32>
    %630 = vector.shape_cast %629 : vector<1x1xf32> to vector<1x1xf32>
    %631 = vector.broadcast %630 : vector<1x1xf32> to vector<1x128xf32>
    %632 = arith.select %628, %631, %626 : vector<1x128xi1>, vector<1x128xf32>
    %c1_i32_235 = arith.constant 1 : i32
    %633 = vector.broadcast %c1_i32_235 : i32 to vector<1x128xi32>
    %634 = arith.cmpi eq, %0, %633 : vector<1x128xi32>
    %635 = vector.extract_strided_slice %625 {offsets = [1, 0], sizes = [1, 1], strides = [1, 1]} : vector<3x1xf32> to vector<1x1xf32>
    %636 = vector.shape_cast %635 : vector<1x1xf32> to vector<1x1xf32>
    %637 = vector.broadcast %636 : vector<1x1xf32> to vector<1x128xf32>
    %638 = arith.select %634, %637, %632 : vector<1x128xi1>, vector<1x128xf32>
    %c2_i32 = arith.constant 2 : i32
    %639 = vector.broadcast %c2_i32 : i32 to vector<1x128xi32>
    %640 = arith.cmpi eq, %0, %639 : vector<1x128xi32>
    %641 = vector.extract_strided_slice %625 {offsets = [2, 0], sizes = [1, 1], strides = [1, 1]} : vector<3x1xf32> to vector<1x1xf32>
    %642 = vector.shape_cast %641 : vector<1x1xf32> to vector<1x1xf32>
    %643 = vector.broadcast %642 : vector<1x1xf32> to vector<1x128xf32>
    %644 = arith.select %640, %643, %638 : vector<1x128xi1>, vector<1x128xf32>
    %c4_236 = arith.constant 4 : index
    %c0_237 = arith.constant 0 : index
    %645 = vector.load %arg10[%c4_236, %c0_237] : memref<8x128xf32, #tpu.memory_space<vmem>>, vector<1x128xf32>
    %646 = arith.addf %644, %645 : vector<1x128xf32>
    %647 = tpu.bitcast %646 : vector<1x128xf32> -> vector<1x128xi32>
    %c0_i32_238 = arith.constant 0 : i32
    %648 = vector.broadcast %c0_i32_238 : i32 to vector<1x128xi32>
    %649 = arith.cmpi slt, %647, %648 : vector<1x128xi32>
    %c2147483647_i32_239 = arith.constant 2147483647 : i32
    %650 = vector.broadcast %c2147483647_i32_239 : i32 to vector<1x128xi32>
    %651 = arith.xori %647, %650 : vector<1x128xi32>
    %652 = arith.select %649, %651, %647 : vector<1x128xi1>, vector<1x128xi32>
    %c-128_i32_240 = arith.constant -128 : i32
    %653 = vector.broadcast %c-128_i32_240 : i32 to vector<1x128xi32>
    %654 = arith.andi %652, %653 : vector<1x128xi32>
    %c127_i32_241 = arith.constant 127 : i32
    %655 = vector.broadcast %c127_i32_241 : i32 to vector<1x128xi32>
    %656 = arith.subi %655, %0 : vector<1x128xi32>
    %657 = arith.ori %654, %656 : vector<1x128xi32>
    %cst_242 = arith.constant dense<-2147483648> : vector<1xi32>
    %658 = vector.multi_reduction <maxsi>, %657, %cst_242 [1] : vector<1x128xi32> to vector<1xi32>
    %659 = vector.shape_cast %658 : vector<1xi32> to vector<1x1xi32>
    %c127_i32_243 = arith.constant 127 : i32
    %660 = vector.broadcast %c127_i32_243 : i32 to vector<1x1xi32>
    %661 = arith.andi %659, %660 : vector<1x1xi32>
    %c127_i32_244 = arith.constant 127 : i32
    %662 = vector.broadcast %c127_i32_244 : i32 to vector<1x1xi32>
    %663 = arith.subi %662, %661 : vector<1x1xi32>
    %664 = vector.shape_cast %663 : vector<1x1xi32> to vector<1x1xi32>
    %665 = vector.broadcast %664 : vector<1x1xi32> to vector<1x128xi32>
    %c1_i32_245 = arith.constant 1 : i32
    %666 = vector.broadcast %c1_i32_245 : i32 to vector<1x1xi32>
    %667 = arith.cmpi eq, %663, %666 : vector<1x1xi32>
    %668 = vector.shape_cast %667 : vector<1x1xi1> to vector<1x1xi1>
    %669 = vector.broadcast %668 : vector<1x1xi1> to vector<1x32xi1>
    %670 = arith.select %669, %113, %61 : vector<1x32xi1>, vector<1x32xf32>
    %c2_i32_246 = arith.constant 2 : i32
    %671 = vector.broadcast %c2_i32_246 : i32 to vector<1x1xi32>
    %672 = arith.cmpi eq, %663, %671 : vector<1x1xi32>
    %673 = vector.shape_cast %672 : vector<1x1xi1> to vector<1x1xi1>
    %674 = vector.broadcast %673 : vector<1x1xi1> to vector<1x32xi1>
    %675 = arith.select %674, %556, %670 : vector<1x32xi1>, vector<1x32xf32>
    %c0_247 = arith.constant 0 : index
    %c0_248 = arith.constant 0 : index
    %c0_249 = arith.constant 0 : index
    %676 = vector.load %arg2[%c0_247, %c0_248, %c0_249] : memref<2x64x128xf32, #tpu.memory_space<vmem>>, vector<1x64x128xf32>
    %677 = vector.shape_cast %676 : vector<1x64x128xf32> to vector<64x128xf32>
    %678 = vector.extract_strided_slice %677 {offsets = [0, 0], sizes = [32, 128], strides = [1, 1]} : vector<64x128xf32> to vector<32x128xf32>
    %cst_250 = arith.constant dense<0.000000e+00> : vector<1x128xf32>
    %679 = tpu.matmul %675, %678, %cst_250 {dimension_numbers = #tpu.dot_dimension_numbers<[1], [0], [0], [1], [0, 0, 1, 1], [], []>} : vector<1x32xf32>, vector<32x128xf32>, vector<1x128xf32> -> vector<1x128xf32>
    %680 = vector.extract_strided_slice %677 {offsets = [32, 0], sizes = [32, 128], strides = [1, 1]} : vector<64x128xf32> to vector<32x128xf32>
    %cst_251 = arith.constant dense<0.000000e+00> : vector<1x128xf32>
    %681 = tpu.matmul %583, %680, %cst_251 {dimension_numbers = #tpu.dot_dimension_numbers<[1], [0], [0], [1], [0, 0, 1, 1], [], []>} : vector<1x32xf32>, vector<32x128xf32>, vector<1x128xf32> -> vector<1x128xf32>
    %682 = arith.addf %679, %681 : vector<1x128xf32>
    %c0_252 = arith.constant 0 : index
    %c0_253 = arith.constant 0 : index
    %683 = vector.load %arg3[%c0_252, %c0_253] : memref<2x128xf32, #tpu.memory_space<vmem>>, vector<1x128xf32>
    %684 = arith.addf %682, %683 : vector<1x128xf32>
    %685 = arith.negf %684 : vector<1x128xf32>
    %686 = math.exp %685 : vector<1x128xf32>
    %cst_254 = arith.constant 1.000000e+00 : f32
    %687 = vector.broadcast %cst_254 : f32 to vector<1x128xf32>
    %688 = arith.addf %687, %686 : vector<1x128xf32>
    %689 = arith.divf %687, %688 : vector<1x128xf32>
    %690 = math.tanh %684 : vector<1x128xf32>
    %691 = vector.extract_strided_slice %689 {offsets = [0, 0], sizes = [1, 32], strides = [1, 1]} : vector<1x128xf32> to vector<1x32xf32>
    %692 = vector.extract_strided_slice %689 {offsets = [0, 32], sizes = [1, 32], strides = [1, 1]} : vector<1x128xf32> to vector<1x32xf32>
    %693 = vector.extract_strided_slice %690 {offsets = [0, 64], sizes = [1, 32], strides = [1, 1]} : vector<1x128xf32> to vector<1x32xf32>
    %694 = vector.extract_strided_slice %689 {offsets = [0, 96], sizes = [1, 32], strides = [1, 1]} : vector<1x128xf32> to vector<1x32xf32>
    %695 = arith.mulf %692, %581 : vector<1x32xf32>
    %696 = arith.mulf %691, %693 : vector<1x32xf32>
    %697 = arith.addf %695, %696 : vector<1x32xf32>
    %698 = math.tanh %697 : vector<1x32xf32>
    %699 = arith.mulf %694, %698 : vector<1x32xf32>
    %c1_255 = arith.constant 1 : index
    %c0_256 = arith.constant 0 : index
    %c0_257 = arith.constant 0 : index
    %700 = vector.load %arg2[%c1_255, %c0_256, %c0_257] : memref<2x64x128xf32, #tpu.memory_space<vmem>>, vector<1x64x128xf32>
    %701 = vector.shape_cast %700 : vector<1x64x128xf32> to vector<64x128xf32>
    %702 = vector.extract_strided_slice %701 {offsets = [0, 0], sizes = [32, 128], strides = [1, 1]} : vector<64x128xf32> to vector<32x128xf32>
    %cst_258 = arith.constant dense<0.000000e+00> : vector<1x128xf32>
    %703 = tpu.matmul %699, %702, %cst_258 {dimension_numbers = #tpu.dot_dimension_numbers<[1], [0], [0], [1], [0, 0, 1, 1], [], []>} : vector<1x32xf32>, vector<32x128xf32>, vector<1x128xf32> -> vector<1x128xf32>
    %704 = vector.extract_strided_slice %701 {offsets = [32, 0], sizes = [32, 128], strides = [1, 1]} : vector<64x128xf32> to vector<32x128xf32>
    %cst_259 = arith.constant dense<0.000000e+00> : vector<1x128xf32>
    %705 = tpu.matmul %607, %704, %cst_259 {dimension_numbers = #tpu.dot_dimension_numbers<[1], [0], [0], [1], [0, 0, 1, 1], [], []>} : vector<1x32xf32>, vector<32x128xf32>, vector<1x128xf32> -> vector<1x128xf32>
    %706 = arith.addf %703, %705 : vector<1x128xf32>
    %c1_260 = arith.constant 1 : index
    %c0_261 = arith.constant 0 : index
    %707 = vector.load %arg3[%c1_260, %c0_261] : memref<2x128xf32, #tpu.memory_space<vmem>>, vector<1x128xf32>
    %708 = arith.addf %706, %707 : vector<1x128xf32>
    %709 = arith.negf %708 : vector<1x128xf32>
    %710 = math.exp %709 : vector<1x128xf32>
    %cst_262 = arith.constant 1.000000e+00 : f32
    %711 = vector.broadcast %cst_262 : f32 to vector<1x128xf32>
    %712 = arith.addf %711, %710 : vector<1x128xf32>
    %713 = arith.divf %711, %712 : vector<1x128xf32>
    %714 = math.tanh %708 : vector<1x128xf32>
    %715 = vector.extract_strided_slice %713 {offsets = [0, 0], sizes = [1, 32], strides = [1, 1]} : vector<1x128xf32> to vector<1x32xf32>
    %716 = vector.extract_strided_slice %713 {offsets = [0, 32], sizes = [1, 32], strides = [1, 1]} : vector<1x128xf32> to vector<1x32xf32>
    %717 = vector.extract_strided_slice %714 {offsets = [0, 64], sizes = [1, 32], strides = [1, 1]} : vector<1x128xf32> to vector<1x32xf32>
    %718 = vector.extract_strided_slice %713 {offsets = [0, 96], sizes = [1, 32], strides = [1, 1]} : vector<1x128xf32> to vector<1x32xf32>
    %719 = arith.mulf %716, %605 : vector<1x32xf32>
    %720 = arith.mulf %715, %717 : vector<1x32xf32>
    %721 = arith.addf %719, %720 : vector<1x32xf32>
    %722 = math.tanh %721 : vector<1x32xf32>
    %723 = arith.mulf %718, %722 : vector<1x32xf32>
    %c0_263 = arith.constant 0 : index
    %c0_264 = arith.constant 0 : index
    %724 = vector.load %arg7[%c0_263, %c0_264] : memref<32x32xf32, #tpu.memory_space<vmem>>, vector<32x32xf32>
    %cst_265 = arith.constant dense<0.000000e+00> : vector<1x32xf32>
    %725 = tpu.matmul %723, %724, %cst_265 {dimension_numbers = #tpu.dot_dimension_numbers<[1], [0], [0], [1], [0, 0, 1, 1], [], []>} : vector<1x32xf32>, vector<32x32xf32>, vector<1x32xf32> -> vector<1x32xf32>
    %726 = arith.addf %725, %2 : vector<1x32xf32>
    %727 = tpu.concatenate %64, %116, %559 in 0 : vector<1x32xf32>, vector<1x32xf32>, vector<1x32xf32> -> vector<3x32xf32>
    %728 = vector.broadcast %726 : vector<1x32xf32> to vector<3x32xf32>
    %729 = arith.addf %727, %728 : vector<3x32xf32>
    %730 = math.tanh %729 : vector<3x32xf32>
    %731 = vector.broadcast %3 : vector<1x32xf32> to vector<3x32xf32>
    %732 = arith.mulf %730, %731 : vector<3x32xf32>
    %cst_266 = arith.constant dense<0.000000e+00> : vector<3xf32>
    %733 = vector.multi_reduction <add>, %732, %cst_266 [1] : vector<3x32xf32> to vector<3xf32>
    %734 = vector.shape_cast %733 : vector<3xf32> to vector<3x1xf32>
    %735 = vector.broadcast %4 : vector<1x1xf32> to vector<3x1xf32>
    %736 = arith.addf %734, %735 : vector<3x1xf32>
    %cst_267 = arith.constant 5.000000e+00 : f32
    %737 = vector.broadcast %cst_267 : f32 to vector<3x1xf32>
    %738 = arith.divf %736, %737 : vector<3x1xf32>
    %739 = math.tanh %738 : vector<3x1xf32>
    %cst_268 = arith.constant 1.100000e+00 : f32
    %740 = vector.broadcast %cst_268 : f32 to vector<3x1xf32>
    %741 = arith.mulf %740, %739 : vector<3x1xf32>
    %cst_269 = arith.constant -1.000000e+30 : f32
    %742 = vector.broadcast %cst_269 : f32 to vector<1x128xf32>
    %c0_i32_270 = arith.constant 0 : i32
    %743 = vector.broadcast %c0_i32_270 : i32 to vector<1x128xi32>
    %744 = arith.cmpi eq, %0, %743 : vector<1x128xi32>
    %745 = vector.extract_strided_slice %741 {offsets = [0, 0], sizes = [1, 1], strides = [1, 1]} : vector<3x1xf32> to vector<1x1xf32>
    %746 = vector.shape_cast %745 : vector<1x1xf32> to vector<1x1xf32>
    %747 = vector.broadcast %746 : vector<1x1xf32> to vector<1x128xf32>
    %748 = arith.select %744, %747, %742 : vector<1x128xi1>, vector<1x128xf32>
    %c1_i32_271 = arith.constant 1 : i32
    %749 = vector.broadcast %c1_i32_271 : i32 to vector<1x128xi32>
    %750 = arith.cmpi eq, %0, %749 : vector<1x128xi32>
    %751 = vector.extract_strided_slice %741 {offsets = [1, 0], sizes = [1, 1], strides = [1, 1]} : vector<3x1xf32> to vector<1x1xf32>
    %752 = vector.shape_cast %751 : vector<1x1xf32> to vector<1x1xf32>
    %753 = vector.broadcast %752 : vector<1x1xf32> to vector<1x128xf32>
    %754 = arith.select %750, %753, %748 : vector<1x128xi1>, vector<1x128xf32>
    %c2_i32_272 = arith.constant 2 : i32
    %755 = vector.broadcast %c2_i32_272 : i32 to vector<1x128xi32>
    %756 = arith.cmpi eq, %0, %755 : vector<1x128xi32>
    %757 = vector.extract_strided_slice %741 {offsets = [2, 0], sizes = [1, 1], strides = [1, 1]} : vector<3x1xf32> to vector<1x1xf32>
    %758 = vector.shape_cast %757 : vector<1x1xf32> to vector<1x1xf32>
    %759 = vector.broadcast %758 : vector<1x1xf32> to vector<1x128xf32>
    %760 = arith.select %756, %759, %754 : vector<1x128xi1>, vector<1x128xf32>
    %c5_273 = arith.constant 5 : index
    %c0_274 = arith.constant 0 : index
    %761 = vector.load %arg10[%c5_273, %c0_274] : memref<8x128xf32, #tpu.memory_space<vmem>>, vector<1x128xf32>
    %762 = arith.addf %760, %761 : vector<1x128xf32>
    %763 = tpu.bitcast %762 : vector<1x128xf32> -> vector<1x128xi32>
    %c0_i32_275 = arith.constant 0 : i32
    %764 = vector.broadcast %c0_i32_275 : i32 to vector<1x128xi32>
    %765 = arith.cmpi slt, %763, %764 : vector<1x128xi32>
    %c2147483647_i32_276 = arith.constant 2147483647 : i32
    %766 = vector.broadcast %c2147483647_i32_276 : i32 to vector<1x128xi32>
    %767 = arith.xori %763, %766 : vector<1x128xi32>
    %768 = arith.select %765, %767, %763 : vector<1x128xi1>, vector<1x128xi32>
    %c-128_i32_277 = arith.constant -128 : i32
    %769 = vector.broadcast %c-128_i32_277 : i32 to vector<1x128xi32>
    %770 = arith.andi %768, %769 : vector<1x128xi32>
    %c127_i32_278 = arith.constant 127 : i32
    %771 = vector.broadcast %c127_i32_278 : i32 to vector<1x128xi32>
    %772 = arith.subi %771, %0 : vector<1x128xi32>
    %773 = arith.ori %770, %772 : vector<1x128xi32>
    %cst_279 = arith.constant dense<-2147483648> : vector<1xi32>
    %774 = vector.multi_reduction <maxsi>, %773, %cst_279 [1] : vector<1x128xi32> to vector<1xi32>
    %775 = vector.shape_cast %774 : vector<1xi32> to vector<1x1xi32>
    %c127_i32_280 = arith.constant 127 : i32
    %776 = vector.broadcast %c127_i32_280 : i32 to vector<1x1xi32>
    %777 = arith.andi %775, %776 : vector<1x1xi32>
    %c127_i32_281 = arith.constant 127 : i32
    %778 = vector.broadcast %c127_i32_281 : i32 to vector<1x1xi32>
    %779 = arith.subi %778, %777 : vector<1x1xi32>
    %780 = vector.shape_cast %779 : vector<1x1xi32> to vector<1x1xi32>
    %781 = vector.broadcast %780 : vector<1x1xi32> to vector<1x128xi32>
    %c1_i32_282 = arith.constant 1 : i32
    %782 = vector.broadcast %c1_i32_282 : i32 to vector<1x1xi32>
    %783 = arith.cmpi eq, %779, %782 : vector<1x1xi32>
    %784 = vector.shape_cast %783 : vector<1x1xi1> to vector<1x1xi1>
    %785 = vector.broadcast %784 : vector<1x1xi1> to vector<1x32xi1>
    %786 = arith.select %785, %113, %61 : vector<1x32xi1>, vector<1x32xf32>
    %c2_i32_283 = arith.constant 2 : i32
    %787 = vector.broadcast %c2_i32_283 : i32 to vector<1x1xi32>
    %788 = arith.cmpi eq, %779, %787 : vector<1x1xi32>
    %789 = vector.shape_cast %788 : vector<1x1xi1> to vector<1x1xi1>
    %790 = vector.broadcast %789 : vector<1x1xi1> to vector<1x32xi1>
    %791 = arith.select %790, %556, %786 : vector<1x32xi1>, vector<1x32xf32>
    %c0_284 = arith.constant 0 : index
    %c0_285 = arith.constant 0 : index
    %c0_286 = arith.constant 0 : index
    %792 = vector.load %arg2[%c0_284, %c0_285, %c0_286] : memref<2x64x128xf32, #tpu.memory_space<vmem>>, vector<1x64x128xf32>
    %793 = vector.shape_cast %792 : vector<1x64x128xf32> to vector<64x128xf32>
    %794 = vector.extract_strided_slice %793 {offsets = [0, 0], sizes = [32, 128], strides = [1, 1]} : vector<64x128xf32> to vector<32x128xf32>
    %cst_287 = arith.constant dense<0.000000e+00> : vector<1x128xf32>
    %795 = tpu.matmul %791, %794, %cst_287 {dimension_numbers = #tpu.dot_dimension_numbers<[1], [0], [0], [1], [0, 0, 1, 1], [], []>} : vector<1x32xf32>, vector<32x128xf32>, vector<1x128xf32> -> vector<1x128xf32>
    %796 = vector.extract_strided_slice %793 {offsets = [32, 0], sizes = [32, 128], strides = [1, 1]} : vector<64x128xf32> to vector<32x128xf32>
    %cst_288 = arith.constant dense<0.000000e+00> : vector<1x128xf32>
    %797 = tpu.matmul %699, %796, %cst_288 {dimension_numbers = #tpu.dot_dimension_numbers<[1], [0], [0], [1], [0, 0, 1, 1], [], []>} : vector<1x32xf32>, vector<32x128xf32>, vector<1x128xf32> -> vector<1x128xf32>
    %798 = arith.addf %795, %797 : vector<1x128xf32>
    %c0_289 = arith.constant 0 : index
    %c0_290 = arith.constant 0 : index
    %799 = vector.load %arg3[%c0_289, %c0_290] : memref<2x128xf32, #tpu.memory_space<vmem>>, vector<1x128xf32>
    %800 = arith.addf %798, %799 : vector<1x128xf32>
    %801 = arith.negf %800 : vector<1x128xf32>
    %802 = math.exp %801 : vector<1x128xf32>
    %cst_291 = arith.constant 1.000000e+00 : f32
    %803 = vector.broadcast %cst_291 : f32 to vector<1x128xf32>
    %804 = arith.addf %803, %802 : vector<1x128xf32>
    %805 = arith.divf %803, %804 : vector<1x128xf32>
    %806 = math.tanh %800 : vector<1x128xf32>
    %807 = vector.extract_strided_slice %805 {offsets = [0, 0], sizes = [1, 32], strides = [1, 1]} : vector<1x128xf32> to vector<1x32xf32>
    %808 = vector.extract_strided_slice %805 {offsets = [0, 32], sizes = [1, 32], strides = [1, 1]} : vector<1x128xf32> to vector<1x32xf32>
    %809 = vector.extract_strided_slice %806 {offsets = [0, 64], sizes = [1, 32], strides = [1, 1]} : vector<1x128xf32> to vector<1x32xf32>
    %810 = vector.extract_strided_slice %805 {offsets = [0, 96], sizes = [1, 32], strides = [1, 1]} : vector<1x128xf32> to vector<1x32xf32>
    %811 = arith.mulf %808, %697 : vector<1x32xf32>
    %812 = arith.mulf %807, %809 : vector<1x32xf32>
    %813 = arith.addf %811, %812 : vector<1x32xf32>
    %814 = math.tanh %813 : vector<1x32xf32>
    %815 = arith.mulf %810, %814 : vector<1x32xf32>
    %c1_292 = arith.constant 1 : index
    %c0_293 = arith.constant 0 : index
    %c0_294 = arith.constant 0 : index
    %816 = vector.load %arg2[%c1_292, %c0_293, %c0_294] : memref<2x64x128xf32, #tpu.memory_space<vmem>>, vector<1x64x128xf32>
    %817 = vector.shape_cast %816 : vector<1x64x128xf32> to vector<64x128xf32>
    %818 = vector.extract_strided_slice %817 {offsets = [0, 0], sizes = [32, 128], strides = [1, 1]} : vector<64x128xf32> to vector<32x128xf32>
    %cst_295 = arith.constant dense<0.000000e+00> : vector<1x128xf32>
    %819 = tpu.matmul %815, %818, %cst_295 {dimension_numbers = #tpu.dot_dimension_numbers<[1], [0], [0], [1], [0, 0, 1, 1], [], []>} : vector<1x32xf32>, vector<32x128xf32>, vector<1x128xf32> -> vector<1x128xf32>
    %820 = vector.extract_strided_slice %817 {offsets = [32, 0], sizes = [32, 128], strides = [1, 1]} : vector<64x128xf32> to vector<32x128xf32>
    %cst_296 = arith.constant dense<0.000000e+00> : vector<1x128xf32>
    %821 = tpu.matmul %723, %820, %cst_296 {dimension_numbers = #tpu.dot_dimension_numbers<[1], [0], [0], [1], [0, 0, 1, 1], [], []>} : vector<1x32xf32>, vector<32x128xf32>, vector<1x128xf32> -> vector<1x128xf32>
    %822 = arith.addf %819, %821 : vector<1x128xf32>
    %c1_297 = arith.constant 1 : index
    %c0_298 = arith.constant 0 : index
    %823 = vector.load %arg3[%c1_297, %c0_298] : memref<2x128xf32, #tpu.memory_space<vmem>>, vector<1x128xf32>
    %824 = arith.addf %822, %823 : vector<1x128xf32>
    %825 = arith.negf %824 : vector<1x128xf32>
    %826 = math.exp %825 : vector<1x128xf32>
    %cst_299 = arith.constant 1.000000e+00 : f32
    %827 = vector.broadcast %cst_299 : f32 to vector<1x128xf32>
    %828 = arith.addf %827, %826 : vector<1x128xf32>
    %829 = arith.divf %827, %828 : vector<1x128xf32>
    %830 = math.tanh %824 : vector<1x128xf32>
    %831 = vector.extract_strided_slice %829 {offsets = [0, 0], sizes = [1, 32], strides = [1, 1]} : vector<1x128xf32> to vector<1x32xf32>
    %832 = vector.extract_strided_slice %829 {offsets = [0, 32], sizes = [1, 32], strides = [1, 1]} : vector<1x128xf32> to vector<1x32xf32>
    %833 = vector.extract_strided_slice %830 {offsets = [0, 64], sizes = [1, 32], strides = [1, 1]} : vector<1x128xf32> to vector<1x32xf32>
    %834 = vector.extract_strided_slice %829 {offsets = [0, 96], sizes = [1, 32], strides = [1, 1]} : vector<1x128xf32> to vector<1x32xf32>
    %835 = arith.mulf %832, %721 : vector<1x32xf32>
    %836 = arith.mulf %831, %833 : vector<1x32xf32>
    %837 = arith.addf %835, %836 : vector<1x32xf32>
    %838 = math.tanh %837 : vector<1x32xf32>
    %839 = arith.mulf %834, %838 : vector<1x32xf32>
    %c0_300 = arith.constant 0 : index
    %c0_301 = arith.constant 0 : index
    %840 = vector.load %arg8[%c0_300, %c0_301] : memref<32x128xf32, #tpu.memory_space<vmem>>, vector<32x128xf32>
    %cst_302 = arith.constant dense<0.000000e+00> : vector<1x128xf32>
    %841 = tpu.matmul %839, %840, %cst_302 {dimension_numbers = #tpu.dot_dimension_numbers<[1], [0], [0], [1], [0, 0, 1, 1], [], []>} : vector<1x32xf32>, vector<32x128xf32>, vector<1x128xf32> -> vector<1x128xf32>
    %842 = arith.addf %841, %5 : vector<1x128xf32>
    %843 = arith.addf %842, %6 : vector<1x128xf32>
    %cst_303 = arith.constant 5.000000e+00 : f32
    %844 = vector.broadcast %cst_303 : f32 to vector<1x128xf32>
    %845 = arith.divf %843, %844 : vector<1x128xf32>
    %846 = math.tanh %845 : vector<1x128xf32>
    %cst_304 = arith.constant 4.400000e-01 : f32
    %847 = vector.broadcast %cst_304 : f32 to vector<1x128xf32>
    %848 = arith.mulf %847, %846 : vector<1x128xf32>
    %849 = arith.addf %848, %7 : vector<1x128xf32>
    %c5_i32_305 = arith.constant 5 : i32
    %850 = vector.broadcast %c5_i32_305 : i32 to vector<1x128xi32>
    %851 = arith.cmpi slt, %0, %850 : vector<1x128xi32>
    %cst_306 = arith.constant -1.000000e+30 : f32
    %852 = vector.broadcast %cst_306 : f32 to vector<1x128xf32>
    %853 = arith.select %851, %849, %852 : vector<1x128xi1>, vector<1x128xf32>
    %c6_307 = arith.constant 6 : index
    %c0_308 = arith.constant 0 : index
    %854 = vector.load %arg10[%c6_307, %c0_308] : memref<8x128xf32, #tpu.memory_space<vmem>>, vector<1x128xf32>
    %855 = arith.addf %853, %854 : vector<1x128xf32>
    %856 = tpu.bitcast %855 : vector<1x128xf32> -> vector<1x128xi32>
    %c0_i32_309 = arith.constant 0 : i32
    %857 = vector.broadcast %c0_i32_309 : i32 to vector<1x128xi32>
    %858 = arith.cmpi slt, %856, %857 : vector<1x128xi32>
    %c2147483647_i32_310 = arith.constant 2147483647 : i32
    %859 = vector.broadcast %c2147483647_i32_310 : i32 to vector<1x128xi32>
    %860 = arith.xori %856, %859 : vector<1x128xi32>
    %861 = arith.select %858, %860, %856 : vector<1x128xi1>, vector<1x128xi32>
    %c-128_i32_311 = arith.constant -128 : i32
    %862 = vector.broadcast %c-128_i32_311 : i32 to vector<1x128xi32>
    %863 = arith.andi %861, %862 : vector<1x128xi32>
    %c127_i32_312 = arith.constant 127 : i32
    %864 = vector.broadcast %c127_i32_312 : i32 to vector<1x128xi32>
    %865 = arith.subi %864, %0 : vector<1x128xi32>
    %866 = arith.ori %863, %865 : vector<1x128xi32>
    %cst_313 = arith.constant dense<-2147483648> : vector<1xi32>
    %867 = vector.multi_reduction <maxsi>, %866, %cst_313 [1] : vector<1x128xi32> to vector<1xi32>
    %868 = vector.shape_cast %867 : vector<1xi32> to vector<1x1xi32>
    %c127_i32_314 = arith.constant 127 : i32
    %869 = vector.broadcast %c127_i32_314 : i32 to vector<1x1xi32>
    %870 = arith.andi %868, %869 : vector<1x1xi32>
    %c127_i32_315 = arith.constant 127 : i32
    %871 = vector.broadcast %c127_i32_315 : i32 to vector<1x1xi32>
    %872 = arith.subi %871, %870 : vector<1x1xi32>
    %873 = vector.shape_cast %872 : vector<1x1xi32> to vector<1x1xi32>
    %874 = vector.broadcast %873 : vector<1x1xi32> to vector<1x128xi32>
    %875 = tpu.iota {dimensions = array<i32: 0>} : vector<5x32xi32>
    %876 = vector.broadcast %872 : vector<1x1xi32> to vector<5x32xi32>
    %877 = arith.cmpi eq, %875, %876 : vector<5x32xi32>
    %c0_316 = arith.constant 0 : index
    %c0_317 = arith.constant 0 : index
    %878 = vector.load %arg5[%c0_316, %c0_317] : memref<5x32xf32, #tpu.memory_space<vmem>>, vector<5x32xf32>
    %cst_318 = arith.constant 0.000000e+00 : f32
    %879 = vector.broadcast %cst_318 : f32 to vector<5x32xf32>
    %880 = arith.select %877, %878, %879 : vector<5x32xi1>, vector<5x32xf32>
    %cst_319 = arith.constant dense<0.000000e+00> : vector<32xf32>
    %881 = vector.multi_reduction <add>, %880, %cst_319 [0] : vector<5x32xf32> to vector<32xf32>
    %882 = vector.shape_cast %881 : vector<32xf32> to vector<1x32xf32>
    %c0_320 = arith.constant 0 : index
    %c0_321 = arith.constant 0 : index
    %c0_322 = arith.constant 0 : index
    %883 = vector.load %arg2[%c0_320, %c0_321, %c0_322] : memref<2x64x128xf32, #tpu.memory_space<vmem>>, vector<1x64x128xf32>
    %884 = vector.shape_cast %883 : vector<1x64x128xf32> to vector<64x128xf32>
    %885 = vector.extract_strided_slice %884 {offsets = [0, 0], sizes = [32, 128], strides = [1, 1]} : vector<64x128xf32> to vector<32x128xf32>
    %cst_323 = arith.constant dense<0.000000e+00> : vector<1x128xf32>
    %886 = tpu.matmul %882, %885, %cst_323 {dimension_numbers = #tpu.dot_dimension_numbers<[1], [0], [0], [1], [0, 0, 1, 1], [], []>} : vector<1x32xf32>, vector<32x128xf32>, vector<1x128xf32> -> vector<1x128xf32>
    %887 = vector.extract_strided_slice %884 {offsets = [32, 0], sizes = [32, 128], strides = [1, 1]} : vector<64x128xf32> to vector<32x128xf32>
    %cst_324 = arith.constant dense<0.000000e+00> : vector<1x128xf32>
    %888 = tpu.matmul %815, %887, %cst_324 {dimension_numbers = #tpu.dot_dimension_numbers<[1], [0], [0], [1], [0, 0, 1, 1], [], []>} : vector<1x32xf32>, vector<32x128xf32>, vector<1x128xf32> -> vector<1x128xf32>
    %889 = arith.addf %886, %888 : vector<1x128xf32>
    %c0_325 = arith.constant 0 : index
    %c0_326 = arith.constant 0 : index
    %890 = vector.load %arg3[%c0_325, %c0_326] : memref<2x128xf32, #tpu.memory_space<vmem>>, vector<1x128xf32>
    %891 = arith.addf %889, %890 : vector<1x128xf32>
    %892 = arith.negf %891 : vector<1x128xf32>
    %893 = math.exp %892 : vector<1x128xf32>
    %cst_327 = arith.constant 1.000000e+00 : f32
    %894 = vector.broadcast %cst_327 : f32 to vector<1x128xf32>
    %895 = arith.addf %894, %893 : vector<1x128xf32>
    %896 = arith.divf %894, %895 : vector<1x128xf32>
    %897 = math.tanh %891 : vector<1x128xf32>
    %898 = vector.extract_strided_slice %896 {offsets = [0, 0], sizes = [1, 32], strides = [1, 1]} : vector<1x128xf32> to vector<1x32xf32>
    %899 = vector.extract_strided_slice %896 {offsets = [0, 32], sizes = [1, 32], strides = [1, 1]} : vector<1x128xf32> to vector<1x32xf32>
    %900 = vector.extract_strided_slice %897 {offsets = [0, 64], sizes = [1, 32], strides = [1, 1]} : vector<1x128xf32> to vector<1x32xf32>
    %901 = vector.extract_strided_slice %896 {offsets = [0, 96], sizes = [1, 32], strides = [1, 1]} : vector<1x128xf32> to vector<1x32xf32>
    %902 = arith.mulf %899, %813 : vector<1x32xf32>
    %903 = arith.mulf %898, %900 : vector<1x32xf32>
    %904 = arith.addf %902, %903 : vector<1x32xf32>
    %905 = math.tanh %904 : vector<1x32xf32>
    %906 = arith.mulf %901, %905 : vector<1x32xf32>
    %c1_328 = arith.constant 1 : index
    %c0_329 = arith.constant 0 : index
    %c0_330 = arith.constant 0 : index
    %907 = vector.load %arg2[%c1_328, %c0_329, %c0_330] : memref<2x64x128xf32, #tpu.memory_space<vmem>>, vector<1x64x128xf32>
    %908 = vector.shape_cast %907 : vector<1x64x128xf32> to vector<64x128xf32>
    %909 = vector.extract_strided_slice %908 {offsets = [0, 0], sizes = [32, 128], strides = [1, 1]} : vector<64x128xf32> to vector<32x128xf32>
    %cst_331 = arith.constant dense<0.000000e+00> : vector<1x128xf32>
    %910 = tpu.matmul %906, %909, %cst_331 {dimension_numbers = #tpu.dot_dimension_numbers<[1], [0], [0], [1], [0, 0, 1, 1], [], []>} : vector<1x32xf32>, vector<32x128xf32>, vector<1x128xf32> -> vector<1x128xf32>
    %911 = vector.extract_strided_slice %908 {offsets = [32, 0], sizes = [32, 128], strides = [1, 1]} : vector<64x128xf32> to vector<32x128xf32>
    %cst_332 = arith.constant dense<0.000000e+00> : vector<1x128xf32>
    %912 = tpu.matmul %839, %911, %cst_332 {dimension_numbers = #tpu.dot_dimension_numbers<[1], [0], [0], [1], [0, 0, 1, 1], [], []>} : vector<1x32xf32>, vector<32x128xf32>, vector<1x128xf32> -> vector<1x128xf32>
    %913 = arith.addf %910, %912 : vector<1x128xf32>
    %c1_333 = arith.constant 1 : index
    %c0_334 = arith.constant 0 : index
    %914 = vector.load %arg3[%c1_333, %c0_334] : memref<2x128xf32, #tpu.memory_space<vmem>>, vector<1x128xf32>
    %915 = arith.addf %913, %914 : vector<1x128xf32>
    %916 = arith.negf %915 : vector<1x128xf32>
    %917 = math.exp %916 : vector<1x128xf32>
    %cst_335 = arith.constant 1.000000e+00 : f32
    %918 = vector.broadcast %cst_335 : f32 to vector<1x128xf32>
    %919 = arith.addf %918, %917 : vector<1x128xf32>
    %920 = arith.divf %918, %919 : vector<1x128xf32>
    %921 = math.tanh %915 : vector<1x128xf32>
    %922 = vector.extract_strided_slice %920 {offsets = [0, 0], sizes = [1, 32], strides = [1, 1]} : vector<1x128xf32> to vector<1x32xf32>
    %923 = vector.extract_strided_slice %920 {offsets = [0, 32], sizes = [1, 32], strides = [1, 1]} : vector<1x128xf32> to vector<1x32xf32>
    %924 = vector.extract_strided_slice %921 {offsets = [0, 64], sizes = [1, 32], strides = [1, 1]} : vector<1x128xf32> to vector<1x32xf32>
    %925 = vector.extract_strided_slice %920 {offsets = [0, 96], sizes = [1, 32], strides = [1, 1]} : vector<1x128xf32> to vector<1x32xf32>
    %926 = arith.mulf %923, %837 : vector<1x32xf32>
    %927 = arith.mulf %922, %924 : vector<1x32xf32>
    %928 = arith.addf %926, %927 : vector<1x32xf32>
    %929 = math.tanh %928 : vector<1x32xf32>
    %930 = arith.mulf %925, %929 : vector<1x32xf32>
    %c0_336 = arith.constant 0 : index
    %c0_337 = arith.constant 0 : index
    %931 = vector.load %arg8[%c0_336, %c0_337] : memref<32x128xf32, #tpu.memory_space<vmem>>, vector<32x128xf32>
    %cst_338 = arith.constant dense<0.000000e+00> : vector<1x128xf32>
    %932 = tpu.matmul %930, %931, %cst_338 {dimension_numbers = #tpu.dot_dimension_numbers<[1], [0], [0], [1], [0, 0, 1, 1], [], []>} : vector<1x32xf32>, vector<32x128xf32>, vector<1x128xf32> -> vector<1x128xf32>
    %933 = arith.addf %932, %5 : vector<1x128xf32>
    %934 = arith.addf %933, %6 : vector<1x128xf32>
    %cst_339 = arith.constant 5.000000e+00 : f32
    %935 = vector.broadcast %cst_339 : f32 to vector<1x128xf32>
    %936 = arith.divf %934, %935 : vector<1x128xf32>
    %937 = math.tanh %936 : vector<1x128xf32>
    %cst_340 = arith.constant 4.400000e-01 : f32
    %938 = vector.broadcast %cst_340 : f32 to vector<1x128xf32>
    %939 = arith.mulf %938, %937 : vector<1x128xf32>
    %940 = arith.addf %939, %7 : vector<1x128xf32>
    %c5_i32_341 = arith.constant 5 : i32
    %941 = vector.broadcast %c5_i32_341 : i32 to vector<1x128xi32>
    %942 = arith.cmpi slt, %0, %941 : vector<1x128xi32>
    %cst_342 = arith.constant -1.000000e+30 : f32
    %943 = vector.broadcast %cst_342 : f32 to vector<1x128xf32>
    %944 = arith.select %942, %940, %943 : vector<1x128xi1>, vector<1x128xf32>
    %c7 = arith.constant 7 : index
    %c0_343 = arith.constant 0 : index
    %945 = vector.load %arg10[%c7, %c0_343] : memref<8x128xf32, #tpu.memory_space<vmem>>, vector<1x128xf32>
    %946 = arith.addf %944, %945 : vector<1x128xf32>
    %947 = tpu.bitcast %946 : vector<1x128xf32> -> vector<1x128xi32>
    %c0_i32_344 = arith.constant 0 : i32
    %948 = vector.broadcast %c0_i32_344 : i32 to vector<1x128xi32>
    %949 = arith.cmpi slt, %947, %948 : vector<1x128xi32>
    %c2147483647_i32_345 = arith.constant 2147483647 : i32
    %950 = vector.broadcast %c2147483647_i32_345 : i32 to vector<1x128xi32>
    %951 = arith.xori %947, %950 : vector<1x128xi32>
    %952 = arith.select %949, %951, %947 : vector<1x128xi1>, vector<1x128xi32>
    %c-128_i32_346 = arith.constant -128 : i32
    %953 = vector.broadcast %c-128_i32_346 : i32 to vector<1x128xi32>
    %954 = arith.andi %952, %953 : vector<1x128xi32>
    %c127_i32_347 = arith.constant 127 : i32
    %955 = vector.broadcast %c127_i32_347 : i32 to vector<1x128xi32>
    %956 = arith.subi %955, %0 : vector<1x128xi32>
    %957 = arith.ori %954, %956 : vector<1x128xi32>
    %cst_348 = arith.constant dense<-2147483648> : vector<1xi32>
    %958 = vector.multi_reduction <maxsi>, %957, %cst_348 [1] : vector<1x128xi32> to vector<1xi32>
    %959 = vector.shape_cast %958 : vector<1xi32> to vector<1x1xi32>
    %c127_i32_349 = arith.constant 127 : i32
    %960 = vector.broadcast %c127_i32_349 : i32 to vector<1x1xi32>
    %961 = arith.andi %959, %960 : vector<1x1xi32>
    %c127_i32_350 = arith.constant 127 : i32
    %962 = vector.broadcast %c127_i32_350 : i32 to vector<1x1xi32>
    %963 = arith.subi %962, %961 : vector<1x1xi32>
    %964 = vector.shape_cast %963 : vector<1x1xi32> to vector<1x1xi32>
    %965 = vector.broadcast %964 : vector<1x1xi32> to vector<1x128xi32>
    %966 = tpu.iota {dimensions = array<i32: 0>} : vector<5x32xi32>
    %967 = vector.broadcast %963 : vector<1x1xi32> to vector<5x32xi32>
    %968 = arith.cmpi eq, %966, %967 : vector<5x32xi32>
    %c0_351 = arith.constant 0 : index
    %c0_352 = arith.constant 0 : index
    %969 = vector.load %arg5[%c0_351, %c0_352] : memref<5x32xf32, #tpu.memory_space<vmem>>, vector<5x32xf32>
    %cst_353 = arith.constant 0.000000e+00 : f32
    %970 = vector.broadcast %cst_353 : f32 to vector<5x32xf32>
    %971 = arith.select %968, %969, %970 : vector<5x32xi1>, vector<5x32xf32>
    %cst_354 = arith.constant dense<0.000000e+00> : vector<32xf32>
    %972 = vector.multi_reduction <add>, %971, %cst_354 [0] : vector<5x32xf32> to vector<32xf32>
    %973 = vector.shape_cast %972 : vector<32xf32> to vector<1x32xf32>
    %c0_355 = arith.constant 0 : index
    %c0_356 = arith.constant 0 : index
    %c0_357 = arith.constant 0 : index
    %974 = vector.load %arg2[%c0_355, %c0_356, %c0_357] : memref<2x64x128xf32, #tpu.memory_space<vmem>>, vector<1x64x128xf32>
    %975 = vector.shape_cast %974 : vector<1x64x128xf32> to vector<64x128xf32>
    %976 = vector.extract_strided_slice %975 {offsets = [0, 0], sizes = [32, 128], strides = [1, 1]} : vector<64x128xf32> to vector<32x128xf32>
    %cst_358 = arith.constant dense<0.000000e+00> : vector<1x128xf32>
    %977 = tpu.matmul %973, %976, %cst_358 {dimension_numbers = #tpu.dot_dimension_numbers<[1], [0], [0], [1], [0, 0, 1, 1], [], []>} : vector<1x32xf32>, vector<32x128xf32>, vector<1x128xf32> -> vector<1x128xf32>
    %978 = vector.extract_strided_slice %975 {offsets = [32, 0], sizes = [32, 128], strides = [1, 1]} : vector<64x128xf32> to vector<32x128xf32>
    %cst_359 = arith.constant dense<0.000000e+00> : vector<1x128xf32>
    %979 = tpu.matmul %906, %978, %cst_359 {dimension_numbers = #tpu.dot_dimension_numbers<[1], [0], [0], [1], [0, 0, 1, 1], [], []>} : vector<1x32xf32>, vector<32x128xf32>, vector<1x128xf32> -> vector<1x128xf32>
    %980 = arith.addf %977, %979 : vector<1x128xf32>
    %c0_360 = arith.constant 0 : index
    %c0_361 = arith.constant 0 : index
    %981 = vector.load %arg3[%c0_360, %c0_361] : memref<2x128xf32, #tpu.memory_space<vmem>>, vector<1x128xf32>
    %982 = arith.addf %980, %981 : vector<1x128xf32>
    %983 = arith.negf %982 : vector<1x128xf32>
    %984 = math.exp %983 : vector<1x128xf32>
    %cst_362 = arith.constant 1.000000e+00 : f32
    %985 = vector.broadcast %cst_362 : f32 to vector<1x128xf32>
    %986 = arith.addf %985, %984 : vector<1x128xf32>
    %987 = arith.divf %985, %986 : vector<1x128xf32>
    %988 = math.tanh %982 : vector<1x128xf32>
    %989 = vector.extract_strided_slice %987 {offsets = [0, 0], sizes = [1, 32], strides = [1, 1]} : vector<1x128xf32> to vector<1x32xf32>
    %990 = vector.extract_strided_slice %987 {offsets = [0, 32], sizes = [1, 32], strides = [1, 1]} : vector<1x128xf32> to vector<1x32xf32>
    %991 = vector.extract_strided_slice %988 {offsets = [0, 64], sizes = [1, 32], strides = [1, 1]} : vector<1x128xf32> to vector<1x32xf32>
    %992 = vector.extract_strided_slice %987 {offsets = [0, 96], sizes = [1, 32], strides = [1, 1]} : vector<1x128xf32> to vector<1x32xf32>
    %993 = arith.mulf %990, %904 : vector<1x32xf32>
    %994 = arith.mulf %989, %991 : vector<1x32xf32>
    %995 = arith.addf %993, %994 : vector<1x32xf32>
    %996 = math.tanh %995 : vector<1x32xf32>
    %997 = arith.mulf %992, %996 : vector<1x32xf32>
    %c1_363 = arith.constant 1 : index
    %c0_364 = arith.constant 0 : index
    %c0_365 = arith.constant 0 : index
    %998 = vector.load %arg2[%c1_363, %c0_364, %c0_365] : memref<2x64x128xf32, #tpu.memory_space<vmem>>, vector<1x64x128xf32>
    %999 = vector.shape_cast %998 : vector<1x64x128xf32> to vector<64x128xf32>
    %1000 = vector.extract_strided_slice %999 {offsets = [0, 0], sizes = [32, 128], strides = [1, 1]} : vector<64x128xf32> to vector<32x128xf32>
    %cst_366 = arith.constant dense<0.000000e+00> : vector<1x128xf32>
    %1001 = tpu.matmul %997, %1000, %cst_366 {dimension_numbers = #tpu.dot_dimension_numbers<[1], [0], [0], [1], [0, 0, 1, 1], [], []>} : vector<1x32xf32>, vector<32x128xf32>, vector<1x128xf32> -> vector<1x128xf32>
    %1002 = vector.extract_strided_slice %999 {offsets = [32, 0], sizes = [32, 128], strides = [1, 1]} : vector<64x128xf32> to vector<32x128xf32>
    %cst_367 = arith.constant dense<0.000000e+00> : vector<1x128xf32>
    %1003 = tpu.matmul %930, %1002, %cst_367 {dimension_numbers = #tpu.dot_dimension_numbers<[1], [0], [0], [1], [0, 0, 1, 1], [], []>} : vector<1x32xf32>, vector<32x128xf32>, vector<1x128xf32> -> vector<1x128xf32>
    %1004 = arith.addf %1001, %1003 : vector<1x128xf32>
    %c1_368 = arith.constant 1 : index
    %c0_369 = arith.constant 0 : index
    %1005 = vector.load %arg3[%c1_368, %c0_369] : memref<2x128xf32, #tpu.memory_space<vmem>>, vector<1x128xf32>
    %1006 = arith.addf %1004, %1005 : vector<1x128xf32>
    %1007 = arith.negf %1006 : vector<1x128xf32>
    %1008 = math.exp %1007 : vector<1x128xf32>
    %cst_370 = arith.constant 1.000000e+00 : f32
    %1009 = vector.broadcast %cst_370 : f32 to vector<1x128xf32>
    %1010 = arith.addf %1009, %1008 : vector<1x128xf32>
    %1011 = arith.divf %1009, %1010 : vector<1x128xf32>
    %1012 = math.tanh %1006 : vector<1x128xf32>
    %1013 = vector.extract_strided_slice %1011 {offsets = [0, 0], sizes = [1, 32], strides = [1, 1]} : vector<1x128xf32> to vector<1x32xf32>
    %1014 = vector.extract_strided_slice %1011 {offsets = [0, 32], sizes = [1, 32], strides = [1, 1]} : vector<1x128xf32> to vector<1x32xf32>
    %1015 = vector.extract_strided_slice %1012 {offsets = [0, 64], sizes = [1, 32], strides = [1, 1]} : vector<1x128xf32> to vector<1x32xf32>
    %1016 = vector.extract_strided_slice %1011 {offsets = [0, 96], sizes = [1, 32], strides = [1, 1]} : vector<1x128xf32> to vector<1x32xf32>
    %1017 = arith.mulf %1014, %928 : vector<1x32xf32>
    %1018 = arith.mulf %1013, %1015 : vector<1x32xf32>
    %1019 = arith.addf %1017, %1018 : vector<1x32xf32>
    %1020 = math.tanh %1019 : vector<1x32xf32>
    %1021 = arith.mulf %1016, %1020 : vector<1x32xf32>
    %1022 = tpu.concatenate %997, %1021 in 0 : vector<1x32xf32>, vector<1x32xf32> -> vector<2x32xf32>
    %c0_371 = arith.constant 0 : index
    %c0_372 = arith.constant 0 : index
    %1023 = vector.load %arg11[%c0_371, %c0_372] : memref<2x32xf32, #tpu.memory_space<vmem>>, vector<2x32xf32>
    tpu.vector_store %arg11[%c0_371, %c0_372], %1022 {strides = array<i32>} : memref<2x32xf32, #tpu.memory_space<vmem>>, vector<2x32xf32>,
    %1024 = tpu.concatenate %995, %1019 in 0 : vector<1x32xf32>, vector<1x32xf32> -> vector<2x32xf32>
    %c0_373 = arith.constant 0 : index
    %c0_374 = arith.constant 0 : index
    %1025 = vector.load %arg12[%c0_373, %c0_374] : memref<2x32xf32, #tpu.memory_space<vmem>>, vector<2x32xf32>
    tpu.vector_store %arg12[%c0_373, %c0_374], %1024 {strides = array<i32>} : memref<2x32xf32, #tpu.memory_space<vmem>>, vector<2x32xf32>,
    %1026 = tpu.concatenate %216, %321, %409, %500, %665, %781, %874, %965 in 0 : vector<1x128xi32>, vector<1x128xi32>, vector<1x128xi32>, vector<1x128xi32>, vector<1x128xi32>, vector<1x128xi32>, vector<1x128xi32>, vector<1x128xi32> -> vector<8x128xi32>
    %c0_375 = arith.constant 0 : index
    %c0_376 = arith.constant 0 : index
    %1027 = vector.load %arg13[%c0_375, %c0_376] : memref<8x128xi32, #tpu.memory_space<vmem>>, vector<8x128xi32>
    tpu.vector_store %arg13[%c0_375, %c0_376], %1026 {strides = array<i32>} : memref<8x128xi32, #tpu.memory_space<vmem>>, vector<8x128xi32>,
    %1028 = tpu.concatenate %195, %300, %384, %475, %644, %760, %849, %940 in 0 : vector<1x128xf32>, vector<1x128xf32>, vector<1x128xf32>, vector<1x128xf32>, vector<1x128xf32>, vector<1x128xf32>, vector<1x128xf32>, vector<1x128xf32> -> vector<8x128xf32>
    %c0_377 = arith.constant 0 : index
    %c0_378 = arith.constant 0 : index
    %1029 = vector.load %arg14[%c0_377, %c0_378] : memref<8x128xf32, #tpu.memory_space<vmem>>, vector<8x128xf32>
    tpu.vector_store %arg14[%c0_377, %c0_378], %1028 {strides = array<i32>} : memref<8x128xf32, #tpu.memory_space<vmem>>, vector<8x128xf32>,
    return
  }
}

</mosaic_0001>

<bundles_post_ra>
// kernel: fwd.1
= control target key start
LH: loop header
LB: loop body
LE: loop exit
PB: predicated region body
PF: predicated region fallthrough
CT: control target
= control target key end

     0   :  { %20 = vsyncpa [#allocation3], 0  ;;  %s8481_s0 = inlined_call_operand.vmem [shape: f32[2,32], index: 0, kind: input, shape index: {}]   ;;  %s8482_s1 = inlined_call_operand.vmem [shape: f32[2,32], index: 1, kind: input, shape index: {}]   ;;  %s8483_s2 = inlined_call_operand.hbm [shape: f32[2,64,128], index: 2, kind: input, shape index: {}]   ;;  %s8484_s3 = inlined_call_operand.hbm [shape: f32[2,128], index: 3, kind: input, shape index: {}]   ;;  %s8485_s4 = inlined_call_operand.vmem [shape: f32[1,32], index: 4, kind: input, shape index: {}]   ;;  %s8486_s5 = inlined_call_operand.vmem [shape: f32[5,32], index: 5, kind: input, shape index: {}]   ;;  %s8487_s6 = inlined_call_operand.vmem [shape: f32[32,32], index: 6, kind: input, shape index: {}]   ;;  %s8488_s7 = inlined_call_operand.hbm [shape: f32[32,32], index: 7, kind: input, shape index: {}]   ;;  %s8489_s8 = inlined_call_operand.hbm [shape: f32[32,128], index: 8, kind: input, shape index: {}]   ;;  %s8490_s9 = inlined_call_operand.vmem [shape: f32[8,128], index: 9, kind: input, shape index: {}]   ;;  %s8491_s10 = inlined_call_operand.vmem [shape: f32[8,128], index: 10, kind: input, shape index: {}]   ;;  %s8492_s11 = inlined_call_operand.hbm [shape: f32[2,32], index: 11, kind: output, shape index: {0}]   ;;  %s8493_s12 = inlined_call_operand.hbm [shape: f32[2,32], index: 12, kind: output, shape index: {1}]   ;;  %s8494_s13 = inlined_call_operand.vmem [shape: s32[8,128], index: 13, kind: output, shape index: {2}]   ;;  %s8495_s14 = inlined_call_operand.vmem [shape: f32[8,128], index: 14, kind: output, shape index: {3}]  }
   0x1   :  { %21 = vsyncpa [#allocation6], 0 }
   0x2   :  { %22 = vsyncpa [#allocation9], 0 }
   0x3   :  { %23 = vsyncpa [#allocation4], 0 }
   0x4   :  { %24 = vsyncpa [#allocation12], 0  ;;  %s7016_s29 = smov [#allocation5]   ;;  %s7017_s15 = smov [#allocation2]  }
   0x5   :  { %s47_s30 = sshll.u32 %s7016_s29, 4  ;;  %s34_s16 = sshll.u32 %s7017_s15, 4  ;;  %s48_s30 = int_to_ptr.vmem [resolvable:$true] %s47_s30  ;;  %s35_s16 = int_to_ptr.vmem [resolvable:$true] %s34_s16 }
   0x6   :  { %s6894_s17 = scalar_lea.vmem %s48_s30, 32  ;;  %p6899_p1 = scmp.lt.s32.totalorder %s48_s30, %s48_s30 }
   0x7   :  { %p6895_p0 = scmp.ne.s32.totalorder %s48_s30, %s6894_s17  ;;  %p6900_p2 = scmp.lt.s32.totalorder %s6894_s17, %s6894_s17 }
   0x9   :  { %p6901_p3 = por %p6900_p2, %p6899_p1 }
   0xb   :  { %p6902_p4 = pnand %p6901_p3, %p6895_p0 }
   0xd   :  { %6905 = shalt.err (!%p6902_p4)
}
   0xe   :  { %50 = dma.hbm_to_vmem [thread:$0]  %s8484_s3, 32, %s48_s30, [#allocation6]  }
   0xf   :  { %s6914_s20 = scalar_lea.vmem %s35_s16, 2048  ;;  %p6919_p6 = scmp.lt.s32.totalorder %s35_s16, %s35_s16 }
  0x10   :  { %p6915_p5 = scmp.ne.s32.totalorder %s35_s16, %s6914_s20  ;;  %p6920_p7 = scmp.lt.s32.totalorder %s6914_s20, %s6914_s20 }
  0x12   :  { %p6921_p8 = por %p6920_p7, %p6919_p6 }
  0x14   :  { %p6922_p9 = pnand %p6921_p8, %p6915_p5 }
  0x16   :  { %6925 = shalt.err (!%p6922_p9)
}
  0x17   :  { %s7018_s21 = smov 128   ;;  %s7019_s22 = smov 8  }
  0x18   :  { %40 = dma.hbm_to_vmem [thread:$0]  %s8483_s2, 2048, %s35_s16, [#allocation3], %s7018_s21, %s7018_s21, %s7019_s22  }
  0x19   :  { %s7020_s25 = smov [#allocation7]   ;;  %s7021_s27 = smov [#allocation8]  }
  0x1a   :  { %s62_s26 = sshll.u32 %s7020_s25, 4  ;;  %s74_s28 = sshll.u32 %s7021_s27, 4  ;;  %s63_s26 = int_to_ptr.vmem [resolvable:$true] %s62_s26  ;;  %s75_s28 = int_to_ptr.vmem [resolvable:$true] %s74_s28 }
  0x1b   :  { %s6934_s3 = scalar_lea.vmem %s63_s26, 512  ;;  %p6939_p11 = scmp.lt.s32.totalorder %s63_s26, %s63_s26 }
  0x1c   :  { %p6935_p10 = scmp.ne.s32.totalorder %s63_s26, %s6934_s3  ;;  %p6940_p12 = scmp.lt.s32.totalorder %s6934_s3, %s6934_s3 }
  0x1e   :  { %p6941_p13 = por %p6940_p12, %p6939_p11 }
  0x20   :  { %p6942_p0 = pnand %p6941_p13, %p6935_p10 }
  0x22   :  { %6945 = shalt.err (!%p6942_p0)
}
  0x23   :  { %68 = dma.hbm_to_vmem [thread:$0]  %s8488_s7, 512, %s63_s26, [#allocation6], %s7018_s21, %s7018_s21, %s7019_s22  }
  0x24   :  { %s6954_s15 = scalar_lea.vmem %s75_s28, 512  ;;  %p6959_p2 = scmp.lt.s32.totalorder %s75_s28, %s75_s28 }
  0x25   :  { %p6955_p1 = scmp.ne.s32.totalorder %s75_s28, %s6954_s15  ;;  %p6960_p3 = scmp.lt.s32.totalorder %s6954_s15, %s6954_s15 }
  0x27   :  { %p6961_p4 = por %p6960_p3, %p6959_p2 }
  0x29   :  { %p6962_p5 = pnand %p6961_p4, %p6955_p1 }
  0x2b   :  { %6965 = shalt.err (!%p6962_p5)
}
  0x2c   :  { %80 = dma.hbm_to_vmem [thread:$0]  %s8489_s8, 512, %s75_s28, [#allocation9], %s7018_s21, %s7018_s21, %s7019_s22  }
  0x2d   :  { %7006 = dma.done.wait [#allocation3], 2048  }
  0x2e   :  { %7007 = vsyncadd [#allocation3], 4294965248 }
  0x2f   :  { %7008 = dma.done.wait [#allocation6], 544  }
  0x30   :  { %7009 = vsyncadd [#allocation6], 4294966752 }
  0x31   :  { %7010 = dma.done.wait [#allocation9], 512  }
  0x32   :  { %7011 = vsyncadd [#allocation9], 4294966784  ;;  %v7022_v0 = vmov 0.0   ;;  %vm7023_vm0 = vmmov 0   ;;  %v7123_v1 = vld [vmem:[#allocation2 + $0x38] sm:$0xff]  ;;  %v7127_v3 = vld [vmem:[#allocation2 + $0x30] sm:$0xff] }
  0x33   :  { %5948 = vmatprep.subr.mxu0 %v7022_v0  ;;  %5959 = vmatprep.subr.mxu1 %v7022_v0  ;;  %v7125_v2 = vld [vmem:[#allocation2 + $0x18] sm:$0xff]  ;;  %v7131_v4 = vld [vmem:[#allocation2 + $0x10] sm:$0xff]  ;;  %v7135_v5 = vld [vmem:[#allocation2 + $0x28] sm:$0xff]  ;;  %vm119_vm1 = vcmask 261120   ;;  %s7024_s19 = smov 64   ;;  %s7025_s22 = smov 32  }
  0x34   :  { %5956 = vmatprep.mubr.msk.f32.mxu0 %vm7023_vm0, %v7022_v0  ;;  %5967 = vmatprep.mubr.msk.f32.mxu1 %vm7023_vm0, %v7022_v0  ;;  %v7137_v6 = vld [vmem:[#allocation2 + $0x8] sm:$0xff]  ;;  %v7143_v7 = vld [vmem:[#allocation2 + $0x20] sm:$0xff]  ;;  %v7182_v30 = vld [vmem:[#allocation2 + $0x78] sm:$0xff]  ;;  %vm1389_vm2 = vcmask 1040384   ;;  %vm2377_vm6 = vcmask 258048   ;;  %vm3668_vm11 = vcmask 1041408  }
  0x35   :  { %5949 = vmatpush3.msra.mxu0 %v7123_v1  ;;  %5960 = vmatpush3.msra.mxu1 %v7125_v2  ;;  %v7145_v8 = vld [vmem:[#allocation2] sm:$0xff]  ;;  %v7184_v31 = vld [vmem:[#allocation2 + $0x58] sm:$0xff]  ;;  %v7186_v32 = vld [vmem:[#allocation2 + $0x70] sm:$0xff]  ;;  %vm3677_vm12 = vcmask 256000   ;;  %s7028_s26 = smov [#allocation11]  }
  0x36   :  { %5950 = vmatprep.subr.mxu0 %v7022_v0  ;;  %5961 = vmatprep.subr.mxu1 %v7022_v0  ;;  %v106_v9 = vld [vmem:[%s8481_s0] sm:$0x1]  ;;  %v7190_v33 = vld [vmem:[#allocation2 + $0x50] sm:$0xff]  ;;  %v7194_v34 = vld [vmem:[#allocation2 + $0x68] sm:$0xff]  ;;  %s5547_s27 = sshll.u32 %s7028_s26, 4  ;;  %s5548_s27 = int_to_ptr.vmem [resolvable:$true] %s5547_s27 }
  0x37   :  { %5951 = vmatpush3.msra.mxu0 %v7127_v3  ;;  %5962 = vmatpush3.msra.mxu1 %v7131_v4  ;;  %v7155_v10 = vld [vmem:[%s8485_s4] sm:$0x1]  ;;  %v7196_v35 = vld [vmem:[#allocation2 + $0x48] sm:$0xff]  ;;  %v107_v38 = vld [vmem:[%s8481_s0 + $0x1] sm:$0x1]  ;;  %p6971_p7 = scmp.lt.s32.totalorder %s5548_s27, %s5548_s27 }
  0x38   :  { %5952 = vmatprep.subr.mxu0 %v7022_v0  ;;  %5963 = vmatprep.subr.mxu1 %v7022_v0  ;;  %v7170_v13 = vld [vmem:[#allocation5] sm:$0x1]  ;;  %v109_v42 = vld [vmem:[%s8482_s1 + $0x1] sm:$0x1] }
  0x39   :  { %5953 = vmatpush3.msra.mxu0 %v7135_v5  ;;  %5964 = vmatpush3.msra.mxu1 %v7137_v6  ;;  %v108_v19 = vld [vmem:[%s8482_s1] sm:$0x1]  ;;  %v7248_v47 = vld [vmem:[#allocation5 + $0x1] sm:$0x1] }
  0x3a   :  { %5954 = vmatprep.subr.mxu0 %v7022_v0  ;;  %5965 = vmatprep.subr.mxu1 %v7022_v0  ;;  %v7202_v36 = vld [vmem:[#allocation2 + $0x60] sm:$0xff] }
  0x3b   :  { %5955 = vmatpush3.msra.mxu0 %v7143_v7  ;;  %5966 = vmatpush3.msra.mxu1 %v7145_v8  ;;  %v7204_v37 = vld [vmem:[#allocation2 + $0x40] sm:$0xff] }
  0x3c   :  { %5957 = vmatmul.mubr.msk.f32.vlgmr.msra.gmra.mxu0 %vm119_vm1, %v106_v9  ;;  %5968 = vmatmul.mubr.msk.f32.vlgmr.msra.gmra.mxu1 %vm119_vm1, %v7155_v10  ;;  %v486_v9 = vld [vmem:[%s8487_s6 + $0x18] sm:$0xff] }
  0x3d   :  { %5970 = vmatprep.subr.mxu0 %v7022_v0  ;;  %5981 = vmatprep.subr.mxu1 %v7022_v0 }
  0x3e   :  { %5978 = vmatprep.mubr.msk.f32.mxu0 %vm7023_vm0, %v7022_v0  ;;  %5989 = vmatprep.mubr.msk.f32.mxu1 %vm7023_vm0, %v7022_v0 }
  0x3f   :  { %5971 = vmatpush3.msra.mxu0 %v7182_v30  ;;  %5982 = vmatpush3.msra.mxu1 %v7184_v31 }
  0x40   :  { %5972 = vmatprep.subr.mxu0 %v7022_v0  ;;  %5983 = vmatprep.subr.mxu1 %v7022_v0 }
  0x41   :  { %5973 = vmatpush3.msra.mxu0 %v7186_v32  ;;  %5984 = vmatpush3.msra.mxu1 %v7190_v33 }
  0x42   :  { %5974 = vmatprep.subr.mxu0 %v7022_v0  ;;  %5985 = vmatprep.subr.mxu1 %v7022_v0 }
  0x43   :  { %5975 = vmatpush3.msra.mxu0 %v7194_v34  ;;  %5986 = vmatpush3.msra.mxu1 %v7196_v35 }
  0x44   :  { %5976 = vmatprep.subr.mxu0 %v7022_v0  ;;  %5987 = vmatprep.subr.mxu1 %v7022_v0 }
  0x45   :  { %5977 = vmatpush3.msra.mxu0 %v7202_v36  ;;  %5988 = vmatpush3.msra.mxu1 %v7204_v37 }
  0x46   :  { %5979 = vmatmul.mubr.msk.f32.vlgmr.msra.gmra.mxu0 %vm119_vm1, %v107_v38  ;;  %6003 = vmatprep.subr.mxu1 %v7022_v0 }
  0x47   :  { %5992 = vmatprep.subr.mxu0 %v7022_v0  ;;  %6000 = vmatprep.mubr.msk.f32.mxu0 %vm7023_vm0, %v7022_v0 }
  0x48   :  { %5993 = vmatpush3.msra.mxu0 %v486_v9 }
  0x49   :  { %5994 = vmatprep.subr.mxu0 %v7022_v0 }
  0xfc   :  { %v189_v11 = vpop.f32.mrf.mxu0  ;;  %v262_v12 = vpop.f32.mrf.mxu1 }
  0xfd   :  { %v263_v14 = vadd.f32 %v262_v12, %v189_v11  ;;  %v485_v11 = vld [vmem:[%s8487_s6 + $0x10] sm:$0xff]  ;;  %v484_v12 = vld [vmem:[%s8487_s6 + $0x8] sm:$0xff] }
  0xfe   :  { %v5958_v15 = vpop.f32.mrf.mxu0  ;;  %v5969_v16 = vpop.f32.mrf.mxu1  ;;  %5995 = vmatpush3.msra.mxu0 %v485_v11 }
  0xff   :  { %v267_v17 = vadd.f32 %v7170_v13, %v263_v14  ;;  %5996 = vmatprep.subr.mxu0 %v7022_v0  ;;  %v483_v14 = vld [vmem:[%s8487_s6] sm:$0xff] }
 0x100   :  { %5997 = vmatpush3.msra.mxu0 %v484_v12 }
 0x101   :  { %6613 = vtanh.f32 %v267_v17  ;;  %v5572_v20 = vmul.f32 -1.442695, %v267_v17  ;;  %5998 = vmatprep.subr.mxu0 %v7022_v0 }
 0x102   :  { %5999 = vmatpush3.msra.mxu0 %v483_v14 }
 0x103   :  { %6615 = vpow2.f32 %v5572_v20  ;;  %6014 = vmatprep.subr.mxu0 %v7022_v0 }
 0x106   :  { %v374_v43 = vpop.f32.mrf.mxu0 }
 0x108   :  { %v5980_v44 = vpop.f32.mrf.mxu0 }
 0x10e   :  { %v6614_v18 = vpop.eup %6613 }
 0x10f   :  { %281 = vrot.lane.b32.xlu0 %v6614_v18, %s7024_s19 }
 0x110   :  { %v6616_v21 = vpop.eup %6615 }
 0x111   :  { %v271_v22 = vadd.f32 1.0, %v6616_v21 }
 0x113   :  { %276 = vrot.lane.b32.xlu0 %v108_v19, %s7025_s22  ;;  %6617 = vrcp.f32 %v271_v22 }
 0x120   :  { %v6618_v23 = vpop.eup %6617 }
 0x181   :  { %v282_v24 = vpop.permute.xlu0 %281 }
 0x182   :  { %v284_v25 = vmul.f32 %v6618_v23, %v282_v24 }
 0x184   :  { %286 = vrot.lane.b32.xlu1 %v284_v25, %s7025_s22 }
 0x185   :  { %v277_v26 = vpop.permute.xlu0 %276 }
 0x186   :  { %v279_v27 = vmul.f32 %v6618_v23, %v277_v26 }
 0x1f6   :  { %v287_v28 = vpop.permute.xlu1 %286 }
 0x1f7   :  { %v7179_v29 = vadd.f32 %v287_v28, %v279_v27 }
 0x1f9   :  { %6619 = vtanh.f32 %v7179_v29 }
 0x206   :  { %v6620_v39 = vpop.eup %6619 }
 0x207   :  { %292 = vrot.lane.b32.xlu1 %v6620_v39, %s7024_s19 }
 0x279   :  { %v293_v40 = vpop.permute.xlu1 %292 }
 0x27a   :  { %v295_v41 = vmul.f32 %v6618_v23, %v293_v40 }
 0x27c   :  { %379 = vrot.lane.b32.xlu0 %v295_v41, %s7025_s22 }
 0x280   :  { %463 = vrot.lane.b32.xlu0 %v109_v42, %s7025_s22 }
 0x2ee   :  { %v380_v45 = vpop.permute.xlu0 %379 }
 0x2ef   :  { %5990 = vmatmul.mubr.msk.f32.vlgmr.msra.gmra.mxu1 %vm119_vm1, %v380_v45 }
 0x2f0   :  { %6004 = vmatpush3.msra.mxu1 %v7123_v1  ;;  %6011 = vmatprep.mubr.msk.f32.mxu1 %vm7023_vm0, %v7022_v0 }
 0x2f1   :  { %6005 = vmatprep.subr.mxu1 %v7022_v0 }
 0x2f2   :  { %6006 = vmatpush3.msra.mxu1 %v7127_v3  ;;  %v464_v60 = vpop.permute.xlu0 %463 }
 0x2f3   :  { %6007 = vmatprep.subr.mxu1 %v7022_v0 }
 0x2f4   :  { %6008 = vmatpush3.msra.mxu1 %v7135_v5 }
 0x2f5   :  { %6009 = vmatprep.subr.mxu1 %v7022_v0 }
 0x2f6   :  { %6010 = vmatpush3.msra.mxu1 %v7143_v7 }
 0x2f7   :  { %6012 = vmatmul.mubr.msk.f32.vlgmr.msra.gmra.mxu1 %vm119_vm1, %v380_v45  ;;  %6025 = vmatprep.subr.mxu1 %v7022_v0 }
 0x2f8   :  { %6026 = vmatpush3.msra.mxu1 %v7182_v30  ;;  %6033 = vmatprep.mubr.msk.f32.mxu1 %vm7023_vm0, %v7022_v0 }
 0x2f9   :  { %6027 = vmatprep.subr.mxu1 %v7022_v0 }
 0x2fa   :  { %6028 = vmatpush3.msra.mxu1 %v7186_v32 }
 0x2fb   :  { %6029 = vmatprep.subr.mxu1 %v7022_v0 }
 0x2fc   :  { %6030 = vmatpush3.msra.mxu1 %v7194_v34 }
 0x2fd   :  { %6031 = vmatprep.subr.mxu1 %v7022_v0 }
 0x2fe   :  { %6032 = vmatpush3.msra.mxu1 %v7202_v36 }
 0x2ff   :  { %6047 = vmatprep.subr.mxu1 %v7022_v0 }
 0x3af   :  { %v449_v46 = vpop.f32.mrf.mxu1 }
 0x3b0   :  { %v450_v48 = vadd.f32 %v449_v46, %v374_v43 }
 0x3b1   :  { %v5991_v49 = vpop.f32.mrf.mxu1 }
 0x3b2   :  { %v454_v50 = vadd.f32 %v7248_v47, %v450_v48 }
 0x3b4   :  { %6621 = vtanh.f32 %v454_v50  ;;  %v5575_v54 = vmul.f32 -1.442695, %v454_v50 }
 0x3b6   :  { %6623 = vpow2.f32 %v5575_v54 }
 0x3b7   :  { %v7251_v51 = vpop.f32.mrf.mxu1 }
 0x3b9   :  { %v6013_v52 = vpop.f32.mrf.mxu1 }
 0x3c1   :  { %v6622_v53 = vpop.eup %6621 }
 0x3c2   :  { %468 = vrot.lane.b32.xlu1 %v6622_v53, %s7024_s19 }
 0x3c3   :  { %v6624_v55 = vpop.eup %6623 }
 0x3c4   :  { %v458_v56 = vadd.f32 1.0, %v6624_v55 }
 0x3c6   :  { %6625 = vrcp.f32 %v458_v56 }
 0x3d3   :  { %v6626_v57 = vpop.eup %6625 }
 0x3d4   :  { %v466_v61 = vmul.f32 %v6626_v57, %v464_v60 }
 0x434   :  { %v469_v58 = vpop.permute.xlu1 %468 }
 0x435   :  { %v471_v59 = vmul.f32 %v6626_v57, %v469_v58 }
 0x437   :  { %473 = vrot.lane.b32.xlu1 %v471_v59, %s7025_s22 }
 0x4a9   :  { %v474_v62 = vpop.permute.xlu1 %473 }
 0x4aa   :  { %v7255_v63 = vadd.f32 %v474_v62, %v466_v61 }
 0x4ac   :  { %6627 = vtanh.f32 %v7255_v63 }
 0x4b9   :  { %v6628_v15 = vpop.eup %6627 }
 0x4ba   :  { %479 = vrot.lane.b32.xlu0 %v6628_v15, %s7024_s19 }
 0x52c   :  { %v480_v16 = vpop.permute.xlu0 %479 }
 0x52d   :  { %v482_v17 = vmul.f32 %v6626_v57, %v480_v16 }
 0x52f   :  { %488 = vrot.lane.b32.xlu1 %v482_v17, %s7025_s22 }
 0x5a1   :  { %v489_v18 = vpop.permute.xlu1 %488 }
 0x5a2   :  { %6001 = vmatmul.mubr.msk.f32.vlgmr.msra.gmra.mxu0 %vm119_vm1, %v489_v18  ;;  %6034 = vmatmul.mubr.msk.f32.vlgmr.msra.gmra.mxu1 %vm119_vm1, %v489_v18 }
 0x5a3   :  { %6015 = vmatpush3.msra.mxu0 %v7125_v2  ;;  %6022 = vmatprep.mubr.msk.f32.mxu0 %vm7023_vm0, %v7022_v0 }
 0x5a4   :  { %6016 = vmatprep.subr.mxu0 %v7022_v0  ;;  %6048 = vmatpush3.msra.mxu1 %v486_v9 }
 0x5a5   :  { %6017 = vmatpush3.msra.mxu0 %v7131_v4  ;;  %6049 = vmatprep.subr.mxu1 %v7022_v0 }
 0x5a6   :  { %6018 = vmatprep.subr.mxu0 %v7022_v0  ;;  %6050 = vmatpush3.msra.mxu1 %v485_v11 }
 0x5a7   :  { %6019 = vmatpush3.msra.mxu0 %v7137_v6  ;;  %6051 = vmatprep.subr.mxu1 %v7022_v0 }
 0x5a8   :  { %6020 = vmatprep.subr.mxu0 %v7022_v0  ;;  %6052 = vmatpush3.msra.mxu1 %v484_v12 }
 0x5a9   :  { %6021 = vmatpush3.msra.mxu0 %v7145_v8  ;;  %6053 = vmatprep.subr.mxu1 %v7022_v0 }
 0x5aa   :  { %6023 = vmatmul.mubr.msk.f32.vlgmr.msra.gmra.mxu0 %vm119_vm1, %v7155_v10  ;;  %6036 = vmatprep.subr.mxu0 %v7022_v0 }
 0x5ab   :  { %6037 = vmatpush3.msra.mxu0 %v7184_v31  ;;  %6044 = vmatprep.mubr.msk.f32.mxu0 %vm7023_vm0, %v7022_v0 }
 0x5ac   :  { %6038 = vmatprep.subr.mxu0 %v7022_v0  ;;  %6054 = vmatpush3.msra.mxu1 %v483_v14 }
 0x5ad   :  { %6039 = vmatpush3.msra.mxu0 %v7190_v33  ;;  %6055 = vmatprep.mubr.msk.f32.mxu1 %vm7023_vm0, %v7022_v0 }
 0x5ae   :  { %6040 = vmatprep.subr.mxu0 %v7022_v0  ;;  %6069 = vmatprep.subr.mxu1 %v7022_v0 }
 0x5af   :  { %6041 = vmatpush3.msra.mxu0 %v7196_v35 }
 0x5b0   :  { %6042 = vmatprep.subr.mxu0 %v7022_v0 }
 0x5b1   :  { %6043 = vmatpush3.msra.mxu0 %v7204_v37 }
 0x5b2   :  { %6058 = vmatprep.subr.mxu0 %v7022_v0 }
 0x662   :  { %v7306_v19 = vpop.f32.mrf.mxu0  ;;  %v793_v20 = vpop.f32.mrf.mxu1 }
 0x664   :  { %v6002_v21 = vpop.f32.mrf.mxu0  ;;  %v6035_v22 = vpop.f32.mrf.mxu1 }
 0x66a   :  { %v698_v23 = vpop.f32.mrf.mxu0 }
 0x66b   :  { %v699_v24 = vadd.f32 %v698_v23, %v7251_v51 }
 0x66c   :  { %v6024_v25 = vpop.f32.mrf.mxu0 }
 0x66d   :  { %v702_v26 = vadd.f32 %v699_v24, %v7170_v13 }
 0x66f   :  { %6629 = vtanh.f32 %v702_v26  ;;  %v5579_v28 = vmul.f32 -1.442695, %v702_v26 }
 0x671   :  { %6631 = vpow2.f32 %v5579_v28 }
 0x67c   :  { %v6630_v27 = vpop.eup %6629 }
 0x67d   :  { %712 = vrot.lane.b32.xlu0 %v6630_v27, %s7024_s19 }
 0x67e   :  { %v6632_v38 = vpop.eup %6631 }
 0x67f   :  { %v706_v39 = vadd.f32 1.0, %v6632_v38 }
 0x681   :  { %6633 = vrcp.f32 %v706_v39 }
 0x68e   :  { %v6634_v40 = vpop.eup %6633 }
 0x68f   :  { %v710_v43 = vmul.f32 %v6634_v40, %v7179_v29 }
 0x6ef   :  { %v713_v41 = vpop.permute.xlu0 %712 }
 0x6f0   :  { %v715_v42 = vmul.f32 %v6634_v40, %v713_v41 }
 0x6f2   :  { %717 = vrot.lane.b32.xlu1 %v715_v42, %s7025_s22 }
 0x764   :  { %v718_v44 = vpop.permute.xlu1 %717 }
 0x765   :  { %v7313_v45 = vadd.f32 %v718_v44, %v710_v43 }
 0x767   :  { %6635 = vtanh.f32 %v7313_v45 }
 0x774   :  { %v6636_v46 = vpop.eup %6635 }
 0x775   :  { %723 = vrot.lane.b32.xlu0 %v6636_v46, %s7024_s19 }
 0x7e7   :  { %v724_v48 = vpop.permute.xlu0 %723 }
 0x7e8   :  { %v726_v49 = vmul.f32 %v6634_v40, %v724_v48 }
 0x7ea   :  { %798 = vrot.lane.b32.xlu1 %v726_v49, %s7025_s22 }
 0x85c   :  { %v799_v50 = vpop.permute.xlu1 %798 }
 0x85d   :  { %6045 = vmatmul.mubr.msk.f32.vlgmr.msra.gmra.mxu0 %vm119_vm1, %v799_v50 }
 0x85e   :  { %6059 = vmatpush3.msra.mxu0 %v7123_v1  ;;  %6066 = vmatprep.mubr.msk.f32.mxu0 %vm7023_vm0, %v7022_v0 }
 0x85f   :  { %6060 = vmatprep.subr.mxu0 %v7022_v0 }
 0x860   :  { %6061 = vmatpush3.msra.mxu0 %v7127_v3 }
 0x861   :  { %6062 = vmatprep.subr.mxu0 %v7022_v0 }
 0x862   :  { %6063 = vmatpush3.msra.mxu0 %v7135_v5 }
 0x863   :  { %6064 = vmatprep.subr.mxu0 %v7022_v0 }
 0x864   :  { %6065 = vmatpush3.msra.mxu0 %v7143_v7 }
 0x865   :  { %6067 = vmatmul.mubr.msk.f32.vlgmr.msra.gmra.mxu0 %vm119_vm1, %v799_v50  ;;  %6080 = vmatprep.subr.mxu0 %v7022_v0 }
 0x866   :  { %6081 = vmatpush3.msra.mxu0 %v7182_v30  ;;  %6088 = vmatprep.mubr.msk.f32.mxu0 %vm7023_vm0, %v7022_v0 }
 0x867   :  { %6082 = vmatprep.subr.mxu0 %v7022_v0 }
 0x868   :  { %6083 = vmatpush3.msra.mxu0 %v7186_v32 }
 0x869   :  { %6084 = vmatprep.subr.mxu0 %v7022_v0 }
 0x86a   :  { %6085 = vmatpush3.msra.mxu0 %v7194_v34 }
 0x86b   :  { %6086 = vmatprep.subr.mxu0 %v7022_v0 }
 0x86c   :  { %6087 = vmatpush3.msra.mxu0 %v7202_v36 }
 0x86d   :  { %6102 = vmatprep.subr.mxu0 %v7022_v0 }
 0x91d   :  { %v868_v29 = vpop.f32.mrf.mxu0 }
 0x91e   :  { %v869_v51 = vadd.f32 %v868_v29, %v793_v20 }
 0x91f   :  { %v6046_v52 = vpop.f32.mrf.mxu0 }
 0x920   :  { %v872_v53 = vadd.f32 %v869_v51, %v7248_v47 }
 0x922   :  { %6637 = vtanh.f32 %v872_v53  ;;  %v5582_v57 = vmul.f32 -1.442695, %v872_v53 }
 0x924   :  { %6639 = vpow2.f32 %v5582_v57 }
 0x925   :  { %v1038_v54 = vpop.f32.mrf.mxu0 }
 0x927   :  { %v6068_v55 = vpop.f32.mrf.mxu0 }
 0x92f   :  { %v6638_v56 = vpop.eup %6637 }
 0x930   :  { %882 = vrot.lane.b32.xlu0 %v6638_v56, %s7024_s19 }
 0x931   :  { %v6640_v58 = vpop.eup %6639 }
 0x932   :  { %v876_v59 = vadd.f32 1.0, %v6640_v58 }
 0x934   :  { %6641 = vrcp.f32 %v876_v59 }
 0x941   :  { %v6642_v60 = vpop.eup %6641 }
 0x942   :  { %v880_v9 = vmul.f32 %v6642_v60, %v7255_v63 }
 0x9a2   :  { %v883_v61 = vpop.permute.xlu0 %882 }
 0x9a3   :  { %v885_v62 = vmul.f32 %v6642_v60, %v883_v61 }
 0x9a5   :  { %887 = vrot.lane.b32.xlu1 %v885_v62, %s7025_s22 }
 0xa17   :  { %v888_v11 = vpop.permute.xlu1 %887 }
 0xa18   :  { %v7344_v12 = vadd.f32 %v888_v11, %v880_v9 }
 0xa1a   :  { %6643 = vtanh.f32 %v7344_v12 }
 0xa27   :  { %v6644_v14 = vpop.eup %6643 }
 0xa28   :  { %893 = vrot.lane.b32.xlu0 %v6644_v14, %s7024_s19 }
 0xa9a   :  { %v894_v15 = vpop.permute.xlu0 %893 }
 0xa9b   :  { %v896_v16 = vmul.f32 %v6642_v60, %v894_v15 }
 0xa9d   :  { %898 = vrot.lane.b32.xlu1 %v896_v16, %s7025_s22 }
 0xb0f   :  { %v899_v17 = vpop.permute.xlu1 %898 }
 0xb10   :  { %6056 = vmatmul.mubr.msk.f32.vlgmr.msra.gmra.mxu1 %vm119_vm1, %v899_v17  ;;  %6089 = vmatmul.mubr.msk.f32.vlgmr.msra.gmra.mxu0 %vm119_vm1, %v899_v17  ;;  %v1310_v17 = vld [vmem:[#allocation7 + $0x18] sm:$0xff] }
 0xb11   :  { %6070 = vmatpush3.msra.mxu1 %v7125_v2  ;;  %6077 = vmatprep.mubr.msk.f32.mxu1 %vm7023_vm0, %v7022_v0 }
 0xb12   :  { %6071 = vmatprep.subr.mxu1 %v7022_v0  ;;  %6110 = vmatprep.mubr.msk.f32.mxu0 %vm7023_vm0, %v7022_v0 }
 0xb13   :  { %6072 = vmatpush3.msra.mxu1 %v7131_v4  ;;  %6103 = vmatpush3.msra.mxu0 %v1310_v17 }
 0xb14   :  { %6073 = vmatprep.subr.mxu1 %v7022_v0  ;;  %6104 = vmatprep.subr.mxu0 %v7022_v0 }
 0xb15   :  { %6074 = vmatpush3.msra.mxu1 %v7137_v6 }
 0xb16   :  { %6075 = vmatprep.subr.mxu1 %v7022_v0 }
 0xb17   :  { %6076 = vmatpush3.msra.mxu1 %v7145_v8 }
 0xb18   :  { %6078 = vmatmul.mubr.msk.f32.vlgmr.msra.gmra.mxu1 %vm119_vm1, %v7155_v10  ;;  %6091 = vmatprep.subr.mxu1 %v7022_v0  ;;  %v99_v10 = vld [vmem:[%s8490_s9] sm:$0x1] }
 0xb19   :  { %6092 = vmatpush3.msra.mxu1 %v7184_v31  ;;  %6099 = vmatprep.mubr.msk.f32.mxu1 %vm7023_vm0, %v7022_v0  ;;  %v559_v23 = vadd.f32 %v7306_v19, %v99_v10 }
 0xb1a   :  { %6093 = vmatprep.subr.mxu1 %v7022_v0 }
 0xb1b   :  { %6094 = vmatpush3.msra.mxu1 %v7190_v33 }
 0xb1c   :  { %6095 = vmatprep.subr.mxu1 %v7022_v0 }
 0xb1d   :  { %6096 = vmatpush3.msra.mxu1 %v7196_v35 }
 0xb1e   :  { %6097 = vmatprep.subr.mxu1 %v7022_v0 }
 0xb1f   :  { %6098 = vmatpush3.msra.mxu1 %v7204_v37 }
 0xb20   :  { %6113 = vmatprep.subr.mxu1 %v7022_v0 }
 0xbd0   :  { %v968_v63 = vpop.f32.mrf.mxu1  ;;  %v1203_v18 = vpop.f32.mrf.mxu0 }
 0xbd1   :  { %v969_v20 = vadd.f32 %v968_v63, %v99_v10  ;;  %v1309_v10 = vld [vmem:[#allocation7 + $0x10] sm:$0xff]  ;;  %v1308_v63 = vld [vmem:[#allocation7 + $0x8] sm:$0xff] }
 0xbd2   :  { %v6057_v21 = vpop.f32.mrf.mxu1  ;;  %v6090_v22 = vpop.f32.mrf.mxu0  ;;  %6105 = vmatpush3.msra.mxu0 %v1309_v10 }
 0xbd3   :  { %v1387_v24 = vrot.slane %v969_v20, 7  ;;  %6106 = vmatprep.subr.mxu0 %v7022_v0 }
 0xbd4   :  { %6107 = vmatpush3.msra.mxu0 %v1308_v63 }
 0xbd5   :  { %v7380_v25 = vsel %vm1389_vm2, %v559_v23, %v1387_v24  ;;  %6108 = vmatprep.subr.mxu0 %v7022_v0 }
 0xbd8   :  { %v1108_v26 = vpop.f32.mrf.mxu1 }
 0xbd9   :  { %v1109_v27 = vadd.f32 %v1108_v26, %v1038_v54 }
 0xbda   :  { %v6079_v28 = vpop.f32.mrf.mxu1 }
 0xbdb   :  { %v1112_v38 = vadd.f32 %v1109_v27, %v7170_v13 }
 0xbdd   :  { %6645 = vtanh.f32 %v1112_v38  ;;  %v5586_v40 = vmul.f32 -1.442695, %v1112_v38 }
 0xbdf   :  { %6647 = vpow2.f32 %v5586_v40 }
 0xbea   :  { %v6646_v39 = vpop.eup %6645 }
 0xbeb   :  { %1122 = vrot.lane.b32.xlu0 %v6646_v39, %s7024_s19 }
 0xbec   :  { %v6648_v41 = vpop.eup %6647 }
 0xbed   :  { %v1116_v42 = vadd.f32 1.0, %v6648_v41 }
 0xbef   :  { %6649 = vrcp.f32 %v1116_v42 }
 0xbfc   :  { %v6650_v43 = vpop.eup %6649 }
 0xbfd   :  { %v1120_v46 = vmul.f32 %v6650_v43, %v7313_v45 }
 0xc5d   :  { %v1123_v19 = vpop.permute.xlu0 %1122 }
 0xc5e   :  { %v1125_v44 = vmul.f32 %v6650_v43, %v1123_v19 }
 0xc60   :  { %1127 = vrot.lane.b32.xlu1 %v1125_v44, %s7025_s22 }
 0xcd2   :  { %v1128_v48 = vpop.permute.xlu1 %1127 }
 0xcd3   :  { %v7386_v49 = vadd.f32 %v1128_v48, %v1120_v46 }
 0xcd5   :  { %6651 = vtanh.f32 %v7386_v49 }
 0xce2   :  { %v6652_v50 = vpop.eup %6651 }
 0xce3   :  { %1133 = vrot.lane.b32.xlu0 %v6652_v50, %s7024_s19 }
 0xd55   :  { %v1134_v29 = vpop.permute.xlu0 %1133 }
 0xd56   :  { %v1136_v51 = vmul.f32 %v6650_v43, %v1134_v29 }
 0xd58   :  { %1208 = vrot.lane.b32.xlu1 %v1136_v51, %s7025_s22 }
 0xdca   :  { %v1209_v52 = vpop.permute.xlu1 %1208 }
 0xdcb   :  { %6100 = vmatmul.mubr.msk.f32.vlgmr.msra.gmra.mxu1 %vm119_vm1, %v1209_v52 }
 0xdcc   :  { %6114 = vmatpush3.msra.mxu1 %v7123_v1  ;;  %6121 = vmatprep.mubr.msk.f32.mxu1 %vm7023_vm0, %v7022_v0 }
 0xdcd   :  { %6115 = vmatprep.subr.mxu1 %v7022_v0 }
 0xdce   :  { %6116 = vmatpush3.msra.mxu1 %v7127_v3 }
 0xdcf   :  { %6117 = vmatprep.subr.mxu1 %v7022_v0 }
 0xdd0   :  { %6118 = vmatpush3.msra.mxu1 %v7135_v5 }
 0xdd1   :  { %6119 = vmatprep.subr.mxu1 %v7022_v0 }
 0xdd2   :  { %6120 = vmatpush3.msra.mxu1 %v7143_v7 }
 0xdd3   :  { %6122 = vmatmul.mubr.msk.f32.vlgmr.msra.gmra.mxu1 %vm119_vm1, %v1209_v52  ;;  %6135 = vmatprep.subr.mxu1 %v7022_v0 }
 0xdd4   :  { %6136 = vmatpush3.msra.mxu1 %v7182_v30  ;;  %6143 = vmatprep.mubr.msk.f32.mxu1 %vm7023_vm0, %v7022_v0 }
 0xdd5   :  { %6137 = vmatprep.subr.mxu1 %v7022_v0 }
 0xdd6   :  { %6138 = vmatpush3.msra.mxu1 %v7186_v32 }
 0xdd7   :  { %6139 = vmatprep.subr.mxu1 %v7022_v0 }
 0xdd8   :  { %6140 = vmatpush3.msra.mxu1 %v7194_v34 }
 0xdd9   :  { %6141 = vmatprep.subr.mxu1 %v7022_v0 }
 0xdda   :  { %6142 = vmatpush3.msra.mxu1 %v7202_v36 }
 0xddb   :  { %6157 = vmatprep.subr.mxu1 %v7022_v0 }
 0xe8b   :  { %v1278_v45 = vpop.f32.mrf.mxu1 }
 0xe8c   :  { %v1279_v53 = vadd.f32 %v1278_v45, %v1203_v18  ;;  %v1307_v18 = vld [vmem:[#allocation7] sm:$0xff] }
 0xe8d   :  { %v6101_v54 = vpop.f32.mrf.mxu1  ;;  %6109 = vmatpush3.msra.mxu0 %v1307_v18 }
 0xe8e   :  { %v1282_v55 = vadd.f32 %v1279_v53, %v7248_v47  ;;  %6124 = vmatprep.subr.mxu0 %v7022_v0 }
 0xe90   :  { %6653 = vtanh.f32 %v1282_v55  ;;  %v5589_v59 = vmul.f32 -1.442695, %v1282_v55 }
 0xe92   :  { %6655 = vpow2.f32 %v5589_v59 }
 0xe93   :  { %v7414_v56 = vpop.f32.mrf.mxu1 }
 0xe95   :  { %v6123_v57 = vpop.f32.mrf.mxu1 }
 0xe9d   :  { %v6654_v58 = vpop.eup %6653 }
 0xe9e   :  { %1292 = vrot.lane.b32.xlu0 %v6654_v58, %s7024_s19 }
 0xe9f   :  { %v6656_v60 = vpop.eup %6655 }
 0xea0   :  { %v1286_v61 = vadd.f32 1.0, %v6656_v60 }
 0xea2   :  { %6657 = vrcp.f32 %v1286_v61 }
 0xeaf   :  { %v6658_v62 = vpop.eup %6657 }
 0xeb0   :  { %v1290_v14 = vmul.f32 %v6658_v62, %v7344_v12 }
 0xf10   :  { %v1293_v9 = vpop.permute.xlu0 %1292 }
 0xf11   :  { %v1295_v11 = vmul.f32 %v6658_v62, %v1293_v9 }
 0xf13   :  { %1297 = vrot.lane.b32.xlu1 %v1295_v11, %s7025_s22 }
 0xf85   :  { %v1298_v15 = vpop.permute.xlu1 %1297 }
 0xf86   :  { %v7419_v16 = vadd.f32 %v1298_v15, %v1290_v14 }
 0xf88   :  { %6659 = vtanh.f32 %v7419_v16 }
 0xf95   :  { %v6660_v12 = vpop.eup %6659 }
 0xf96   :  { %1303 = vrot.lane.b32.xlu0 %v6660_v12, %s7024_s19 }
0x1008   :  { %v1304_v20 = vpop.permute.xlu0 %1303 }
0x1009   :  { %v1306_v21 = vmul.f32 %v6658_v62, %v1304_v20 }
0x100b   :  { %1312 = vrot.lane.b32.xlu1 %v1306_v21, %s7025_s22 }
0x107d   :  { %v1313_v22 = vpop.permute.xlu1 %1312 }
0x107e   :  { %6111 = vmatmul.mubr.msk.f32.vlgmr.msra.gmra.mxu0 %vm119_vm1, %v1313_v22  ;;  %6144 = vmatmul.mubr.msk.f32.vlgmr.msra.gmra.mxu1 %vm119_vm1, %v1313_v22 }
0x107f   :  { %6125 = vmatpush3.msra.mxu0 %v7125_v2  ;;  %6132 = vmatprep.mubr.msk.f32.mxu0 %vm7023_vm0, %v7022_v0 }
0x1080   :  { %6126 = vmatprep.subr.mxu0 %v7022_v0  ;;  %6158 = vmatpush3.msra.mxu1 %v1310_v17 }
0x1081   :  { %6127 = vmatpush3.msra.mxu0 %v7131_v4  ;;  %6159 = vmatprep.subr.mxu1 %v7022_v0 }
0x1082   :  { %6128 = vmatprep.subr.mxu0 %v7022_v0  ;;  %6160 = vmatpush3.msra.mxu1 %v1309_v10 }
0x1083   :  { %6129 = vmatpush3.msra.mxu0 %v7137_v6  ;;  %6161 = vmatprep.subr.mxu1 %v7022_v0 }
0x1084   :  { %6130 = vmatprep.subr.mxu0 %v7022_v0  ;;  %6162 = vmatpush3.msra.mxu1 %v1308_v63 }
0x1085   :  { %6131 = vmatpush3.msra.mxu0 %v7145_v8  ;;  %6163 = vmatprep.subr.mxu1 %v7022_v0 }
0x1086   :  { %6133 = vmatmul.mubr.f32.vlgmr.msra.gmra.mxu0 %v7022_v0  ;;  %6146 = vmatprep.subr.mxu0 %v7022_v0 }
0x1087   :  { %6147 = vmatpush3.msra.mxu0 %v7184_v31  ;;  %6154 = vmatprep.mubr.msk.f32.mxu0 %vm7023_vm0, %v7022_v0 }
0x1088   :  { %6148 = vmatprep.subr.mxu0 %v7022_v0  ;;  %6164 = vmatpush3.msra.mxu1 %v1307_v18 }
0x1089   :  { %6149 = vmatpush3.msra.mxu0 %v7190_v33  ;;  %6165 = vmatprep.mubr.msk.f32.mxu1 %vm7023_vm0, %v7022_v0 }
0x108a   :  { %6150 = vmatprep.subr.mxu0 %v7022_v0  ;;  %6179 = vmatprep.subr.mxu1 %v7022_v0 }
0x108b   :  { %6151 = vmatpush3.msra.mxu0 %v7196_v35 }
0x108c   :  { %6152 = vmatprep.subr.mxu0 %v7022_v0 }
0x108d   :  { %6153 = vmatpush3.msra.mxu0 %v7204_v37 }
0x108e   :  { %6168 = vmatprep.subr.mxu0 %v7022_v0 }
0x113e   :  { %v7457_v23 = vpop.f32.mrf.mxu0  ;;  %v1691_v24 = vpop.f32.mrf.mxu1 }
0x1140   :  { %v6112_v26 = vpop.f32.mrf.mxu0  ;;  %v6145_v27 = vpop.f32.mrf.mxu1 }
0x1146   :  { %v1596_v28 = vpop.f32.mrf.mxu0 }
0x1147   :  { %v1597_v38 = vadd.f32 %v1596_v28, %v7414_v56 }
0x1148   :  { %v6134_v39 = vpop.f32.mrf.mxu0 }
0x1149   :  { %v1600_v40 = vadd.f32 %v1597_v38, %v7170_v13 }
0x114b   :  { %6661 = vtanh.f32 %v1600_v40  ;;  %v5594_v42 = vmul.f32 -1.442695, %v1600_v40 }
0x114d   :  { %6663 = vpow2.f32 %v5594_v42  ;;  %v7543_v42 = vld [vmem:[#allocation2 + $0x30] sm:$0xff] }
0x1158   :  { %v6662_v41 = vpop.eup %6661 }
0x1159   :  { %1610 = vrot.lane.b32.xlu0 %v6662_v41, %s7024_s19  ;;  %v7537_v41 = vld [vmem:[#allocation2 + $0x38] sm:$0xff] }
0x115a   :  { %v6664_v43 = vpop.eup %6663 }
0x115b   :  { %v1604_v19 = vadd.f32 1.0, %v6664_v43  ;;  %v7547_v43 = vld [vmem:[#allocation2 + $0x28] sm:$0xff] }
0x115d   :  { %6665 = vrcp.f32 %v1604_v19  ;;  %v7551_v19 = vld [vmem:[#allocation2 + $0x20] sm:$0xff] }
0x116a   :  { %v6666_v44 = vpop.eup %6665 }
0x116b   :  { %v1608_v50 = vmul.f32 %v6666_v44, %v7386_v49 }
0x11cb   :  { %v1611_v46 = vpop.permute.xlu0 %1610 }
0x11cc   :  { %v1613_v48 = vmul.f32 %v6666_v44, %v1611_v46 }
0x11ce   :  { %1615 = vrot.lane.b32.xlu1 %v1613_v48, %s7025_s22 }
0x1240   :  { %v1616_v29 = vpop.permute.xlu1 %1615 }
0x1241   :  { %v7464_v51 = vadd.f32 %v1616_v29, %v1608_v50 }
0x1243   :  { %6667 = vtanh.f32 %v7464_v51 }
0x1250   :  { %v6668_v52 = vpop.eup %6667 }
0x1251   :  { %1621 = vrot.lane.b32.xlu0 %v6668_v52, %s7024_s19 }
0x12c3   :  { %v1622_v45 = vpop.permute.xlu0 %1621 }
0x12c4   :  { %v1624_v53 = vmul.f32 %v6666_v44, %v1622_v45 }
0x12c6   :  { %1696 = vrot.lane.b32.xlu1 %v1624_v53, %s7025_s22 }
0x1338   :  { %v1697_v54 = vpop.permute.xlu1 %1696 }
0x1339   :  { %6155 = vmatmul.mubr.msk.f32.vlgmr.msra.gmra.mxu0 %vm119_vm1, %v1697_v54 }
0x133a   :  { %6169 = vmatpush3.msra.mxu0 %v7123_v1  ;;  %6176 = vmatprep.mubr.msk.f32.mxu0 %vm7023_vm0, %v7022_v0 }
0x133b   :  { %6170 = vmatprep.subr.mxu0 %v7022_v0 }
0x133c   :  { %6171 = vmatpush3.msra.mxu0 %v7127_v3 }
0x133d   :  { %6172 = vmatprep.subr.mxu0 %v7022_v0 }
0x133e   :  { %6173 = vmatpush3.msra.mxu0 %v7135_v5 }
0x133f   :  { %6174 = vmatprep.subr.mxu0 %v7022_v0 }
0x1340   :  { %6175 = vmatpush3.msra.mxu0 %v7143_v7 }
0x1341   :  { %6177 = vmatmul.mubr.msk.f32.vlgmr.msra.gmra.mxu0 %vm119_vm1, %v1697_v54  ;;  %6190 = vmatprep.subr.mxu0 %v7022_v0 }
0x1342   :  { %6191 = vmatpush3.msra.mxu0 %v7182_v30  ;;  %6198 = vmatprep.mubr.msk.f32.mxu0 %vm7023_vm0, %v7022_v0 }
0x1343   :  { %6192 = vmatprep.subr.mxu0 %v7022_v0 }
0x1344   :  { %6193 = vmatpush3.msra.mxu0 %v7186_v32 }
0x1345   :  { %6194 = vmatprep.subr.mxu0 %v7022_v0 }
0x1346   :  { %6195 = vmatpush3.msra.mxu0 %v7194_v34 }
0x1347   :  { %6196 = vmatprep.subr.mxu0 %v7022_v0 }
0x1348   :  { %6197 = vmatpush3.msra.mxu0 %v7202_v36 }
0x1349   :  { %6212 = vmatprep.subr.mxu0 %v7022_v0 }
0x13f9   :  { %v1766_v1 = vpop.f32.mrf.mxu0 }
0x13fa   :  { %v1767_v3 = vadd.f32 %v1766_v1, %v1691_v24 }
0x13fb   :  { %v6156_v5 = vpop.f32.mrf.mxu0 }
0x13fc   :  { %v1770_v7 = vadd.f32 %v1767_v3, %v7248_v47  ;;  %v2260_v3 = vld [vmem:[#allocation8 + $0x18] sm:$0xff]  ;;  %v2259_v5 = vld [vmem:[#allocation8 + $0x10] sm:$0xff] }
0x13fe   :  { %6669 = vtanh.f32 %v1770_v7  ;;  %v5597_v57 = vmul.f32 -1.442695, %v1770_v7  ;;  %v2258_v7 = vld [vmem:[#allocation8 + $0x8] sm:$0xff] }
0x1400   :  { %6671 = vpow2.f32 %v5597_v57 }
0x1401   :  { %v1988_v49 = vpop.f32.mrf.mxu0 }
0x1403   :  { %v6178_v55 = vpop.f32.mrf.mxu0 }
0x140b   :  { %v6670_v56 = vpop.eup %6669 }
0x140c   :  { %1780 = vrot.lane.b32.xlu0 %v6670_v56, %s7024_s19 }
0x140d   :  { %v6672_v58 = vpop.eup %6671 }
0x140e   :  { %v1774_v59 = vadd.f32 1.0, %v6672_v58 }
0x1410   :  { %6673 = vrcp.f32 %v1774_v59  ;;  %v7583_v59 = vld [vmem:[#allocation2 + $0x18] sm:$0xff] }
0x141d   :  { %v6674_v60 = vpop.eup %6673 }
0x141e   :  { %v1778_v9 = vmul.f32 %v6674_v60, %v7419_v16 }
0x147e   :  { %v1781_v61 = vpop.permute.xlu0 %1780 }
0x147f   :  { %v1783_v62 = vmul.f32 %v6674_v60, %v1781_v61  ;;  %v7594_v61 = vld [vmem:[#allocation2 + $0x8] sm:$0xff] }
0x1481   :  { %1785 = vrot.lane.b32.xlu1 %v1783_v62, %s7025_s22  ;;  %v7599_v62 = vld [vmem:[#allocation2] sm:$0xff] }
0x14f3   :  { %v1786_v11 = vpop.permute.xlu1 %1785 }
0x14f4   :  { %v7495_v14 = vadd.f32 %v1786_v11, %v1778_v9  ;;  %v7610_v9 = vld [vmem:[%s8490_s9 + $0x4] sm:$0x1]  ;;  %v7615_v11 = vld [vmem:[%s8490_s9 + $0x5] sm:$0x1] }
0x14f6   :  { %6675 = vtanh.f32 %v7495_v14 }
0x1503   :  { %v6676_v15 = vpop.eup %6675 }
0x1504   :  { %1791 = vrot.lane.b32.xlu0 %v6676_v15, %s7024_s19 }
0x1576   :  { %v1792_v17 = vpop.permute.xlu0 %1791 }
0x1577   :  { %v1794_v10 = vmul.f32 %v6674_v60, %v1792_v17  ;;  %v7589_v60 = vld [vmem:[#allocation2 + $0x10] sm:$0xff] }
0x1579   :  { %1796 = vrot.lane.b32.xlu1 %v1794_v10, %s7025_s22 }
0x15eb   :  { %v1797_v63 = vpop.permute.xlu1 %1796 }
0x15ec   :  { %6166 = vmatmul.mubr.msk.f32.vlgmr.msra.gmra.mxu1 %vm119_vm1, %v1797_v63  ;;  %6199 = vmatmul.mubr.msk.f32.vlgmr.msra.gmra.mxu0 %vm119_vm1, %v1797_v63 }
0x15ed   :  { %6180 = vmatpush3.msra.mxu1 %v7125_v2  ;;  %6187 = vmatprep.mubr.msk.f32.mxu1 %vm7023_vm0, %v7022_v0 }
0x15ee   :  { %6181 = vmatprep.subr.mxu1 %v7022_v0  ;;  %6220 = vmatprep.mubr.msk.f32.mxu0 %vm7023_vm0, %v7022_v0 }
0x15ef   :  { %6182 = vmatpush3.msra.mxu1 %v7131_v4  ;;  %6213 = vmatpush3.msra.mxu0 %v2260_v3 }
0x15f0   :  { %6183 = vmatprep.subr.mxu1 %v7022_v0  ;;  %6214 = vmatprep.subr.mxu0 %v7022_v0 }
0x15f1   :  { %6184 = vmatpush3.msra.mxu1 %v7137_v6  ;;  %6215 = vmatpush3.msra.mxu0 %v2259_v5 }
0x15f2   :  { %6185 = vmatprep.subr.mxu1 %v7022_v0  ;;  %6216 = vmatprep.subr.mxu0 %v7022_v0 }
0x15f3   :  { %6186 = vmatpush3.msra.mxu1 %v7145_v8  ;;  %6217 = vmatpush3.msra.mxu0 %v2258_v7 }
0x15f4   :  { %6188 = vmatmul.mubr.f32.vlgmr.msra.gmra.mxu1 %v7022_v0  ;;  %6201 = vmatprep.subr.mxu1 %v7022_v0 }
0x15f5   :  { %6202 = vmatpush3.msra.mxu1 %v7184_v31  ;;  %6209 = vmatprep.mubr.msk.f32.mxu1 %vm7023_vm0, %v7022_v0 }
0x15f6   :  { %6203 = vmatprep.subr.mxu1 %v7022_v0  ;;  %6218 = vmatprep.subr.mxu0 %v7022_v0 }
0x15f7   :  { %6204 = vmatpush3.msra.mxu1 %v7190_v33 }
0x15f8   :  { %6205 = vmatprep.subr.mxu1 %v7022_v0 }
0x15f9   :  { %6206 = vmatpush3.msra.mxu1 %v7196_v35 }
0x15fa   :  { %6207 = vmatprep.subr.mxu1 %v7022_v0 }
0x15fb   :  { %6208 = vmatpush3.msra.mxu1 %v7204_v37 }
0x15fc   :  { %6223 = vmatprep.subr.mxu1 %v7022_v0 }
0x16ac   :  { %v7525_v2 = vpop.f32.mrf.mxu1  ;;  %v2153_v4 = vpop.f32.mrf.mxu0 }
0x16ae   :  { %v6167_v6 = vpop.f32.mrf.mxu1  ;;  %v6200_v8 = vpop.f32.mrf.mxu0 }
0x16af   :  { %v97_v8 = vlaneseq }
0x16b4   :  { %v2058_v31 = vpop.f32.mrf.mxu1 }
0x16b5   :  { %v2059_v16 = vadd.f32 %v2058_v31, %v1988_v49  ;;  %v2257_v49 = vld [vmem:[#allocation8] sm:$0xff]  ;;  %v7621_v31 = vand.u32 127, %v97_v8 }
0x16b6   :  { %v6189_v18 = vpop.f32.mrf.mxu1  ;;  %6219 = vmatpush3.msra.mxu0 %v2257_v49 }
0x16b7   :  { %v2062_v33 = vadd.f32 %v2059_v16, %v7170_v13  ;;  %6234 = vmatprep.subr.mxu0 %v7022_v0  ;;  %v7626_v18 = vld [vmem:[%s8490_s9 + $0x6] sm:$0x1]  ;;  %vm2341_vm3 = vcmp.lt.s32.totalorder %v7621_v31, 5  ;;  %vm1415_vm13 = vcmp.eq.s32.totalorder %v7621_v31, 0  ;;  %vm1422_vm14 = vcmp.eq.s32.totalorder %v7621_v31, 1 }
0x16b8   :  { %vm3695_vm15 = vcmp.eq.s32.totalorder %v7621_v31, 2 }
0x16b9   :  { %6677 = vtanh.f32 %v2062_v33  ;;  %v5600_v35 = vmul.f32 -1.442695, %v2062_v33 }
0x16bb   :  { %6679 = vpow2.f32 %v5600_v35  ;;  %v2343_v35 = vld [vmem:[%s8491_s10 + $0x2] sm:$0x1] }
0x16c6   :  { %v6678_v12 = vpop.eup %6677 }
0x16c7   :  { %2072 = vrot.lane.b32.xlu0 %v6678_v12, %s7024_s19 }
0x16c8   :  { %v6680_v20 = vpop.eup %6679 }
0x16c9   :  { %v2066_v37 = vadd.f32 1.0, %v6680_v20 }
0x16cb   :  { %6681 = vrcp.f32 %v2066_v37 }
0x16d8   :  { %v6682_v21 = vpop.eup %6681 }
0x16d9   :  { %v2070_v26 = vmul.f32 %v6682_v21, %v7464_v51 }
0x1739   :  { %v2073_v22 = vpop.permute.xlu0 %2072 }
0x173a   :  { %v2075_v24 = vmul.f32 %v6682_v21, %v2073_v22  ;;  %v7639_v22 = vsub.s32 127, %v7621_v31 }
0x173c   :  { %2077 = vrot.lane.b32.xlu1 %v2075_v24, %s7025_s22 }
0x17ae   :  { %v2078_v27 = vpop.permute.xlu1 %2077 }
0x17af   :  { %v7531_v28 = vadd.f32 %v2078_v27, %v2070_v26 }
0x17b1   :  { %6683 = vtanh.f32 %v7531_v28 }
0x17be   :  { %v6684_v13 = vpop.eup %6683 }
0x17bf   :  { %2083 = vrot.lane.b32.xlu0 %v6684_v13, %s7024_s19 }
0x1831   :  { %v2084_v38 = vpop.permute.xlu0 %2083 }
0x1832   :  { %v2086_v39 = vmul.f32 %v6682_v21, %v2084_v38 }
0x1834   :  { %2158 = vrot.lane.b32.xlu1 %v2086_v39, %s7025_s22 }
0x18a6   :  { %v2159_v40 = vpop.permute.xlu1 %2158 }
0x18a7   :  { %6210 = vmatmul.mubr.msk.f32.vlgmr.msra.gmra.mxu1 %vm119_vm1, %v2159_v40 }
0x18a8   :  { %6224 = vmatpush3.msra.mxu1 %v7537_v41  ;;  %6231 = vmatprep.mubr.msk.f32.mxu1 %vm7023_vm0, %v7022_v0 }
0x18a9   :  { %6225 = vmatprep.subr.mxu1 %v7022_v0 }
0x18aa   :  { %6226 = vmatpush3.msra.mxu1 %v7543_v42 }
0x18ab   :  { %6227 = vmatprep.subr.mxu1 %v7022_v0 }
0x18ac   :  { %6228 = vmatpush3.msra.mxu1 %v7547_v43 }
0x18ad   :  { %6229 = vmatprep.subr.mxu1 %v7022_v0 }
0x18ae   :  { %6230 = vmatpush3.msra.mxu1 %v7551_v19 }
0x18af   :  { %6232 = vmatmul.mubr.msk.f32.vlgmr.msra.gmra.mxu1 %vm119_vm1, %v2159_v40  ;;  %6245 = vmatprep.subr.mxu1 %v7022_v0 }
0x18b0   :  { %6246 = vmatpush3.msra.mxu1 %v7182_v30  ;;  %6253 = vmatprep.mubr.msk.f32.mxu1 %vm7023_vm0, %v7022_v0 }
0x18b1   :  { %6247 = vmatprep.subr.mxu1 %v7022_v0 }
0x18b2   :  { %6248 = vmatpush3.msra.mxu1 %v7186_v32 }
0x18b3   :  { %6249 = vmatprep.subr.mxu1 %v7022_v0 }
0x18b4   :  { %6250 = vmatpush3.msra.mxu1 %v7194_v34 }
0x18b5   :  { %6251 = vmatprep.subr.mxu1 %v7022_v0 }
0x18b6   :  { %6252 = vmatpush3.msra.mxu1 %v7202_v36 }
0x18b7   :  { %6267 = vmatprep.subr.mxu1 %v7022_v0 }
0x1967   :  { %v2228_v44 = vpop.f32.mrf.mxu1 }
0x1968   :  { %v2229_v46 = vadd.f32 %v2228_v44, %v2153_v4 }
0x1969   :  { %v6211_v30 = vpop.f32.mrf.mxu1 }
0x196a   :  { %v2232_v48 = vadd.f32 %v2229_v46, %v7248_v47 }
0x196c   :  { %6685 = vtanh.f32 %v2232_v48  ;;  %v5603_v51 = vmul.f32 -1.442695, %v2232_v48 }
0x196e   :  { %6687 = vpow2.f32 %v5603_v51 }
0x196f   :  { %v7567_v50 = vpop.f32.mrf.mxu1 }
0x1971   :  { %v6233_v29 = vpop.f32.mrf.mxu1 }
0x1979   :  { %v6686_v32 = vpop.eup %6685 }
0x197a   :  { %2242 = vrot.lane.b32.xlu0 %v6686_v32, %s7024_s19 }
0x197b   :  { %v6688_v34 = vpop.eup %6687 }
0x197c   :  { %v2236_v52 = vadd.f32 1.0, %v6688_v34  ;;  %v7643_v34 = vshrl.u32 %v97_v8, 7 }
0x197e   :  { %6689 = vrcp.f32 %v2236_v52 }
0x198b   :  { %v6690_v36 = vpop.eup %6689 }
0x198c   :  { %v2240_v54 = vmul.f32 %v6690_v36, %v7495_v14 }
0x19ec   :  { %v2243_v45 = vpop.permute.xlu0 %2242 }
0x19ed   :  { %v2245_v53 = vmul.f32 %v6690_v36, %v2243_v45  ;;  %v7646_v45 = vsub.s32 0, %v7643_v34 }
0x19ef   :  { %2247 = vrot.lane.b32.xlu1 %v2245_v53, %s7025_s22 }
0x1a61   :  { %v2248_v47 = vpop.permute.xlu1 %2247 }
0x1a62   :  { %v7572_v1 = vadd.f32 %v2248_v47, %v2240_v54  ;;  %v7653_v54 = vld [vmem:[%s8486_s5] sm:$0x1f] }
0x1a64   :  { %6691 = vtanh.f32 %v7572_v1 }
0x1a71   :  { %v6692_v55 = vpop.eup %6691 }
0x1a72   :  { %2253 = vrot.lane.b32.xlu0 %v6692_v55, %s7024_s19 }
0x1ae4   :  { %v2254_v56 = vpop.permute.xlu0 %2253 }
0x1ae5   :  { %v2256_v57 = vmul.f32 %v6690_v36, %v2254_v56 }
0x1ae7   :  { %2262 = vrot.lane.b32.xlu1 %v2256_v57, %s7025_s22 }
0x1b59   :  { %v2263_v58 = vpop.permute.xlu1 %2262 }
0x1b5a   :  { %6221 = vmatmul.mubr.msk.f32.vlgmr.msra.gmra.mxu0 %vm119_vm1, %v2263_v58  ;;  %6254 = vmatmul.mubr.msk.f32.vlgmr.msra.gmra.mxu1 %vm119_vm1, %v2263_v58 }
0x1b5b   :  { %6235 = vmatpush3.msra.mxu0 %v7583_v59  ;;  %6242 = vmatprep.mubr.msk.f32.mxu0 %vm7023_vm0, %v7022_v0 }
0x1b5c   :  { %6236 = vmatprep.subr.mxu0 %v7022_v0  ;;  %6268 = vmatpush3.msra.mxu1 %v2260_v3 }
0x1b5d   :  { %6237 = vmatpush3.msra.mxu0 %v7589_v60  ;;  %6269 = vmatprep.subr.mxu1 %v7022_v0 }
0x1b5e   :  { %6238 = vmatprep.subr.mxu0 %v7022_v0  ;;  %6270 = vmatpush3.msra.mxu1 %v2259_v5 }
0x1b5f   :  { %6239 = vmatpush3.msra.mxu0 %v7594_v61  ;;  %6271 = vmatprep.subr.mxu1 %v7022_v0 }
0x1b60   :  { %6240 = vmatprep.subr.mxu0 %v7022_v0  ;;  %6272 = vmatpush3.msra.mxu1 %v2258_v7 }
0x1b61   :  { %6241 = vmatpush3.msra.mxu0 %v7599_v62  ;;  %6273 = vmatprep.subr.mxu1 %v7022_v0 }
0x1b62   :  { %6256 = vmatprep.subr.mxu0 %v7022_v0  ;;  %6274 = vmatpush3.msra.mxu1 %v2257_v49 }
0x1b63   :  { %6275 = vmatprep.mubr.msk.f32.mxu1 %vm7023_vm0, %v7022_v0  ;;  %6289 = vmatprep.subr.mxu1 %v7022_v0 }
0x1c1a   :  { %v2332_v14 = vpop.f32.mrf.mxu0  ;;  %v7617_v15 = vpop.f32.mrf.mxu1 }
0x1c1b   :  { %v2333_v17 = vadd.f32 %v2332_v14, %v7610_v9  ;;  %v7661_v14 = vld [vmem:[#allocation2 + $0x58] sm:$0xff] }
0x1c1c   :  { %v6222_v10 = vpop.f32.mrf.mxu0  ;;  %v6255_v63 = vpop.f32.mrf.mxu1 }
0x1c1d   :  { %v2336_v4 = vadd.f32 %v2333_v17, %v7615_v11  ;;  %v7667_v17 = vld [vmem:[#allocation2 + $0x50] sm:$0xff]  ;;  %v7671_v10 = vld [vmem:[#allocation2 + $0x48] sm:$0xff]  ;;  %v7675_v63 = vld [vmem:[#allocation2 + $0x40] sm:$0xff] }
0x1c1f   :  { %v2337_v6 = vmul.f32 0.2, %v2336_v4 }
0x1c21   :  { %6693 = vtanh.f32 %v2337_v6 }
0x1c2e   :  { %v6694_v16 = vpop.eup %6693 }
0x1c2f   :  { %v2339_v33 = vmul.f32 0.44, %v6694_v16  ;;  %v7680_v16 = vld [vmem:[#allocation5] sm:$0x1] }
0x1c31   :  { %v7630_v12 = vadd.f32 %v2339_v33, %v7626_v18 }
0x1c33   :  { %v2342_v20 = vsel %vm2341_vm3, %v7630_v12, -1e+30 }
0x1c34   :  { %v2344_v37 = vadd.f32 %v2343_v35, %v2342_v20 }
0x1c36   :  { %vm2346_vm4 = vcmp.lt.s32.totalorder %v2344_v37, 0  ;;  %v2347_v21 = vxor.u32 2147483647, %v2344_v37 }
0x1c38   :  { %v2348_v24 = vsel %vm2346_vm4, %v2347_v21, %v2344_v37 }
0x1c39   :  { %v2349_v26 = vand.u32 4294967168, %v2348_v24 }
0x1c3b   :  { %v2350_v27 = vor.u32 %v2349_v26, %v7639_v22 }
0x1c3d   :  { %v2351_v13 = vsel %vm1389_vm2, %v2350_v27, 2147483648 }
0x1c3e   :  { %v2353_v38 = vshra.s32 %v2351_v13, 16  ;;  %v2352_v40 = vand.u32 65535, %v2351_v13 }
0x1c40   :  { %v2355_v39 = vcvt.s32.f32 %v2353_v38  ;;  %v2354_v46 = vcvt.s32.f32 %v2352_v40 }
0x1c42   :  { %2356 = vmax.xlane.f32.xlu0 %v2355_v39 }
0x1ccb   :  { %v2357_v44 = vpop.xlane.xlu0 %2356 }
0x1ccc   :  { %vm2358_vm5 = vcmp.eq.f32.partialorder %v2355_v39, %v2357_v44  ;;  %v2363_v48 = vcvt.f32.s32 %v2357_v44 }
0x1ccd   :  { %v2359_v30 = vsel %vm2358_vm5, %v2354_v46, -inf  ;;  %vm3711_vm5 = vcmask 1042434  }
0x1cce   :  { %2360 = vmax.xlane.f32.xlu1 %v2359_v30  ;;  %v2364_v32 = vshll.u32 %v2363_v48, 16  ;;  %v7709_v30 = vld [vmem:[#allocation2 + $0x70] sm:$0xff]  ;;  %v7713_v48 = vld [vmem:[#allocation2 + $0x68] sm:$0xff] }
0x1d57   :  { %v2361_v29 = vpop.xlane.xlu1 %2360 }
0x1d58   :  { %v2362_v51 = vcvt.f32.s32 %v2361_v29  ;;  %v7717_v29 = vld [vmem:[#allocation2 + $0x60] sm:$0xff] }
0x1d5a   :  { %v2365_v52 = vadd.s32 %v2364_v32, %v2362_v51 }
0x1d5c   :  { %v2366_v36 = vand.u32 127, %v2365_v52 }
0x1d5e   :  { %v7648_v53 = vsub.s32 127, %v2366_v36  ;;  %v7722_v36 = vld [vmem:[#allocation5 + $0x1] sm:$0x1] }
0x1d60   :  { %v2373_v47 = vrot.slane %v7648_v53, %v7646_v45 }
0x1d62   :  { %vm2374_vm7 = vcmp.eq.s32.totalorder %v7643_v34, %v2373_v47 }
0x1d63   :  { %v2376_v3 = vsel %vm2374_vm7, %v7653_v54, 0.0 }
0x1d64   :  { %v2378_v5 = vsel %vm2377_vm6, %v2376_v3, 0.0 }
0x1d65   :  { %v2379_v7 = vrot.slane %v2378_v5, 4 }
0x1d67   :  { %v2380_v49 = vadd.f32 %v2379_v7, %v2378_v5 }
0x1d69   :  { %v2381_v55 = vrot.slane %v2380_v49, 2 }
0x1d6b   :  { %v2382_v56 = vadd.f32 %v2381_v55, %v2380_v49 }
0x1d6d   :  { %v2383_v57 = vrot.slane %v2382_v56, 1 }
0x1d6f   :  { %v2384_v58 = vadd.f32 %v2383_v57, %v2382_v56 }
0x1d71   :  { %6243 = vmatmul.mubr.msk.f32.vlgmr.msra.gmra.mxu0 %vm119_vm1, %v2384_v58 }
0x1d72   :  { %6257 = vmatpush3.msra.mxu0 %v7661_v14  ;;  %6264 = vmatprep.mubr.msk.f32.mxu0 %vm7023_vm0, %v7022_v0 }
0x1d73   :  { %6258 = vmatprep.subr.mxu0 %v7022_v0 }
0x1d74   :  { %6259 = vmatpush3.msra.mxu0 %v7667_v17 }
0x1d75   :  { %6260 = vmatprep.subr.mxu0 %v7022_v0 }
0x1d76   :  { %6261 = vmatpush3.msra.mxu0 %v7671_v10 }
0x1d77   :  { %6262 = vmatprep.subr.mxu0 %v7022_v0 }
0x1d78   :  { %6263 = vmatpush3.msra.mxu0 %v7675_v63 }
0x1d79   :  { %6278 = vmatprep.subr.mxu0 %v7022_v0 }
0x1e31   :  { %v2524_v4 = vpop.f32.mrf.mxu0 }
0x1e32   :  { %v2525_v6 = vadd.f32 %v2524_v4, %v7567_v50 }
0x1e33   :  { %v6244_v8 = vpop.f32.mrf.mxu0 }
0x1e34   :  { %v2528_v33 = vadd.f32 %v7680_v16, %v2525_v6 }
0x1e36   :  { %6695 = vtanh.f32 %v2528_v33  ;;  %v5607_v20 = vmul.f32 -1.442695, %v2528_v33 }
0x1e38   :  { %6697 = vpow2.f32 %v5607_v20 }
0x1e43   :  { %v6696_v35 = vpop.eup %6695 }
0x1e44   :  { %2538 = vrot.lane.b32.xlu0 %v6696_v35, %s7024_s19 }
0x1e45   :  { %v6698_v37 = vpop.eup %6697 }
0x1e46   :  { %v2532_v21 = vadd.f32 1.0, %v6698_v37 }
0x1e48   :  { %6699 = vrcp.f32 %v2532_v21  ;;  %v6848_v21 = vld [vmem:[%s8487_s6 + $0x10] sm:$0xff] }
0x1e55   :  { %v6700_v24 = vpop.eup %6699 }
0x1e56   :  { %v2536_v50 = vmul.f32 %v6700_v24, %v7531_v28  ;;  %v7703_v28 = vld [vmem:[#allocation2 + $0x78] sm:$0xff] }
0x1eb6   :  { %v2539_v26 = vpop.permute.xlu0 %2538 }
0x1eb7   :  { %v2541_v27 = vmul.f32 %v6700_v24, %v2539_v26  ;;  %v6850_v26 = vld [vmem:[%s8487_s6] sm:$0xff] }
0x1eb9   :  { %2543 = vrot.lane.b32.xlu1 %v2541_v27, %s7025_s22 }
0x1f2b   :  { %v2544_v13 = vpop.permute.xlu1 %2543 }
0x1f2c   :  { %v7686_v38 = vadd.f32 %v2544_v13, %v2536_v50 }
0x1f2e   :  { %6701 = vtanh.f32 %v7686_v38 }
0x1f3b   :  { %v6702_v39 = vpop.eup %6701 }
0x1f3c   :  { %2549 = vrot.lane.b32.xlu0 %v6702_v39, %s7024_s19 }
0x1fae   :  { %v2550_v40 = vpop.permute.xlu0 %2549 }
0x1faf   :  { %v2552_v44 = vmul.f32 %v6700_v24, %v2550_v40  ;;  %v6849_v24 = vld [vmem:[%s8487_s6 + $0x8] sm:$0xff] }
0x1fb1   :  { %2624 = vrot.lane.b32.xlu1 %v2552_v44, %s7025_s22 }
0x2023   :  { %v2625_v46 = vpop.permute.xlu1 %2624 }
0x2024   :  { %6265 = vmatmul.mubr.msk.f32.vlgmr.msra.gmra.mxu0 %vm119_vm1, %v2625_v46 }
0x2025   :  { %6279 = vmatpush3.msra.mxu0 %v7537_v41  ;;  %6286 = vmatprep.mubr.msk.f32.mxu0 %vm7023_vm0, %v7022_v0 }
0x2026   :  { %6280 = vmatprep.subr.mxu0 %v7022_v0 }
0x2027   :  { %6281 = vmatpush3.msra.mxu0 %v7543_v42 }
0x2028   :  { %6282 = vmatprep.subr.mxu0 %v7022_v0 }
0x2029   :  { %6283 = vmatpush3.msra.mxu0 %v7547_v43 }
0x202a   :  { %6284 = vmatprep.subr.mxu0 %v7022_v0 }
0x202b   :  { %6285 = vmatpush3.msra.mxu0 %v7551_v19 }
0x202c   :  { %6287 = vmatmul.mubr.msk.f32.vlgmr.msra.gmra.mxu0 %vm119_vm1, %v2625_v46  ;;  %6300 = vmatprep.subr.mxu0 %v7022_v0 }
0x202d   :  { %6301 = vmatpush3.msra.mxu0 %v7703_v28  ;;  %6308 = vmatprep.mubr.msk.f32.mxu0 %vm7023_vm0, %v7022_v0 }
0x202e   :  { %6302 = vmatprep.subr.mxu0 %v7022_v0 }
0x202f   :  { %6303 = vmatpush3.msra.mxu0 %v7709_v30 }
0x2030   :  { %6304 = vmatprep.subr.mxu0 %v7022_v0 }
0x2031   :  { %6305 = vmatpush3.msra.mxu0 %v7713_v48 }
0x2032   :  { %6306 = vmatprep.subr.mxu0 %v7022_v0 }
0x2033   :  { %6307 = vmatpush3.msra.mxu0 %v7717_v29 }
0x2034   :  { %6322 = vmatprep.subr.mxu0 %v7022_v0 }
0x20e4   :  { %v2694_v32 = vpop.f32.mrf.mxu0 }
0x20e5   :  { %v2695_v51 = vadd.f32 %v2694_v32, %v7617_v15 }
0x20e6   :  { %v6266_v52 = vpop.f32.mrf.mxu0 }
0x20e7   :  { %v2698_v47 = vadd.f32 %v7722_v36, %v2695_v51 }
0x20e9   :  { %6703 = vtanh.f32 %v2698_v47  ;;  %v5610_v49 = vmul.f32 -1.442695, %v2698_v47  ;;  %v2804_v47 = vld [vmem:[%s8491_s10 + $0x3] sm:$0x1] }
0x20eb   :  { %6705 = vpow2.f32 %v5610_v49 }
0x20ec   :  { %v7725_v3 = vpop.f32.mrf.mxu0 }
0x20ee   :  { %v6288_v5 = vpop.f32.mrf.mxu0 }
0x20f6   :  { %v6704_v7 = vpop.eup %6703 }
0x20f7   :  { %2708 = vrot.lane.b32.xlu0 %v6704_v7, %s7024_s19 }
0x20f8   :  { %v6706_v55 = vpop.eup %6705 }
0x20f9   :  { %v2702_v56 = vadd.f32 1.0, %v6706_v55 }
0x20fb   :  { %6707 = vrcp.f32 %v2702_v56 }
0x2108   :  { %v6708_v57 = vpop.eup %6707 }
0x2109   :  { %v2706_v4 = vmul.f32 %v6708_v57, %v7572_v1  ;;  %v6847_v1 = vld [vmem:[%s8487_s6 + $0x18] sm:$0xff] }
0x2169   :  { %v2709_v58 = vpop.permute.xlu0 %2708 }
0x216a   :  { %v2711_v15 = vmul.f32 %v6708_v57, %v2709_v58 }
0x216c   :  { %2713 = vrot.lane.b32.xlu1 %v2711_v15, %s7025_s22 }
0x21de   :  { %v2714_v6 = vpop.permute.xlu1 %2713 }
0x21df   :  { %v7730_v8 = vadd.f32 %v2714_v6, %v2706_v4 }
0x21e1   :  { %6709 = vtanh.f32 %v7730_v8 }
0x21ee   :  { %v6710_v33 = vpop.eup %6709 }
0x21ef   :  { %2719 = vrot.lane.b32.xlu0 %v6710_v33, %s7024_s19 }
0x2261   :  { %v2720_v35 = vpop.permute.xlu0 %2719 }
0x2262   :  { %v2722_v20 = vmul.f32 %v6708_v57, %v2720_v35 }
0x2264   :  { %2724 = vrot.lane.b32.xlu1 %v2722_v20, %s7025_s22 }
0x22d6   :  { %v2725_v37 = vpop.permute.xlu1 %2724 }
0x22d7   :  { %6276 = vmatmul.mubr.msk.f32.vlgmr.msra.gmra.mxu1 %vm119_vm1, %v2725_v37  ;;  %6309 = vmatmul.mubr.msk.f32.vlgmr.msra.gmra.mxu0 %vm119_vm1, %v2725_v37 }
0x22d8   :  { %6290 = vmatpush3.msra.mxu1 %v7583_v59  ;;  %6297 = vmatprep.mubr.msk.f32.mxu1 %vm7023_vm0, %v7022_v0 }
0x22d9   :  { %6291 = vmatprep.subr.mxu1 %v7022_v0  ;;  %6323 = vmatpush3.msra.mxu0 %v6847_v1 }
0x22da   :  { %6292 = vmatpush3.msra.mxu1 %v7589_v60  ;;  %6324 = vmatprep.subr.mxu0 %v7022_v0 }
0x22db   :  { %6293 = vmatprep.subr.mxu1 %v7022_v0  ;;  %6325 = vmatpush3.msra.mxu0 %v6848_v21 }
0x22dc   :  { %6294 = vmatpush3.msra.mxu1 %v7594_v61  ;;  %6326 = vmatprep.subr.mxu0 %v7022_v0 }
0x22dd   :  { %6295 = vmatprep.subr.mxu1 %v7022_v0  ;;  %6327 = vmatpush3.msra.mxu0 %v6849_v24 }
0x22de   :  { %6296 = vmatpush3.msra.mxu1 %v7599_v62  ;;  %6328 = vmatprep.subr.mxu0 %v7022_v0 }
0x22df   :  { %6311 = vmatprep.subr.mxu1 %v7022_v0  ;;  %6329 = vmatpush3.msra.mxu0 %v6850_v26 }
0x22e0   :  { %6330 = vmatprep.mubr.msk.f32.mxu0 %vm7023_vm0, %v7022_v0  ;;  %6344 = vmatprep.subr.mxu0 %v7022_v0 }
0x2397   :  { %v2794_v27 = vpop.f32.mrf.mxu1  ;;  %v7765_v50 = vpop.f32.mrf.mxu0 }
0x2398   :  { %v2795_v13 = vadd.f32 %v2794_v27, %v7610_v9 }
0x2399   :  { %v6277_v39 = vpop.f32.mrf.mxu1  ;;  %v6310_v40 = vpop.f32.mrf.mxu0 }
0x239a   :  { %v2798_v44 = vadd.f32 %v2795_v13, %v7615_v11 }
0x239c   :  { %v2799_v46 = vmul.f32 0.2, %v2798_v44 }
0x239e   :  { %6711 = vtanh.f32 %v2799_v46 }
0x23ab   :  { %v6712_v32 = vpop.eup %6711 }
0x23ac   :  { %v2801_v51 = vmul.f32 0.44, %v6712_v32 }
0x23ae   :  { %v7770_v52 = vadd.f32 %v2801_v51, %v7626_v18 }
0x23b0   :  { %v2803_v5 = vsel %vm2341_vm3, %v7770_v52, -1e+30 }
0x23b1   :  { %v2805_v9 = vadd.f32 %v2804_v47, %v2803_v5 }
0x23b3   :  { %vm2807_vm8 = vcmp.lt.s32.totalorder %v2805_v9, 0  ;;  %v2808_v7 = vxor.u32 2147483647, %v2805_v9 }
0x23b5   :  { %v2809_v49 = vsel %vm2807_vm8, %v2808_v7, %v2805_v9 }
0x23b6   :  { %v2810_v11 = vand.u32 4294967168, %v2809_v49 }
0x23b8   :  { %v2811_v55 = vor.u32 %v2810_v11, %v7639_v22 }
0x23ba   :  { %v2812_v56 = vsel %vm1389_vm2, %v2811_v55, 2147483648 }
0x23bb   :  { %v2814_v57 = vshra.s32 %v2812_v56, 16  ;;  %v2813_v58 = vand.u32 65535, %v2812_v56 }
0x23bd   :  { %v2816_v18 = vcvt.s32.f32 %v2814_v57  ;;  %v2815_v4 = vcvt.s32.f32 %v2813_v58 }
0x23bf   :  { %2817 = vmax.xlane.f32.xlu0 %v2816_v18 }
0x2448   :  { %v2818_v15 = vpop.xlane.xlu0 %2817 }
0x2449   :  { %vm2819_vm9 = vcmp.eq.f32.partialorder %v2816_v18, %v2818_v15  ;;  %v2824_v33 = vcvt.f32.s32 %v2818_v15 }
0x244a   :  { %v2820_v6 = vsel %vm2819_vm9, %v2815_v4, -inf }
0x244b   :  { %2821 = vmax.xlane.f32.xlu1 %v2820_v6  ;;  %v2825_v20 = vshll.u32 %v2824_v33, 16 }
0x24d4   :  { %v2822_v35 = vpop.xlane.xlu1 %2821 }
0x24d5   :  { %v2823_v37 = vcvt.f32.s32 %v2822_v35 }
0x24d7   :  { %v2826_v1 = vadd.s32 %v2825_v20, %v2823_v37 }
0x24d9   :  { %v2827_v21 = vand.u32 127, %v2826_v1 }
0x24db   :  { %v7780_v24 = vsub.s32 127, %v2827_v21 }
0x24dd   :  { %v2832_v26 = vrot.slane %v7780_v24, %v7646_v45 }
0x24df   :  { %vm2833_vm10 = vcmp.eq.s32.totalorder %v7643_v34, %v2832_v26 }
0x24e0   :  { %v2834_v27 = vsel %vm2833_vm10, %v7653_v54, 0.0 }
0x24e1   :  { %v2835_v13 = vsel %vm2377_vm6, %v2834_v27, 0.0 }
0x24e2   :  { %v2836_v39 = vrot.slane %v2835_v13, 4 }
0x24e4   :  { %v2837_v40 = vadd.f32 %v2836_v39, %v2835_v13 }
0x24e6   :  { %v2838_v44 = vrot.slane %v2837_v40, 2 }
0x24e8   :  { %v2839_v46 = vadd.f32 %v2838_v44, %v2837_v40 }
0x24ea   :  { %v2840_v32 = vrot.slane %v2839_v46, 1 }
0x24ec   :  { %v2841_v51 = vadd.f32 %v2840_v32, %v2839_v46 }
0x24ee   :  { %6298 = vmatmul.mubr.msk.f32.vlgmr.msra.gmra.mxu1 %vm119_vm1, %v2841_v51 }
0x24ef   :  { %6312 = vmatpush3.msra.mxu1 %v7661_v14  ;;  %6319 = vmatprep.mubr.msk.f32.mxu1 %vm7023_vm0, %v7022_v0 }
0x24f0   :  { %6313 = vmatprep.subr.mxu1 %v7022_v0 }
0x24f1   :  { %6314 = vmatpush3.msra.mxu1 %v7667_v17 }
0x24f2   :  { %6315 = vmatprep.subr.mxu1 %v7022_v0 }
0x24f3   :  { %6316 = vmatpush3.msra.mxu1 %v7671_v10 }
0x24f4   :  { %6317 = vmatprep.subr.mxu1 %v7022_v0 }
0x24f5   :  { %6318 = vmatpush3.msra.mxu1 %v7675_v63 }
0x24f6   :  { %6333 = vmatprep.subr.mxu1 %v7022_v0 }
0x25ae   :  { %v2981_v54 = vpop.f32.mrf.mxu1 }
0x25af   :  { %v2982_v47 = vadd.f32 %v2981_v54, %v7725_v3 }
0x25b0   :  { %v6299_v5 = vpop.f32.mrf.mxu1 }
0x25b1   :  { %v2985_v9 = vadd.f32 %v7680_v16, %v2982_v47 }
0x25b3   :  { %6713 = vtanh.f32 %v2985_v9  ;;  %v5614_v49 = vmul.f32 -1.442695, %v2985_v9 }
0x25b5   :  { %6715 = vpow2.f32 %v5614_v49  ;;  %v7857_v49 = vld [vmem:[#allocation7 + $0x10] sm:$0xff] }
0x25c0   :  { %v6714_v7 = vpop.eup %6713 }
0x25c1   :  { %2995 = vrot.lane.b32.xlu0 %v6714_v7, %s7024_s19 }
0x25c2   :  { %v6716_v11 = vpop.eup %6715 }
0x25c3   :  { %v2989_v55 = vadd.f32 1.0, %v6716_v11  ;;  %v7863_v11 = vld [vmem:[#allocation7 + $0x8] sm:$0xff] }
0x25c5   :  { %6717 = vrcp.f32 %v2989_v55  ;;  %v6854_v55 = vld [vmem:[%s8485_s4] sm:$0x1] }
0x25d2   :  { %v6718_v56 = vpop.eup %6717 }
0x25d3   :  { %v2993_v58 = vmul.f32 %v6718_v56, %v7686_v38 }
0x2633   :  { %v2996_v57 = vpop.permute.xlu0 %2995 }
0x2634   :  { %v2998_v18 = vmul.f32 %v6718_v56, %v2996_v57 }
0x2636   :  { %3000 = vrot.lane.b32.xlu1 %v2998_v18, %s7025_s22 }
0x26a8   :  { %v3001_v3 = vpop.permute.xlu1 %3000 }
0x26a9   :  { %v7803_v15 = vadd.f32 %v3001_v3, %v2993_v58 }
0x26ab   :  { %6719 = vtanh.f32 %v7803_v15 }
0x26b8   :  { %v6720_v4 = vpop.eup %6719 }
0x26b9   :  { %3006 = vrot.lane.b32.xlu0 %v6720_v4, %s7024_s19 }
0x272b   :  { %v3007_v6 = vpop.permute.xlu0 %3006 }
0x272c   :  { %v3009_v33 = vmul.f32 %v6718_v56, %v3007_v6  ;;  %v7877_v56 = vld [vmem:[#allocation7] sm:$0xff] }
0x272e   :  { %3081 = vrot.lane.b32.xlu1 %v3009_v33, %s7025_s22 }
0x27a0   :  { %v3082_v35 = vpop.permute.xlu1 %3081 }
0x27a1   :  { %6320 = vmatmul.mubr.msk.f32.vlgmr.msra.gmra.mxu1 %vm119_vm1, %v3082_v35 }
0x27a2   :  { %6334 = vmatpush3.msra.mxu1 %v7537_v41  ;;  %6341 = vmatprep.mubr.msk.f32.mxu1 %vm7023_vm0, %v7022_v0 }
0x27a3   :  { %6335 = vmatprep.subr.mxu1 %v7022_v0 }
0x27a4   :  { %6336 = vmatpush3.msra.mxu1 %v7543_v42 }
0x27a5   :  { %6337 = vmatprep.subr.mxu1 %v7022_v0 }
0x27a6   :  { %6338 = vmatpush3.msra.mxu1 %v7547_v43 }
0x27a7   :  { %6339 = vmatprep.subr.mxu1 %v7022_v0 }
0x27a8   :  { %6340 = vmatpush3.msra.mxu1 %v7551_v19 }
0x27a9   :  { %6342 = vmatmul.mubr.msk.f32.vlgmr.msra.gmra.mxu1 %vm119_vm1, %v3082_v35  ;;  %6355 = vmatprep.subr.mxu1 %v7022_v0 }
0x27aa   :  { %6356 = vmatpush3.msra.mxu1 %v7703_v28  ;;  %6363 = vmatprep.mubr.msk.f32.mxu1 %vm7023_vm0, %v7022_v0 }
0x27ab   :  { %6357 = vmatprep.subr.mxu1 %v7022_v0 }
0x27ac   :  { %6358 = vmatpush3.msra.mxu1 %v7709_v30 }
0x27ad   :  { %6359 = vmatprep.subr.mxu1 %v7022_v0 }
0x27ae   :  { %6360 = vmatpush3.msra.mxu1 %v7713_v48 }
0x27af   :  { %6361 = vmatprep.subr.mxu1 %v7022_v0 }
0x27b0   :  { %6362 = vmatpush3.msra.mxu1 %v7717_v29 }
0x27b1   :  { %6377 = vmatprep.subr.mxu1 %v7022_v0 }
0x2861   :  { %v3151_v38 = vpop.f32.mrf.mxu1 }
0x2862   :  { %v3152_v20 = vadd.f32 %v3151_v38, %v7765_v50 }
0x2863   :  { %v6321_v37 = vpop.f32.mrf.mxu1 }
0x2864   :  { %v3155_v1 = vadd.f32 %v7722_v36, %v3152_v20 }
0x2866   :  { %6721 = vtanh.f32 %v3155_v1  ;;  %v5617_v13 = vmul.f32 -1.442695, %v3155_v1 }
0x2868   :  { %6723 = vpow2.f32 %v5617_v13 }
0x2869   :  { %v7832_v21 = vpop.f32.mrf.mxu1 }
0x286b   :  { %v6343_v26 = vpop.f32.mrf.mxu1 }
0x2873   :  { %v6722_v27 = vpop.eup %6721 }
0x2874   :  { %3165 = vrot.lane.b32.xlu0 %v6722_v27, %s7024_s19 }
0x2875   :  { %v6724_v39 = vpop.eup %6723 }
0x2876   :  { %v3159_v40 = vadd.f32 1.0, %v6724_v39 }
0x2878   :  { %6725 = vrcp.f32 %v3159_v40 }
0x2885   :  { %v6726_v44 = vpop.eup %6725 }
0x2886   :  { %v3163_v50 = vmul.f32 %v6726_v44, %v7730_v8  ;;  %v7851_v8 = vld [vmem:[#allocation7 + $0x18] sm:$0xff] }
0x28e6   :  { %v3166_v46 = vpop.permute.xlu0 %3165 }
0x28e7   :  { %v3168_v32 = vmul.f32 %v6726_v44, %v3166_v46 }
0x28e9   :  { %3170 = vrot.lane.b32.xlu1 %v3168_v32, %s7025_s22 }
0x295b   :  { %v3171_v51 = vpop.permute.xlu1 %3170 }
0x295c   :  { %v7837_v54 = vadd.f32 %v3171_v51, %v3163_v50 }
0x295e   :  { %6727 = vtanh.f32 %v7837_v54 }
0x296b   :  { %v6728_v47 = vpop.eup %6727 }
0x296c   :  { %3176 = vrot.lane.b32.xlu0 %v6728_v47, %s7024_s19 }
0x29de   :  { %v3177_v5 = vpop.permute.xlu0 %3176 }
0x29df   :  { %v7841_v9 = vmul.f32 %v6726_v44, %v3177_v5 }
0x29e1   :  { %3181 = vrot.lane.b32.xlu1 %v7841_v9, %s7025_s22 }
0x2a53   :  { %v3182_v7 = vpop.permute.xlu1 %3181 }
0x2a54   :  { %6331 = vmatmul.mubr.msk.f32.vlgmr.msra.gmra.mxu0 %vm119_vm1, %v3182_v7  ;;  %6364 = vmatmul.mubr.msk.f32.vlgmr.msra.gmra.mxu1 %vm119_vm1, %v3182_v7 }
0x2a55   :  { %6345 = vmatpush3.msra.mxu0 %v7583_v59  ;;  %6352 = vmatprep.mubr.msk.f32.mxu0 %vm7023_vm0, %v7022_v0 }
0x2a56   :  { %6346 = vmatprep.subr.mxu0 %v7022_v0  ;;  %6378 = vmatpush3.msra.mxu1 %v7851_v8 }
0x2a57   :  { %6347 = vmatpush3.msra.mxu0 %v7589_v60  ;;  %6379 = vmatprep.subr.mxu1 %v7022_v0 }
0x2a58   :  { %6348 = vmatprep.subr.mxu0 %v7022_v0  ;;  %6380 = vmatpush3.msra.mxu1 %v7857_v49 }
0x2a59   :  { %6349 = vmatpush3.msra.mxu0 %v7594_v61  ;;  %6381 = vmatprep.subr.mxu1 %v7022_v0 }
0x2a5a   :  { %6350 = vmatprep.subr.mxu0 %v7022_v0  ;;  %6382 = vmatpush3.msra.mxu1 %v7863_v11 }
0x2a5b   :  { %6351 = vmatpush3.msra.mxu0 %v7599_v62  ;;  %6383 = vmatprep.subr.mxu1 %v7022_v0 }
0x2a5c   :  { %6353 = vmatmul.mubr.msk.f32.vlgmr.msra.gmra.mxu0 %vm119_vm1, %v6854_v55  ;;  %6366 = vmatprep.subr.mxu0 %v7022_v0 }
0x2a5d   :  { %6367 = vmatpush3.msra.mxu0 %v7661_v14  ;;  %6374 = vmatprep.mubr.msk.f32.mxu0 %vm7023_vm0, %v7022_v0 }
0x2a5e   :  { %6368 = vmatprep.subr.mxu0 %v7022_v0  ;;  %6384 = vmatpush3.msra.mxu1 %v7877_v56 }
0x2a5f   :  { %6369 = vmatpush3.msra.mxu0 %v7667_v17  ;;  %6385 = vmatprep.mubr.msk.f32.mxu1 %vm7023_vm0, %v7022_v0 }
0x2a60   :  { %6370 = vmatprep.subr.mxu0 %v7022_v0  ;;  %6399 = vmatprep.subr.mxu1 %v7022_v0 }
0x2a61   :  { %6371 = vmatpush3.msra.mxu0 %v7671_v10 }
0x2a62   :  { %6372 = vmatprep.subr.mxu0 %v7022_v0 }
0x2a63   :  { %6373 = vmatpush3.msra.mxu0 %v7675_v63 }
0x2a64   :  { %6388 = vmatprep.subr.mxu0 %v7022_v0 }
0x2b14   :  { %v7889_v57 = vpop.f32.mrf.mxu0  ;;  %v3486_v18 = vpop.f32.mrf.mxu1 }
0x2b16   :  { %v6332_v58 = vpop.f32.mrf.mxu0  ;;  %v6365_v3 = vpop.f32.mrf.mxu1 }
0x2b1c   :  { %v3391_v4 = vpop.f32.mrf.mxu0 }
0x2b1d   :  { %v3392_v6 = vadd.f32 %v3391_v4, %v7832_v21 }
0x2b1e   :  { %v6354_v33 = vpop.f32.mrf.mxu0 }
0x2b1f   :  { %v3395_v35 = vadd.f32 %v7680_v16, %v3392_v6 }
0x2b21   :  { %6729 = vtanh.f32 %v3395_v35  ;;  %v5621_v20 = vmul.f32 -1.442695, %v3395_v35 }
0x2b23   :  { %6731 = vpow2.f32 %v5621_v20 }
0x2b2e   :  { %v6730_v38 = vpop.eup %6729 }
0x2b2f   :  { %3405 = vrot.lane.b32.xlu0 %v6730_v38, %s7024_s19 }
0x2b30   :  { %v6732_v37 = vpop.eup %6731 }
0x2b31   :  { %v3399_v1 = vadd.f32 1.0, %v6732_v37 }
0x2b33   :  { %6733 = vrcp.f32 %v3399_v1 }
0x2b40   :  { %v6734_v26 = vpop.eup %6733 }
0x2b41   :  { %v3403_v39 = vmul.f32 %v6734_v26, %v7803_v15 }
0x2ba1   :  { %v3406_v27 = vpop.permute.xlu0 %3405 }
0x2ba2   :  { %v3408_v13 = vmul.f32 %v6734_v26, %v3406_v27 }
0x2ba4   :  { %3410 = vrot.lane.b32.xlu1 %v3408_v13, %s7025_s22  ;;  %v7977_v13 = vld [vmem:[%s8490_s9 + $0x2] ss:$0 sm:$0xff] }
0x2c16   :  { %v3411_v21 = vpop.permute.xlu1 %3410 }
0x2c17   :  { %v7896_v40 = vadd.f32 %v3411_v21, %v3403_v39 }
0x2c19   :  { %6735 = vtanh.f32 %v7896_v40 }
0x2c26   :  { %v6736_v44 = vpop.eup %6735 }
0x2c27   :  { %3416 = vrot.lane.b32.xlu0 %v6736_v44, %s7024_s19  ;;  %v7026_v44 = vmov 0  }
0x2c28   :  { %6611 = vset.pattern.permute.xlu1 %v7026_v44  ;;  %6612 = vset.pattern.permute.xlu0 %v7026_v44 }
0x2c99   :  { %v3417_v46 = vpop.permute.xlu0 %3416 }
0x2c9a   :  { %v3419_v32 = vmul.f32 %v6734_v26, %v3417_v46  ;;  %v7984_v46 = vld [vmem:[%s8490_s9 + $0x3] ss:$0 sm:$0xff] }
0x2c9c   :  { %3491 = vrot.lane.b32.xlu1 %v3419_v32, %s7025_s22 }
0x2d0e   :  { %v3492_v50 = vpop.permute.xlu1 %3491 }
0x2d0f   :  { %6375 = vmatmul.mubr.msk.f32.vlgmr.msra.gmra.mxu0 %vm119_vm1, %v3492_v50 }
0x2d10   :  { %6389 = vmatpush3.msra.mxu0 %v7537_v41  ;;  %6396 = vmatprep.mubr.msk.f32.mxu0 %vm7023_vm0, %v7022_v0 }
0x2d11   :  { %6390 = vmatprep.subr.mxu0 %v7022_v0 }
0x2d12   :  { %6391 = vmatpush3.msra.mxu0 %v7543_v42 }
0x2d13   :  { %6392 = vmatprep.subr.mxu0 %v7022_v0 }
0x2d14   :  { %6393 = vmatpush3.msra.mxu0 %v7547_v43 }
0x2d15   :  { %6394 = vmatprep.subr.mxu0 %v7022_v0 }
0x2d16   :  { %6395 = vmatpush3.msra.mxu0 %v7551_v19 }
0x2d17   :  { %6397 = vmatmul.mubr.msk.f32.vlgmr.msra.gmra.mxu0 %vm119_vm1, %v3492_v50  ;;  %6410 = vmatprep.subr.mxu0 %v7022_v0 }
0x2d18   :  { %6411 = vmatpush3.msra.mxu0 %v7703_v28  ;;  %6418 = vmatprep.mubr.msk.f32.mxu0 %vm7023_vm0, %v7022_v0 }
0x2d19   :  { %6412 = vmatprep.subr.mxu0 %v7022_v0 }
0x2d1a   :  { %6413 = vmatpush3.msra.mxu0 %v7709_v30 }
0x2d1b   :  { %6414 = vmatprep.subr.mxu0 %v7022_v0 }
0x2d1c   :  { %6415 = vmatpush3.msra.mxu0 %v7713_v48 }
0x2d1d   :  { %6416 = vmatprep.subr.mxu0 %v7022_v0 }
0x2d1e   :  { %6417 = vmatpush3.msra.mxu0 %v7717_v29 }
0x2d1f   :  { %6432 = vmatprep.subr.mxu0 %v7022_v0 }
0x2dcf   :  { %v3561_v41 = vpop.f32.mrf.mxu0 }
0x2dd0   :  { %v3562_v42 = vadd.f32 %v3561_v41, %v3486_v18 }
0x2dd1   :  { %v6376_v43 = vpop.f32.mrf.mxu0 }
0x2dd2   :  { %v3565_v19 = vadd.f32 %v7722_v36, %v3562_v42 }
0x2dd4   :  { %6737 = vtanh.f32 %v3565_v19  ;;  %v5624_v5 = vmul.f32 -1.442695, %v3565_v19 }
0x2dd6   :  { %6739 = vpow2.f32 %v5624_v5 }
0x2dd7   :  { %v7924_v15 = vpop.f32.mrf.mxu0 }
0x2dd9   :  { %v6398_v51 = vpop.f32.mrf.mxu0 }
0x2dda   :  { %v3700_v51 = vld [vmem:[%s8491_s10 + $0x4] sm:$0x1] }
0x2de1   :  { %v6738_v47 = vpop.eup %6737 }
0x2de2   :  { %3575 = vrot.lane.b32.xlu0 %v6738_v47, %s7024_s19 }
0x2de3   :  { %v6740_v7 = vpop.eup %6739 }
0x2de4   :  { %v3569_v55 = vadd.f32 1.0, %v6740_v7  ;;  %v3702_v7 = vrot.slane %v3700_v51, 6 }
0x2de6   :  { %6741 = vrcp.f32 %v3569_v55 }
0x2df3   :  { %v6742_v58 = vpop.eup %6741 }
0x2df4   :  { %v3573_v18 = vmul.f32 %v6742_v58, %v7837_v54 }
0x2e54   :  { %v3576_v3 = vpop.permute.xlu0 %3575 }
0x2e55   :  { %v3578_v4 = vmul.f32 %v6742_v58, %v3576_v3 }
0x2e57   :  { %3580 = vrot.lane.b32.xlu1 %v3578_v4, %s7025_s22 }
0x2ec9   :  { %v3581_v6 = vpop.permute.xlu1 %3580 }
0x2eca   :  { %v7929_v33 = vadd.f32 %v3581_v6, %v3573_v18 }
0x2ecc   :  { %6743 = vtanh.f32 %v7929_v33 }
0x2ed9   :  { %v6744_v35 = vpop.eup %6743 }
0x2eda   :  { %3586 = vrot.lane.b32.xlu0 %v6744_v35, %s7024_s19 }
0x2f4c   :  { %v3587_v38 = vpop.permute.xlu0 %3586 }
0x2f4d   :  { %v3589_v20 = vmul.f32 %v6742_v58, %v3587_v38 }
0x2f4f   :  { %3591 = vrot.lane.b32.xlu1 %v3589_v20, %s7025_s22 }
0x2fc1   :  { %v3592_v37 = vpop.permute.xlu1 %3591 }
0x2fc2   :  { %6386 = vmatmul.mubr.msk.f32.vlgmr.msra.gmra.mxu1 %vm119_vm1, %v3592_v37  ;;  %6419 = vmatmul.mubr.msk.f32.vlgmr.msra.gmra.mxu0 %vm119_vm1, %v3592_v37 }
0x2fc3   :  { %6400 = vmatpush3.msra.mxu1 %v7583_v59  ;;  %6407 = vmatprep.mubr.msk.f32.mxu1 %vm7023_vm0, %v7022_v0  ;;  %v6856_v59 = vld [vmem:[%s8490_s9] sm:$0x1] }
0x2fc4   :  { %6401 = vmatprep.subr.mxu1 %v7022_v0  ;;  %6433 = vmatpush3.msra.mxu0 %v7851_v8 }
0x2fc5   :  { %6402 = vmatpush3.msra.mxu1 %v7589_v60  ;;  %6434 = vmatprep.subr.mxu0 %v7022_v0  ;;  %v3252_v60 = vadd.f32 %v6856_v59, %v7889_v57 }
0x2fc6   :  { %6403 = vmatprep.subr.mxu1 %v7022_v0  ;;  %6435 = vmatpush3.msra.mxu0 %v7857_v49 }
0x2fc7   :  { %6404 = vmatpush3.msra.mxu1 %v7594_v61  ;;  %6436 = vmatprep.subr.mxu0 %v7022_v0  ;;  %v7963_v61 = vld [vmem:[%s8490_s9 + $0x1] sm:$0x1] }
0x2fc8   :  { %6405 = vmatprep.subr.mxu1 %v7022_v0  ;;  %6437 = vmatpush3.msra.mxu0 %v7863_v11 }
0x2fc9   :  { %6406 = vmatpush3.msra.mxu1 %v7599_v62  ;;  %6438 = vmatprep.subr.mxu0 %v7022_v0  ;;  %v3666_v62 = vrot.slane %v3252_v60, 6 }
0x2fca   :  { %6421 = vmatprep.subr.mxu1 %v7022_v0  ;;  %6439 = vmatpush3.msra.mxu0 %v7877_v56 }
0x2fcb   :  { %6440 = vmatprep.mubr.msk.f32.mxu0 %vm7023_vm0, %v7022_v0  ;;  %6454 = vmatprep.subr.mxu0 %v7022_v0  ;;  %v7971_v26 = vsel %vm3668_vm11, %v7380_v25, %v3666_v62 }
0x3082   :  { %v3661_v54 = vpop.f32.mrf.mxu1  ;;  %v7965_v8 = vpop.f32.mrf.mxu0 }
0x3083   :  { %v3662_v49 = vadd.f32 %v3661_v54, %v7963_v61 }
0x3084   :  { %v6387_v11 = vpop.f32.mrf.mxu1  ;;  %v6420_v56 = vpop.f32.mrf.mxu0 }
0x3085   :  { %v3673_v1 = vrot.slane %v3662_v49, %v7646_v45  ;;  %v3732_v11 = vrot.slane %v7841_v9, 6 }
0x3087   :  { %v3674_v57 = vadd.f32 %v3673_v1, %v7971_v26 }
0x3089   :  { %6745 = vtanh.f32 %v3674_v57 }
0x3096   :  { %v6746_v27 = vpop.eup %6745 }
0x3097   :  { %v3676_v39 = vmul.f32 %v6746_v27, %v7977_v13 }
0x3099   :  { %v3678_v21 = vsel %vm3677_vm12, %v3676_v39, 0.0 }
0x309a   :  { %3679 = vadd.xlane.f32.xlu0 %v3678_v21 }
0x3123   :  { %v3680_v32 = vpop.xlane.xlu0 %3679 }
0x3124   :  { %v3681_v50 = vadd.f32 %v7984_v46, %v3680_v32 }
0x3126   :  { %v3682_v41 = vmul.f32 0.2, %v3681_v50 }
0x3128   :  { %6747 = vtanh.f32 %v3682_v41 }
0x3135   :  { %v6748_v42 = vpop.eup %6747 }
0x3136   :  { %v3684_v43 = vmul.f32 1.1, %v6748_v42 }
0x3138   :  { %3687 = vperm.xlu1 %6611, %v3684_v43  }
0x31b3   :  { %v3688_v19 = vpop.permute.xlu1 %3687 }
0x31b4   :  { %v3690_v47 = vsel %vm1415_vm13, %v3688_v19, -1e+30 }
0x31b5   :  { %v3692_v5 = vrot.slane %v3690_v47, 7 }
0x31b7   :  { %v3694_v55 = vsel %vm1422_vm14, %v3688_v19, %v3692_v5 }
0x31b8   :  { %v3697_v58 = vrot.slane %v3694_v55, 7 }
0x31ba   :  { %v7999_v3 = vsel %vm3695_vm15, %v3688_v19, %v3697_v58 }
0x31bb   :  { %v3704_v4 = vadd.f32 %v3702_v7, %v7999_v3 }
0x31bd   :  { %vm3706_vm4 = vcmp.lt.s32.totalorder %v3704_v4, 0  ;;  %v3707_v18 = vxor.u32 2147483647, %v3704_v4 }
0x31bf   :  { %v3708_v6 = vsel %vm3706_vm4, %v3707_v18, %v3704_v4 }
0x31c0   :  { %v3709_v35 = vand.u32 4294967168, %v3708_v6  ;;  %v8034_v6 = vld [vmem:[#allocation2 + $0x38] sm:$0xff] }
0x31c2   :  { %v3710_v38 = vor.u32 %v3709_v35, %v7639_v22  ;;  %v8044_v35 = vld [vmem:[#allocation2 + $0x28] sm:$0xff] }
0x31c4   :  { %v3712_v20 = vsel %vm3711_vm5, %v3710_v38, 2147483648  ;;  %v8048_v38 = vld [vmem:[#allocation2 + $0x20] sm:$0xff] }
0x31c5   :  { %v3714_v37 = vshra.s32 %v3712_v20, 16  ;;  %v3713_v60 = vand.u32 65535, %v3712_v20 }
0x31c7   :  { %v3716_v59 = vcvt.s32.f32 %v3714_v37  ;;  %v3715_v54 = vcvt.s32.f32 %v3713_v60 }
0x31c9   :  { %3717 = vmax.xlane.f32.xlu1 %v3716_v59 }
0x3252   :  { %v3718_v62 = vpop.xlane.xlu1 %3717 }
0x3253   :  { %vm3719_vm7 = vcmp.eq.f32.partialorder %v3716_v59, %v3718_v62  ;;  %v3724_v56 = vcvt.f32.s32 %v3718_v62 }
0x3254   :  { %v3720_v49 = vsel %vm3719_vm7, %v3715_v54, -inf }
0x3255   :  { %3721 = vmax.xlane.f32.xlu0 %v3720_v49  ;;  %v3725_v57 = vshll.u32 %v3724_v56, 16 }
0x326b   :  { %3733 = vrot.lane.b32.xlu0 %v3732_v11, %s7025_s22 }
0x32de   :  { %v3722_v1 = vpop.xlane.xlu0 %3721 }
0x32df   :  { %v3723_v27 = vcvt.f32.s32 %v3722_v1 }
0x32e1   :  { %v3726_v39 = vadd.s32 %v3725_v57, %v3723_v27 }
0x32e2   :  { %v8009_v32 = vpop.permute.xlu0 %3733 }
0x32e3   :  { %v3727_v21 = vand.u32 127, %v3726_v39 }
0x32e5   :  { %v8006_v44 = vsub.s32 127, %v3727_v21 }
0x32e7   :  { %vm3729_vm8 = vcmp.eq.s32.totalorder %v8006_v44, 2 }
0x32e8   :  { %v3736_v50 = vsel %vm3729_vm8, %v8009_v32, 0.0 }
0x32e9   :  { %v3808_v41 = vrot.slane %v3736_v50, 2  ;;  %v8077_v50 = vld [vmem:[#allocation2 + $0x18] sm:$0xff] }
0x32eb   :  { %6408 = vmatmul.mubr.msk.f32.vlgmr.msra.gmra.mxu1 %vm119_vm1, %v3808_v41  ;;  %v8086_v41 = vld [vmem:[#allocation2 + $0x10] sm:$0xff] }
0x32ec   :  { %6422 = vmatpush3.msra.mxu1 %v7661_v14  ;;  %6429 = vmatprep.mubr.msk.f32.mxu1 %vm7023_vm0, %v7022_v0 }
0x32ed   :  { %6423 = vmatprep.subr.mxu1 %v7022_v0 }
0x32ee   :  { %6424 = vmatpush3.msra.mxu1 %v7667_v17 }
0x32ef   :  { %6425 = vmatprep.subr.mxu1 %v7022_v0 }
0x32f0   :  { %6426 = vmatpush3.msra.mxu1 %v7671_v10 }
0x32f1   :  { %6427 = vmatprep.subr.mxu1 %v7022_v0 }
0x32f2   :  { %6428 = vmatpush3.msra.mxu1 %v7675_v63 }
0x32f3   :  { %6443 = vmatprep.subr.mxu1 %v7022_v0 }
0x33ab   :  { %v3877_v9 = vpop.f32.mrf.mxu1 }
0x33ac   :  { %v3878_v14 = vadd.f32 %v3877_v9, %v7924_v15  ;;  %v8091_v9 = vld [vmem:[#allocation8 + $0x10] sm:$0xff] }
0x33ad   :  { %v6409_v42 = vpop.f32.mrf.mxu1 }
0x33ae   :  { %v3881_v43 = vadd.f32 %v7680_v16, %v3878_v14  ;;  %v8094_v14 = vld [vmem:[#allocation2 + $0x8] sm:$0xff] }
0x33af   :  { %v8099_v42 = vld [vmem:[#allocation8 + $0x8] sm:$0xff] }
0x33b0   :  { %6749 = vtanh.f32 %v3881_v43  ;;  %v5628_v17 = vmul.f32 -1.442695, %v3881_v43  ;;  %v8102_v43 = vld [vmem:[#allocation2] sm:$0xff] }
0x33b2   :  { %6751 = vpow2.f32 %v5628_v17 }
0x33bd   :  { %v6750_v19 = vpop.eup %6749 }
0x33be   :  { %3891 = vrot.lane.b32.xlu1 %v6750_v19, %s7024_s19  ;;  %v8107_v19 = vld [vmem:[#allocation8] sm:$0xff] }
0x33bf   :  { %v6752_v51 = vpop.eup %6751 }
0x33c0   :  { %v3885_v10 = vadd.f32 1.0, %v6752_v51 }
0x33c2   :  { %6753 = vrcp.f32 %v3885_v10 }
0x33cf   :  { %v6754_v47 = vpop.eup %6753 }
0x33d0   :  { %v3889_v7 = vmul.f32 %v6754_v47, %v7896_v40  ;;  %v8040_v40 = vld [vmem:[#allocation2 + $0x30] sm:$0xff] }
0x3430   :  { %v3892_v5 = vpop.permute.xlu1 %3891 }
0x3431   :  { %v3894_v63 = vmul.f32 %v6754_v47, %v3892_v5 }
0x3433   :  { %3896 = vrot.lane.b32.xlu0 %v3894_v63, %s7025_s22 }
0x34a5   :  { %v3897_v15 = vpop.permute.xlu0 %3896 }
0x34a6   :  { %v8028_v55 = vadd.f32 %v3897_v15, %v3889_v7 }
0x34a8   :  { %6755 = vtanh.f32 %v8028_v55 }
0x34b5   :  { %v6756_v16 = vpop.eup %6755 }
0x34b6   :  { %3902 = vrot.lane.b32.xlu1 %v6756_v16, %s7024_s19 }
0x3528   :  { %v3903_v58 = vpop.permute.xlu1 %3902 }
0x3529   :  { %v3905_v4 = vmul.f32 %v6754_v47, %v3903_v58 }
0x352b   :  { %3977 = vrot.lane.b32.xlu0 %v3905_v4, %s7025_s22 }
0x359d   :  { %v3978_v18 = vpop.permute.xlu0 %3977 }
0x359e   :  { %6430 = vmatmul.mubr.msk.f32.vlgmr.msra.gmra.mxu1 %vm119_vm1, %v3978_v18 }
0x359f   :  { %6444 = vmatpush3.msra.mxu1 %v8034_v6  ;;  %6451 = vmatprep.mubr.msk.f32.mxu1 %vm7023_vm0, %v7022_v0 }
0x35a0   :  { %6445 = vmatprep.subr.mxu1 %v7022_v0 }
0x35a1   :  { %6446 = vmatpush3.msra.mxu1 %v8040_v40 }
0x35a2   :  { %6447 = vmatprep.subr.mxu1 %v7022_v0 }
0x35a3   :  { %6448 = vmatpush3.msra.mxu1 %v8044_v35 }
0x35a4   :  { %6449 = vmatprep.subr.mxu1 %v7022_v0 }
0x35a5   :  { %6450 = vmatpush3.msra.mxu1 %v8048_v38 }
0x35a6   :  { %6452 = vmatmul.mubr.msk.f32.vlgmr.msra.gmra.mxu1 %vm119_vm1, %v3978_v18  ;;  %6465 = vmatprep.subr.mxu1 %v7022_v0 }
0x35a7   :  { %6466 = vmatpush3.msra.mxu1 %v7703_v28  ;;  %6473 = vmatprep.mubr.msk.f32.mxu1 %vm7023_vm0, %v7022_v0 }
0x35a8   :  { %6467 = vmatprep.subr.mxu1 %v7022_v0 }
0x35a9   :  { %6468 = vmatpush3.msra.mxu1 %v7709_v30 }
0x35aa   :  { %6469 = vmatprep.subr.mxu1 %v7022_v0 }
0x35ab   :  { %6470 = vmatpush3.msra.mxu1 %v7713_v48 }
0x35ac   :  { %6471 = vmatprep.subr.mxu1 %v7022_v0 }
0x35ad   :  { %6472 = vmatpush3.msra.mxu1 %v7717_v29 }
0x35ae   :  { %6487 = vmatprep.subr.mxu1 %v7022_v0 }
0x365e   :  { %v4047_v20 = vpop.f32.mrf.mxu1 }
0x365f   :  { %v4048_v28 = vadd.f32 %v4047_v20, %v7965_v8 }
0x3660   :  { %v6431_v37 = vpop.f32.mrf.mxu1 }
0x3661   :  { %v4051_v59 = vadd.f32 %v7722_v36, %v4048_v28 }
0x3663   :  { %6757 = vtanh.f32 %v4051_v59  ;;  %v5631_v48 = vmul.f32 -1.442695, %v4051_v59 }
0x3665   :  { %6759 = vpow2.f32 %v5631_v48 }
0x3666   :  { %v8065_v60 = vpop.f32.mrf.mxu1 }
0x3668   :  { %v6453_v30 = vpop.f32.mrf.mxu1 }
0x3670   :  { %v6758_v62 = vpop.eup %6757 }
0x3671   :  { %4061 = vrot.lane.b32.xlu1 %v6758_v62, %s7024_s19 }
0x3672   :  { %v6760_v54 = vpop.eup %6759 }
0x3673   :  { %v4055_v49 = vadd.f32 1.0, %v6760_v54 }
0x3675   :  { %6761 = vrcp.f32 %v4055_v49 }
0x3682   :  { %v6762_v29 = vpop.eup %6761 }
0x3683   :  { %v4059_v8 = vmul.f32 %v6762_v29, %v7929_v33  ;;  %v8083_v33 = vld [vmem:[#allocation8 + $0x18] sm:$0xff] }
0x36e3   :  { %v4062_v11 = vpop.permute.xlu1 %4061 }
0x36e4   :  { %v4064_v56 = vmul.f32 %v6762_v29, %v4062_v11 }
0x36e6   :  { %4066 = vrot.lane.b32.xlu0 %v4064_v56, %s7025_s22 }
0x3758   :  { %v4067_v36 = vpop.permute.xlu0 %4066 }
0x3759   :  { %v8070_v1 = vadd.f32 %v4067_v36, %v4059_v8 }
0x375b   :  { %6763 = vtanh.f32 %v8070_v1 }
0x3768   :  { %v6764_v57 = vpop.eup %6763 }
0x3769   :  { %4072 = vrot.lane.b32.xlu1 %v6764_v57, %s7024_s19 }
0x37db   :  { %v4073_v27 = vpop.permute.xlu1 %4072 }
0x37dc   :  { %v4075_v39 = vmul.f32 %v6762_v29, %v4073_v27 }
0x37de   :  { %4077 = vrot.lane.b32.xlu0 %v4075_v39, %s7025_s22 }
0x3850   :  { %v4078_v21 = vpop.permute.xlu0 %4077 }
0x3851   :  { %6441 = vmatmul.mubr.msk.f32.vlgmr.msra.gmra.mxu0 %vm119_vm1, %v4078_v21  ;;  %6474 = vmatmul.mubr.msk.f32.vlgmr.msra.gmra.mxu1 %vm119_vm1, %v4078_v21 }
0x3852   :  { %6455 = vmatpush3.msra.mxu0 %v8077_v50  ;;  %6462 = vmatprep.mubr.msk.f32.mxu0 %vm7023_vm0, %v7022_v0 }
0x3853   :  { %6456 = vmatprep.subr.mxu0 %v7022_v0  ;;  %6488 = vmatpush3.msra.mxu1 %v8083_v33 }
0x3854   :  { %6457 = vmatpush3.msra.mxu0 %v8086_v41  ;;  %6489 = vmatprep.subr.mxu1 %v7022_v0 }
0x3855   :  { %6458 = vmatprep.subr.mxu0 %v7022_v0  ;;  %6490 = vmatpush3.msra.mxu1 %v8091_v9 }
0x3856   :  { %6459 = vmatpush3.msra.mxu0 %v8094_v14  ;;  %6491 = vmatprep.subr.mxu1 %v7022_v0 }
0x3857   :  { %6460 = vmatprep.subr.mxu0 %v7022_v0  ;;  %6492 = vmatpush3.msra.mxu1 %v8099_v42 }
0x3858   :  { %6461 = vmatpush3.msra.mxu0 %v8102_v43  ;;  %6493 = vmatprep.subr.mxu1 %v7022_v0 }
0x3859   :  { %6476 = vmatprep.subr.mxu0 %v7022_v0  ;;  %6494 = vmatpush3.msra.mxu1 %v8107_v19 }
0x385a   :  { %6495 = vmatprep.mubr.msk.f32.mxu1 %vm7023_vm0, %v7022_v0  ;;  %6509 = vmatprep.subr.mxu1 %v7022_v0 }
0x3911   :  { %v4147_v17 = vpop.f32.mrf.mxu0  ;;  %v8113_v51 = vpop.f32.mrf.mxu1 }
0x3912   :  { %v4148_v10 = vadd.f32 %v4147_v17, %v7963_v61 }
0x3913   :  { %v6442_v47 = vpop.f32.mrf.mxu0  ;;  %v6475_v5 = vpop.f32.mrf.mxu1 }
0x3914   :  { %v4154_v63 = vrot.slane %v4148_v10, %v7646_v45 }
0x3916   :  { %v4155_v7 = vadd.f32 %v4154_v63, %v7971_v26  ;;  %v4179_v26 = vld [vmem:[%s8491_s10 + $0x5] sm:$0x1] }
0x3917   :  { %v4181_v30 = vrot.slane %v4179_v26, 6 }
0x3918   :  { %6765 = vtanh.f32 %v4155_v7 }
0x3925   :  { %v6766_v15 = vpop.eup %6765 }
0x3926   :  { %v4157_v16 = vmul.f32 %v6766_v15, %v7977_v13 }
0x3928   :  { %v4158_v58 = vsel %vm3677_vm12, %v4157_v16, 0.0 }
0x3929   :  { %4159 = vadd.xlane.f32.xlu1 %v4158_v58 }
0x39b2   :  { %v4160_v4 = vpop.xlane.xlu1 %4159 }
0x39b3   :  { %v4161_v18 = vadd.f32 %v7984_v46, %v4160_v4 }
0x39b5   :  { %v4162_v20 = vmul.f32 0.2, %v4161_v18  ;;  %v8140_v18 = vld [vmem:[#allocation2 + $0x58] sm:$0xff] }
0x39b7   :  { %6767 = vtanh.f32 %v4162_v20  ;;  %v8146_v20 = vld [vmem:[#allocation2 + $0x50] sm:$0xff] }
0x39c4   :  { %v6768_v28 = vpop.eup %6767 }
0x39c5   :  { %v4164_v61 = vmul.f32 1.1, %v6768_v28  ;;  %v8150_v28 = vld [vmem:[#allocation2 + $0x48] sm:$0xff] }
0x39c7   :  { %4167 = vperm.xlu0 %6612, %v4164_v61  }
0x3a42   :  { %v4168_v37 = vpop.permute.xlu0 %4167 }
0x3a43   :  { %v4170_v59 = vsel %vm1415_vm13, %v4168_v37, -1e+30 }
0x3a44   :  { %v4172_v13 = vrot.slane %v4170_v59, 7  ;;  %v8159_v59 = vld [vmem:[#allocation5] sm:$0x1] }
0x3a46   :  { %v4174_v62 = vsel %vm1422_vm14, %v4168_v37, %v4172_v13 }
0x3a47   :  { %v4176_v48 = vrot.slane %v4174_v62, 7 }
0x3a49   :  { %v8130_v46 = vsel %vm3695_vm15, %v4168_v37, %v4176_v48 }
0x3a4a   :  { %v4183_v54 = vadd.f32 %v4181_v30, %v8130_v46 }
0x3a4c   :  { %vm4185_vm9 = vcmp.lt.s32.totalorder %v4183_v54, 0  ;;  %v4186_v49 = vxor.u32 2147483647, %v4183_v54 }
0x3a4e   :  { %v4187_v29 = vsel %vm4185_vm9, %v4186_v49, %v4183_v54  ;;  %vm5491_vm9 = vcmask 1042432  }
0x3a4f   :  { %v4188_v11 = vand.u32 4294967168, %v4187_v29 }
0x3a51   :  { %v4189_v56 = vor.u32 %v4188_v11, %v7639_v22 }
0x3a53   :  { %v4190_v8 = vsel %vm3711_vm5, %v4189_v56, 2147483648 }
0x3a54   :  { %v4192_v36 = vshra.s32 %v4190_v8, 16  ;;  %v4191_v27 = vand.u32 65535, %v4190_v8 }
0x3a56   :  { %v4194_v57 = vcvt.s32.f32 %v4192_v36  ;;  %v4193_v21 = vcvt.s32.f32 %v4191_v27 }
0x3a58   :  { %4195 = vmax.xlane.f32.xlu0 %v4194_v57 }
0x3ae1   :  { %v4196_v39 = vpop.xlane.xlu0 %4195 }
0x3ae2   :  { %vm4197_vm10 = vcmp.eq.f32.partialorder %v4194_v57, %v4196_v39  ;;  %v4202_v10 = vcvt.f32.s32 %v4196_v39 }
0x3ae3   :  { %v4198_v17 = vsel %vm4197_vm10, %v4193_v21, -inf  ;;  %v8188_v21 = vld [vmem:[#allocation2 + $0x70] sm:$0xff]  ;;  %vm5493_vm10 = vcmask 1043456  }
0x3ae4   :  { %4199 = vmax.xlane.f32.xlu1 %v4198_v17  ;;  %v4203_v5 = vshll.u32 %v4202_v10, 16  ;;  %v8192_v17 = vld [vmem:[#allocation2 + $0x68] sm:$0xff]  ;;  %v8196_v10 = vld [vmem:[#allocation2 + $0x60] sm:$0xff] }
0x3b6d   :  { %v4200_v47 = vpop.xlane.xlu1 %4199 }
0x3b6e   :  { %v4201_v63 = vcvt.f32.s32 %v4200_v47 }
0x3b70   :  { %v4204_v7 = vadd.s32 %v4203_v5, %v4201_v63 }
0x3b72   :  { %v4205_v15 = vand.u32 127, %v4204_v7  ;;  %v8201_v7 = vld [vmem:[#allocation5 + $0x1] sm:$0x1] }
0x3b74   :  { %v8135_v16 = vsub.s32 127, %v4205_v15 }
0x3b76   :  { %vm4207_vm12 = vcmp.eq.s32.totalorder %v8135_v16, 2 }
0x3b77   :  { %v4210_v58 = vsel %vm4207_vm12, %v8009_v32, 0.0  ;;  %v8154_v32 = vld [vmem:[#allocation2 + $0x40] sm:$0xff]  ;;  %vm5495_vm12 = vcmask 1044480  }
0x3b78   :  { %v4282_v4 = vrot.slane %v4210_v58, 2 }
0x3b7a   :  { %6463 = vmatmul.mubr.msk.f32.vlgmr.msra.gmra.mxu0 %vm119_vm1, %v4282_v4 }
0x3b7b   :  { %6477 = vmatpush3.msra.mxu0 %v8140_v18  ;;  %6484 = vmatprep.mubr.msk.f32.mxu0 %vm7023_vm0, %v7022_v0 }
0x3b7c   :  { %6478 = vmatprep.subr.mxu0 %v7022_v0 }
0x3b7d   :  { %6479 = vmatpush3.msra.mxu0 %v8146_v20 }
0x3b7e   :  { %6480 = vmatprep.subr.mxu0 %v7022_v0 }
0x3b7f   :  { %6481 = vmatpush3.msra.mxu0 %v8150_v28 }
0x3b80   :  { %6482 = vmatprep.subr.mxu0 %v7022_v0 }
0x3b81   :  { %6483 = vmatpush3.msra.mxu0 %v8154_v32 }
0x3b82   :  { %6498 = vmatprep.subr.mxu0 %v7022_v0 }
0x3c3a   :  { %v4351_v61 = vpop.f32.mrf.mxu0 }
0x3c3b   :  { %v4352_v37 = vadd.f32 %v4351_v61, %v8065_v60 }
0x3c3c   :  { %v6464_v26 = vpop.f32.mrf.mxu0 }
0x3c3d   :  { %v4355_v13 = vadd.f32 %v8159_v59, %v4352_v37 }
0x3c3f   :  { %6769 = vtanh.f32 %v4355_v13  ;;  %v5635_v62 = vmul.f32 -1.442695, %v4355_v13 }
0x3c41   :  { %6771 = vpow2.f32 %v5635_v62 }
0x3c4c   :  { %v6770_v30 = vpop.eup %6769 }
0x3c4d   :  { %4365 = vrot.lane.b32.xlu1 %v6770_v30, %s7024_s19 }
0x3c4e   :  { %v6772_v48 = vpop.eup %6771 }
0x3c4f   :  { %v4359_v54 = vadd.f32 1.0, %v6772_v48 }
0x3c51   :  { %6773 = vrcp.f32 %v4359_v54 }
0x3c5e   :  { %v6774_v49 = vpop.eup %6773 }
0x3c5f   :  { %v4363_v60 = vmul.f32 %v6774_v49, %v8028_v55  ;;  %v8182_v55 = vld [vmem:[#allocation2 + $0x78] sm:$0xff] }
0x3cbf   :  { %v4366_v29 = vpop.permute.xlu1 %4365 }
0x3cc0   :  { %v4368_v11 = vmul.f32 %v6774_v49, %v4366_v29 }
0x3cc2   :  { %4370 = vrot.lane.b32.xlu0 %v4368_v11, %s7025_s22 }
0x3d34   :  { %v4371_v56 = vpop.permute.xlu0 %4370 }
0x3d35   :  { %v8165_v8 = vadd.f32 %v4371_v56, %v4363_v60 }
0x3d37   :  { %6775 = vtanh.f32 %v8165_v8 }
0x3d44   :  { %v6776_v36 = vpop.eup %6775 }
0x3d45   :  { %4376 = vrot.lane.b32.xlu1 %v6776_v36, %s7024_s19 }
0x3db7   :  { %v4377_v57 = vpop.permute.xlu1 %4376 }
0x3db8   :  { %v4379_v27 = vmul.f32 %v6774_v49, %v4377_v57 }
0x3dba   :  { %4451 = vrot.lane.b32.xlu1 %v4379_v27, %s7025_s22 }
0x3e2c   :  { %v4452_v39 = vpop.permute.xlu1 %4451 }
0x3e2d   :  { %6485 = vmatmul.mubr.msk.f32.vlgmr.msra.gmra.mxu0 %vm119_vm1, %v4452_v39 }
0x3e2e   :  { %6499 = vmatpush3.msra.mxu0 %v8034_v6  ;;  %6506 = vmatprep.mubr.msk.f32.mxu0 %vm7023_vm0, %v7022_v0 }
0x3e2f   :  { %6500 = vmatprep.subr.mxu0 %v7022_v0 }
0x3e30   :  { %6501 = vmatpush3.msra.mxu0 %v8040_v40 }
0x3e31   :  { %6502 = vmatprep.subr.mxu0 %v7022_v0 }
0x3e32   :  { %6503 = vmatpush3.msra.mxu0 %v8044_v35 }
0x3e33   :  { %6504 = vmatprep.subr.mxu0 %v7022_v0 }
0x3e34   :  { %6505 = vmatpush3.msra.mxu0 %v8048_v38 }
0x3e35   :  { %6507 = vmatmul.mubr.msk.f32.vlgmr.msra.gmra.mxu0 %vm119_vm1, %v4452_v39  ;;  %6520 = vmatprep.subr.mxu0 %v7022_v0 }
0x3e36   :  { %6521 = vmatpush3.msra.mxu0 %v8182_v55  ;;  %6528 = vmatprep.mubr.msk.f32.mxu0 %vm7023_vm0, %v7022_v0 }
0x3e37   :  { %6522 = vmatprep.subr.mxu0 %v7022_v0 }
0x3e38   :  { %6523 = vmatpush3.msra.mxu0 %v8188_v21 }
0x3e39   :  { %6524 = vmatprep.subr.mxu0 %v7022_v0 }
0x3e3a   :  { %6525 = vmatpush3.msra.mxu0 %v8192_v17 }
0x3e3b   :  { %6526 = vmatprep.subr.mxu0 %v7022_v0 }
0x3e3c   :  { %6527 = vmatpush3.msra.mxu0 %v8196_v10 }
0x3e3d   :  { %6542 = vmatprep.subr.mxu0 %v7022_v0 }
0x3eed   :  { %v4521_v47 = vpop.f32.mrf.mxu0 }
0x3eee   :  { %v4522_v5 = vadd.f32 %v4521_v47, %v8113_v51 }
0x3eef   :  { %v6486_v63 = vpop.f32.mrf.mxu0 }
0x3ef0   :  { %v4525_v15 = vadd.f32 %v8201_v7, %v4522_v5  ;;  %v8253_v63 = vld [vmem:[%s8490_s9 + $0x6] sm:$0x1] }
0x3ef2   :  { %6777 = vtanh.f32 %v4525_v15  ;;  %v5638_v37 = vmul.f32 -1.442695, %v4525_v15 }
0x3ef4   :  { %6779 = vpow2.f32 %v5638_v37 }
0x3ef5   :  { %v8204_v58 = vpop.f32.mrf.mxu0 }
0x3ef7   :  { %v6508_v4 = vpop.f32.mrf.mxu0 }
0x3ef8   :  { %v4631_v4 = vld [vmem:[%s8491_s10 + $0x6] sm:$0x1] }
0x3eff   :  { %v6778_v61 = vpop.eup %6777 }
0x3f00   :  { %4535 = vrot.lane.b32.xlu0 %v6778_v61, %s7024_s19 }
0x3f01   :  { %v6780_v26 = vpop.eup %6779 }
0x3f02   :  { %v4529_v13 = vadd.f32 1.0, %v6780_v26 }
0x3f04   :  { %6781 = vrcp.f32 %v4529_v13 }
0x3f11   :  { %v6782_v30 = vpop.eup %6781 }
0x3f12   :  { %v4533_v48 = vmul.f32 %v6782_v30, %v8070_v1 }
0x3f72   :  { %v4536_v62 = vpop.permute.xlu0 %4535 }
0x3f73   :  { %v4538_v51 = vmul.f32 %v6782_v30, %v4536_v62 }
0x3f75   :  { %4540 = vrot.lane.b32.xlu1 %v4538_v51, %s7025_s22 }
0x3fe7   :  { %v4541_v54 = vpop.permute.xlu1 %4540 }
0x3fe8   :  { %v8209_v49 = vadd.f32 %v4541_v54, %v4533_v48 }
0x3fea   :  { %6783 = vtanh.f32 %v8209_v49 }
0x3ff7   :  { %v6784_v29 = vpop.eup %6783 }
0x3ff8   :  { %4546 = vrot.lane.b32.xlu0 %v6784_v29, %s7024_s19 }
0x406a   :  { %v4547_v11 = vpop.permute.xlu0 %4546 }
0x406b   :  { %v4549_v60 = vmul.f32 %v6782_v30, %v4547_v11 }
0x406d   :  { %4551 = vrot.lane.b32.xlu1 %v4549_v60, %s7025_s22 }
0x40df   :  { %v4552_v56 = vpop.permute.xlu1 %4551 }
0x40e0   :  { %6496 = vmatmul.mubr.msk.f32.vlgmr.msra.gmra.mxu1 %vm119_vm1, %v4552_v56  ;;  %6529 = vmatmul.mubr.msk.f32.vlgmr.msra.gmra.mxu0 %vm119_vm1, %v4552_v56 }
0x40e1   :  { %6510 = vmatpush3.msra.mxu1 %v8077_v50  ;;  %6517 = vmatprep.mubr.msk.f32.mxu1 %vm7023_vm0, %v7022_v0 }
0x40e2   :  { %6511 = vmatprep.subr.mxu1 %v7022_v0  ;;  %6543 = vmatpush3.msra.mxu0 %v8083_v33 }
0x40e3   :  { %6512 = vmatpush3.msra.mxu1 %v8086_v41  ;;  %6544 = vmatprep.subr.mxu0 %v7022_v0 }
0x40e4   :  { %6513 = vmatprep.subr.mxu1 %v7022_v0  ;;  %6545 = vmatpush3.msra.mxu0 %v8091_v9  ;;  %v8241_v9 = vld [vmem:[%s8490_s9 + $0x4] sm:$0x1] }
0x40e5   :  { %6514 = vmatpush3.msra.mxu1 %v8094_v14  ;;  %6546 = vmatprep.subr.mxu0 %v7022_v0 }
0x40e6   :  { %6515 = vmatprep.subr.mxu1 %v7022_v0  ;;  %6547 = vmatpush3.msra.mxu0 %v8099_v42 }
0x40e7   :  { %6516 = vmatpush3.msra.mxu1 %v8102_v43  ;;  %6548 = vmatprep.subr.mxu0 %v7022_v0 }
0x40e8   :  { %6531 = vmatprep.subr.mxu1 %v7022_v0  ;;  %6549 = vmatpush3.msra.mxu0 %v8107_v19  ;;  %v8247_v19 = vld [vmem:[%s8490_s9 + $0x5] sm:$0x1] }
0x40e9   :  { %6550 = vmatprep.mubr.msk.f32.mxu0 %vm7023_vm0, %v7022_v0  ;;  %6564 = vmatprep.subr.mxu0 %v7022_v0 }
0x41a0   :  { %v4621_v1 = vpop.f32.mrf.mxu1  ;;  %v8236_v33 = vpop.f32.mrf.mxu0 }
0x41a1   :  { %v4622_v42 = vadd.f32 %v8241_v9, %v4621_v1 }
0x41a2   :  { %v6497_v36 = vpop.f32.mrf.mxu1  ;;  %v6530_v57 = vpop.f32.mrf.mxu0 }
0x41a3   :  { %v4625_v27 = vadd.f32 %v8247_v19, %v4622_v42 }
0x41a5   :  { %v4626_v39 = vmul.f32 0.2, %v4625_v27 }
0x41a7   :  { %6785 = vtanh.f32 %v4626_v39 }
0x41b4   :  { %v6786_v47 = vpop.eup %6785 }
0x41b5   :  { %v4628_v5 = vmul.f32 0.44, %v6786_v47 }
0x41b7   :  { %v8256_v15 = vadd.f32 %v8253_v63, %v4628_v5 }
0x41b9   :  { %v4630_v61 = vsel %vm2341_vm3, %v8256_v15, -1e+30  ;;  %v5518_v31 = vrot.slane %v8256_v15, 2 }
0x41ba   :  { %v4632_v37 = vadd.f32 %v4631_v4, %v4630_v61  ;;  %v8274_v4 = vld [vmem:[%s8486_s5] sm:$0x1f] }
0x41bc   :  { %vm4634_vm15 = vcmp.lt.s32.totalorder %v4632_v37, 0  ;;  %v4635_v26 = vxor.u32 2147483647, %v4632_v37 }
0x41be   :  { %v4636_v13 = vsel %vm4634_vm15, %v4635_v26, %v4632_v37 }
0x41bf   :  { %v4637_v30 = vand.u32 4294967168, %v4636_v13 }
0x41c1   :  { %v4638_v62 = vor.u32 %v4637_v30, %v7639_v22 }
0x41c3   :  { %v4639_v51 = vsel %vm1389_vm2, %v4638_v62, 2147483648 }
0x41c4   :  { %v4641_v48 = vshra.s32 %v4639_v51, 16  ;;  %v4640_v29 = vand.u32 65535, %v4639_v51 }
0x41c6   :  { %v4643_v54 = vcvt.s32.f32 %v4641_v48  ;;  %v4642_v60 = vcvt.s32.f32 %v4640_v29 }
0x41c8   :  { %4644 = vmax.xlane.f32.xlu0 %v4643_v54 }
0x4251   :  { %v4645_v11 = vpop.xlane.xlu0 %4644 }
0x4252   :  { %vm4646_vm4 = vcmp.eq.f32.partialorder %v4643_v54, %v4645_v11  ;;  %v4651_v1 = vcvt.f32.s32 %v4645_v11 }
0x4253   :  { %v4647_v56 = vsel %vm4646_vm4, %v4642_v60, -inf }
0x4254   :  { %4648 = vmax.xlane.f32.xlu1 %v4647_v56  ;;  %v4652_v36 = vshll.u32 %v4651_v1, 16 }
0x42dd   :  { %v4649_v42 = vpop.xlane.xlu1 %4648 }
0x42de   :  { %v4650_v57 = vcvt.f32.s32 %v4649_v42 }
0x42e0   :  { %v4653_v27 = vadd.s32 %v4652_v36, %v4650_v57 }
0x42e2   :  { %v4654_v39 = vand.u32 127, %v4653_v27 }
0x42e4   :  { %v8266_v47 = vsub.s32 127, %v4654_v39 }
0x42e6   :  { %v4659_v5 = vrot.slane %v8266_v47, %v7646_v45 }
0x42e8   :  { %vm4660_vm5 = vcmp.eq.s32.totalorder %v7643_v34, %v4659_v5 }
0x42e9   :  { %v4661_v61 = vsel %vm4660_vm5, %v8274_v4, 0.0 }
0x42ea   :  { %v4662_v37 = vsel %vm2377_vm6, %v4661_v61, 0.0 }
0x42eb   :  { %v4663_v26 = vrot.slane %v4662_v37, 4 }
0x42ed   :  { %v4664_v13 = vadd.f32 %v4663_v26, %v4662_v37 }
0x42ef   :  { %v4665_v30 = vrot.slane %v4664_v13, 2 }
0x42f1   :  { %v4666_v62 = vadd.f32 %v4665_v30, %v4664_v13 }
0x42f3   :  { %v4667_v51 = vrot.slane %v4666_v62, 1 }
0x42f5   :  { %v4668_v48 = vadd.f32 %v4667_v51, %v4666_v62 }
0x42f7   :  { %6518 = vmatmul.mubr.msk.f32.vlgmr.msra.gmra.mxu1 %vm119_vm1, %v4668_v48 }
0x42f8   :  { %6532 = vmatpush3.msra.mxu1 %v8140_v18  ;;  %6539 = vmatprep.mubr.msk.f32.mxu1 %vm7023_vm0, %v7022_v0 }
0x42f9   :  { %6533 = vmatprep.subr.mxu1 %v7022_v0 }
0x42fa   :  { %6534 = vmatpush3.msra.mxu1 %v8146_v20 }
0x42fb   :  { %6535 = vmatprep.subr.mxu1 %v7022_v0 }
0x42fc   :  { %6536 = vmatpush3.msra.mxu1 %v8150_v28 }
0x42fd   :  { %6537 = vmatprep.subr.mxu1 %v7022_v0 }
0x42fe   :  { %6538 = vmatpush3.msra.mxu1 %v8154_v32 }
0x42ff   :  { %6553 = vmatprep.subr.mxu1 %v7022_v0 }
0x43b7   :  { %v4808_v54 = vpop.f32.mrf.mxu1 }
0x43b8   :  { %v4809_v29 = vadd.f32 %v4808_v54, %v8204_v58 }
0x43b9   :  { %v6519_v11 = vpop.f32.mrf.mxu1 }
0x43ba   :  { %v4812_v60 = vadd.f32 %v8159_v59, %v4809_v29 }
0x43bc   :  { %6787 = vtanh.f32 %v4812_v60  ;;  %v5642_v1 = vmul.f32 -1.442695, %v4812_v60 }
0x43be   :  { %6789 = vpow2.f32 %v5642_v1 }
0x43c9   :  { %v6788_v56 = vpop.eup %6787 }
0x43ca   :  { %4822 = vrot.lane.b32.xlu0 %v6788_v56, %s7024_s19 }
0x43cb   :  { %v6790_v42 = vpop.eup %6789 }
0x43cc   :  { %v4816_v36 = vadd.f32 1.0, %v6790_v42 }
0x43ce   :  { %6791 = vrcp.f32 %v4816_v36 }
0x43db   :  { %v6792_v57 = vpop.eup %6791 }
0x43dc   :  { %v4820_v5 = vmul.f32 %v6792_v57, %v8165_v8 }
0x443c   :  { %v4823_v27 = vpop.permute.xlu0 %4822 }
0x443d   :  { %v4825_v39 = vmul.f32 %v6792_v57, %v4823_v27 }
0x443f   :  { %4827 = vrot.lane.b32.xlu1 %v4825_v39, %s7025_s22 }
0x44b1   :  { %v4828_v58 = vpop.permute.xlu1 %4827 }
0x44b2   :  { %v8294_v61 = vadd.f32 %v4828_v58, %v4820_v5 }
0x44b4   :  { %6793 = vtanh.f32 %v8294_v61 }
0x44c1   :  { %v6794_v37 = vpop.eup %6793 }
0x44c2   :  { %4833 = vrot.lane.b32.xlu0 %v6794_v37, %s7024_s19 }
0x4534   :  { %v4834_v26 = vpop.permute.xlu0 %4833 }
0x4535   :  { %v4836_v13 = vmul.f32 %v6792_v57, %v4834_v26 }
0x4537   :  { %4908 = vrot.lane.b32.xlu1 %v4836_v13, %s7025_s22 }
0x45a9   :  { %v4909_v30 = vpop.permute.xlu1 %4908 }
0x45aa   :  { %6540 = vmatmul.mubr.msk.f32.vlgmr.msra.gmra.mxu1 %vm119_vm1, %v4909_v30 }
0x45ab   :  { %6554 = vmatpush3.msra.mxu1 %v8034_v6  ;;  %6561 = vmatprep.mubr.msk.f32.mxu1 %vm7023_vm0, %v7022_v0 }
0x45ac   :  { %6555 = vmatprep.subr.mxu1 %v7022_v0 }
0x45ad   :  { %6556 = vmatpush3.msra.mxu1 %v8040_v40 }
0x45ae   :  { %6557 = vmatprep.subr.mxu1 %v7022_v0 }
0x45af   :  { %6558 = vmatpush3.msra.mxu1 %v8044_v35 }
0x45b0   :  { %6559 = vmatprep.subr.mxu1 %v7022_v0 }
0x45b1   :  { %6560 = vmatpush3.msra.mxu1 %v8048_v38 }
0x45b2   :  { %6562 = vmatmul.mubr.msk.f32.vlgmr.msra.gmra.mxu1 %vm119_vm1, %v4909_v30  ;;  %6575 = vmatprep.subr.mxu1 %v7022_v0 }
0x45b3   :  { %6576 = vmatpush3.msra.mxu1 %v8182_v55  ;;  %6583 = vmatprep.mubr.msk.f32.mxu1 %vm7023_vm0, %v7022_v0 }
0x45b4   :  { %6577 = vmatprep.subr.mxu1 %v7022_v0 }
0x45b5   :  { %6578 = vmatpush3.msra.mxu1 %v8188_v21 }
0x45b6   :  { %6579 = vmatprep.subr.mxu1 %v7022_v0 }
0x45b7   :  { %6580 = vmatpush3.msra.mxu1 %v8192_v17 }
0x45b8   :  { %6581 = vmatprep.subr.mxu1 %v7022_v0 }
0x45b9   :  { %6582 = vmatpush3.msra.mxu1 %v8196_v10 }
0x466a   :  { %v4978_v6 = vpop.f32.mrf.mxu1 }
0x466b   :  { %v4979_v40 = vadd.f32 %v4978_v6, %v8236_v33 }
0x466c   :  { %v6541_v35 = vpop.f32.mrf.mxu1 }
0x466d   :  { %v4982_v38 = vadd.f32 %v8201_v7, %v4979_v40 }
0x466f   :  { %6795 = vtanh.f32 %v4982_v38  ;;  %v5645_v21 = vmul.f32 -1.442695, %v4982_v38 }
0x4671   :  { %6797 = vpow2.f32 %v5645_v21 }
0x4672   :  { %v8322_v8 = vpop.f32.mrf.mxu1 }
0x4674   :  { %v6563_v55 = vpop.f32.mrf.mxu1 }
0x467c   :  { %v6796_v62 = vpop.eup %6795 }
0x467d   :  { %4992 = vrot.lane.b32.xlu0 %v6796_v62, %s7024_s19 }
0x467e   :  { %v6798_v17 = vpop.eup %6797 }
0x467f   :  { %v4986_v51 = vadd.f32 1.0, %v6798_v17 }
0x4681   :  { %6799 = vrcp.f32 %v4986_v51 }
0x468e   :  { %v6800_v48 = vpop.eup %6799 }
0x468f   :  { %v4990_v33 = vmul.f32 %v6800_v48, %v8209_v49 }
0x46ef   :  { %v4993_v10 = vpop.permute.xlu0 %4992 }
0x46f0   :  { %v4995_v54 = vmul.f32 %v6800_v48, %v4993_v10 }
0x46f2   :  { %4997 = vrot.lane.b32.xlu1 %v4995_v54, %s7025_s22 }
0x4764   :  { %v4998_v29 = vpop.permute.xlu1 %4997 }
0x4765   :  { %v8327_v11 = vadd.f32 %v4998_v29, %v4990_v33 }
0x4767   :  { %6801 = vtanh.f32 %v8327_v11 }
0x4774   :  { %v6802_v60 = vpop.eup %6801 }
0x4775   :  { %5003 = vrot.lane.b32.xlu0 %v6802_v60, %s7024_s19 }
0x47e7   :  { %v5004_v56 = vpop.permute.xlu0 %5003 }
0x47e8   :  { %v5006_v1 = vmul.f32 %v6800_v48, %v5004_v56 }
0x47ea   :  { %5008 = vrot.lane.b32.xlu1 %v5006_v1, %s7025_s22 }
0x485c   :  { %v5009_v42 = vpop.permute.xlu1 %5008 }
0x485d   :  { %6551 = vmatmul.mubr.msk.f32.vlgmr.msra.gmra.mxu0 %vm119_vm1, %v5009_v42  ;;  %6584 = vmatmul.mubr.msk.f32.vlgmr.msra.gmra.mxu1 %vm119_vm1, %v5009_v42 }
0x485e   :  { %6565 = vmatpush3.msra.mxu0 %v8077_v50  ;;  %6572 = vmatprep.mubr.msk.f32.mxu0 %vm7023_vm0, %v7022_v0 }
0x485f   :  { %6566 = vmatprep.subr.mxu0 %v7022_v0 }
0x4860   :  { %6567 = vmatpush3.msra.mxu0 %v8086_v41 }
0x4861   :  { %6568 = vmatprep.subr.mxu0 %v7022_v0 }
0x4862   :  { %6569 = vmatpush3.msra.mxu0 %v8094_v14 }
0x4863   :  { %6570 = vmatprep.subr.mxu0 %v7022_v0 }
0x4864   :  { %6571 = vmatpush3.msra.mxu0 %v8102_v43  ;;  %v5088_v43 = vld [vmem:[%s8491_s10 + $0x7] sm:$0x1] }
0x4865   :  { %6586 = vmatprep.subr.mxu0 %v7022_v0 }
0x491d   :  { %v5078_v49 = vpop.f32.mrf.mxu0  ;;  %v8344_v36 = vpop.f32.mrf.mxu1 }
0x491e   :  { %v5079_v50 = vadd.f32 %v8241_v9, %v5078_v49 }
0x491f   :  { %v6552_v57 = vpop.f32.mrf.mxu0  ;;  %v6585_v27 = vpop.f32.mrf.mxu1 }
0x4920   :  { %v5082_v39 = vadd.f32 %v8247_v19, %v5079_v50 }
0x4922   :  { %v5083_v41 = vmul.f32 0.2, %v5082_v39 }
0x4924   :  { %6803 = vtanh.f32 %v5083_v41 }
0x4931   :  { %v6804_v5 = vpop.eup %6803 }
0x4932   :  { %v5085_v58 = vmul.f32 0.44, %v6804_v5 }
0x4934   :  { %v8349_v14 = vadd.f32 %v8253_v63, %v5085_v58 }
0x4936   :  { %v5087_v37 = vsel %vm2341_vm3, %v8349_v14, -1e+30 }
0x4937   :  { %v5089_v9 = vadd.f32 %v5088_v43, %v5087_v37 }
0x4939   :  { %vm5091_vm7 = vcmp.lt.s32.totalorder %v5089_v9, 0  ;;  %v5092_v26 = vxor.u32 2147483647, %v5089_v9 }
0x493b   :  { %v5093_v13 = vsel %vm5091_vm7, %v5092_v26, %v5089_v9 }
0x493c   :  { %v5094_v19 = vand.u32 4294967168, %v5093_v13 }
0x493e   :  { %v5095_v30 = vor.u32 %v5094_v19, %v7639_v22 }
0x4940   :  { %v5096_v6 = vsel %vm1389_vm2, %v5095_v30, 2147483648  ;;  %v6884_v30 = vld [vmem:[%s8490_s9 + $0x2] ss:$0 sm:$0xff] }
0x4941   :  { %v5098_v40 = vshra.s32 %v5096_v6, 16  ;;  %v5097_v35 = vand.u32 65535, %v5096_v6 }
0x4943   :  { %v5100_v63 = vcvt.s32.f32 %v5098_v40  ;;  %v5099_v55 = vcvt.s32.f32 %v5097_v35 }
0x4945   :  { %5101 = vmax.xlane.f32.xlu0 %v5100_v63 }
0x49ce   :  { %v5102_v38 = vpop.xlane.xlu0 %5101 }
0x49cf   :  { %vm5103_vm8 = vcmp.eq.f32.partialorder %v5100_v63, %v5102_v38  ;;  %v5108_v21 = vcvt.f32.s32 %v5102_v38 }
0x49d0   :  { %v5104_v62 = vsel %vm5103_vm8, %v5099_v55, -inf }
0x49d1   :  { %5105 = vmax.xlane.f32.xlu1 %v5104_v62  ;;  %v5109_v51 = vshll.u32 %v5108_v21, 16 }
0x4a5a   :  { %v5106_v17 = vpop.xlane.xlu1 %5105 }
0x4a5b   :  { %v5107_v48 = vcvt.f32.s32 %v5106_v17 }
0x4a5d   :  { %v5110_v10 = vadd.s32 %v5109_v51, %v5107_v48  ;;  %v6885_v48 = vld [vmem:[%s8490_s9 + $0x3] ss:$0 sm:$0xff] }
0x4a5f   :  { %v5111_v54 = vand.u32 127, %v5110_v10 }
0x4a61   :  { %v8359_v33 = vsub.s32 127, %v5111_v54 }
0x4a63   :  { %v5116_v29 = vrot.slane %v8359_v33, %v7646_v45 }
0x4a65   :  { %vm5117_vm3 = vcmp.eq.s32.totalorder %v7643_v34, %v5116_v29 }
0x4a66   :  { %v5118_v60 = vsel %vm5117_vm3, %v8274_v4, 0.0 }
0x4a67   :  { %v5119_v56 = vsel %vm2377_vm6, %v5118_v60, 0.0  ;;  %vm1439_vm6 = vcmask 1041409  }
0x4a68   :  { %v5120_v1 = vrot.slane %v5119_v56, 4 }
0x4a6a   :  { %v5121_v42 = vadd.f32 %v5120_v1, %v5119_v56 }
0x4a6c   :  { %v5122_v49 = vrot.slane %v5121_v42, 2 }
0x4a6e   :  { %v5123_v50 = vadd.f32 %v5122_v49, %v5121_v42 }
0x4a70   :  { %v5124_v57 = vrot.slane %v5123_v50, 1 }
0x4a72   :  { %v5125_v27 = vadd.f32 %v5124_v57, %v5123_v50 }
0x4a74   :  { %6573 = vmatmul.mubr.msk.f32.vlgmr.msra.gmra.mxu0 %vm119_vm1, %v5125_v27 }
0x4a75   :  { %6587 = vmatpush3.msra.mxu0 %v8140_v18  ;;  %6594 = vmatprep.mubr.msk.f32.mxu0 %vm7023_vm0, %v7022_v0  ;;  %vm1402_vm0 = vcmask 254976  }
0x4a76   :  { %6588 = vmatprep.subr.mxu0 %v7022_v0 }
0x4a77   :  { %6589 = vmatpush3.msra.mxu0 %v8146_v20 }
0x4a78   :  { %6590 = vmatprep.subr.mxu0 %v7022_v0 }
0x4a79   :  { %6591 = vmatpush3.msra.mxu0 %v8150_v28 }
0x4a7a   :  { %6592 = vmatprep.subr.mxu0 %v7022_v0 }
0x4a7b   :  { %6593 = vmatpush3.msra.mxu0 %v8154_v32 }
0x4b34   :  { %v5265_v34 = vpop.f32.mrf.mxu0 }
0x4b35   :  { %v5266_v4 = vadd.f32 %v5265_v34, %v8322_v8 }
0x4b36   :  { %v6574_v39 = vpop.f32.mrf.mxu0 }
0x4b37   :  { %v5269_v18 = vadd.f32 %v8159_v59, %v5266_v4  ;;  %v6883_v59 = vld [vmem:[%s8490_s9 + $0x1] sm:$0x1]  ;;  %v1427_v39 = vld [vmem:[%s8491_s10] sm:$0x1] }
0x4b38   :  { %v1383_v9 = vadd.f32 %v6883_v59, %v7457_v23  ;;  %v1867_v35 = vadd.f32 %v6883_v59, %v7525_v2 }
0x4b39   :  { %6805 = vtanh.f32 %v5269_v18  ;;  %v5649_v5 = vmul.f32 -1.442695, %v5269_v18 }
0x4b3a   :  { %v1394_v13 = vrot.slane %v1383_v9, %v7646_v45  ;;  %v1873_v38 = vrot.slane %v1867_v35, %v7646_v45 }
0x4b3b   :  { %6807 = vpow2.f32 %v5649_v5 }
0x4b3c   :  { %v1395_v19 = vadd.f32 %v1394_v13, %v7380_v25  ;;  %v1874_v55 = vadd.f32 %v1873_v38, %v7380_v25 }
0x4b46   :  { %v6806_v41 = vpop.eup %6805 }
0x4b47   :  { %5279 = vrot.lane.b32.xlu0 %v6806_v41, %s7024_s19 }
0x4b48   :  { %v6808_v20 = vpop.eup %6807 }
0x4b49   :  { %v5273_v58 = vadd.f32 1.0, %v6808_v20 }
0x4b4b   :  { %6809 = vrcp.f32 %v5273_v58 }
0x4b58   :  { %v6810_v28 = vpop.eup %6809 }
0x4b59   :  { %v5277_v32 = vmul.f32 %v6810_v28, %v8294_v61 }
0x4bb9   :  { %v5280_v43 = vpop.permute.xlu0 %5279 }
0x4bba   :  { %v5282_v0 = vmul.f32 %v6810_v28, %v5280_v43 }
0x4bbc   :  { %5284 = vrot.lane.b32.xlu1 %v5282_v0, %s7025_s22 }
0x4c2e   :  { %v5285_v8 = vpop.permute.xlu1 %5284 }
0x4c2f   :  { %v8381_v37 = vadd.f32 %v5285_v8, %v5277_v32 }
0x4c31   :  { %6811 = vtanh.f32 %v8381_v37 }
0x4c32   :  { %6813 = vtanh.f32 %v1395_v19 }
0x4c33   :  { %6815 = vtanh.f32 %v1874_v55  ;;  %v5506_v55 = vrot.slane %v7630_v12, 6 }
0x4c3e   :  { %v6812_v26 = vpop.eup %6811 }
0x4c3f   :  { %5290 = vrot.lane.b32.xlu0 %v6812_v26, %s7024_s19  ;;  %v6814_v61 = vpop.eup %6813 }
0x4c40   :  { %v1401_v6 = vmul.f32 %v6884_v30, %v6814_v61  ;;  %v6816_v62 = vpop.eup %6815 }
0x4c41   :  { %v1876_v21 = vmul.f32 %v6884_v30, %v6816_v62  ;;  %v1894_v30 = vld [vmem:[%s8491_s10 + $0x1] sm:$0x1] }
0x4c42   :  { %v1403_v40 = vsel %vm1402_vm0, %v1401_v6, 0.0 }
0x4c43   :  { %v1877_v17 = vsel %vm1402_vm0, %v1876_v21, 0.0  ;;  %v5509_v21 = vrot.slane %v7770_v52, 5 }
0x4c5e   :  { %1404 = vadd.xlane.f32.xlu0 %v1403_v40  ;;  %v1896_v40 = vrot.slane %v1894_v30, 7 }
0x4cb1   :  { %v5291_v63 = vpop.permute.xlu0 %5290 }
0x4cb2   :  { %v8395_v23 = vmul.f32 %v6810_v28, %v5291_v63 }
0x4cb4   :  { %5365 = vrot.lane.b32.xlu1 %v8395_v23, %s7025_s22 }
0x4cd8   :  { %1878 = vadd.xlane.f32.xlu1 %v1877_v17 }
0x4ce7   :  { %v1405_v51 = vpop.xlane.xlu0 %1404 }
0x4ce8   :  { %v1410_v10 = vadd.f32 %v6885_v48, %v1405_v51 }
0x4cea   :  { %v1412_v54 = vmul.f32 0.2, %v1410_v10  ;;  %v5515_v10 = vrot.slane %v8130_v46, 5 }
0x4cec   :  { %6817 = vtanh.f32 %v1412_v54 }
0x4cf9   :  { %v6818_v29 = vpop.eup %6817 }
0x4cfa   :  { %v1414_v2 = vmul.f32 1.1, %v6818_v29 }
0x4cfc   :  { %1418 = vperm.xlu1 %6611, %v1414_v2   ;;  %v5521_v2 = vrot.slane %v8349_v14, 1 }
0x4d26   :  { %v5366_v45 = vpop.permute.xlu1 %5365 }
0x4d27   :  { %6595 = vmatmul.mubr.msk.f32.vlgmr.msra.gmra.mxu0 %vm119_vm1, %v5366_v45 }
0x4d61   :  { %v1879_v25 = vpop.xlane.xlu1 %1878 }
0x4d62   :  { %v1880_v60 = vadd.f32 %v6885_v48, %v1879_v25  ;;  %v5512_v48 = vrot.slane %v7999_v3, 6 }
0x4d64   :  { %v1881_v56 = vmul.f32 0.2, %v1880_v60 }
0x4d66   :  { %6819 = vtanh.f32 %v1881_v56 }
0x4d73   :  { %v6820_v34 = vpop.eup %6819 }
0x4d74   :  { %v1883_v41 = vmul.f32 1.1, %v6820_v34 }
0x4d77   :  { %v1419_v57 = vpop.permute.xlu1 %1418 }
0x4d78   :  { %v1421_v27 = vsel %vm1415_vm13, %v1419_v57, -1e+30 }
0x4d79   :  { %v1424_v18 = vrot.slane %v1421_v27, 7 }
0x4de7   :  { %v5435_v1 = vpop.f32.mrf.mxu0 }
0x4de8   :  { %v5436_v42 = vadd.f32 %v5435_v1, %v8344_v36  ;;  %v1429_v36 = vrot.slane %v1427_v39, 7 }
0x4de9   :  { %v6596_v49 = vpop.f32.mrf.mxu0 }
0x4dea   :  { %v5439_v50 = vadd.f32 %v8201_v7, %v5436_v42  ;;  %v1426_v7 = vsel %vm1422_vm14, %v1419_v57, %v1424_v18 }
0x4deb   :  { %v1431_v5 = vadd.f32 %v1429_v36, %v1426_v7  ;;  %v5503_v38 = vrot.slane %v1426_v7, 1 }
0x4dec   :  { %6821 = vtanh.f32 %v5439_v50  ;;  %v5652_v59 = vmul.f32 -1.442695, %v5439_v50 }
0x4ded   :  { %v1434_v20 = vxor.u32 2147483647, %v1431_v5  ;;  %vm1433_vm1 = vcmp.lt.s32.totalorder %v1431_v5, 0 }
0x4dee   :  { %6823 = vpow2.f32 %v5652_v59 }
0x4def   :  { %v1435_v58 = vsel %vm1433_vm1, %v1434_v20, %v1431_v5 }
0x4df0   :  { %v1436_v28 = vand.u32 4294967168, %v1435_v58 }
0x4df2   :  { %v1438_v43 = vor.u32 %v7639_v22, %v1436_v28 }
0x4df4   :  { %v1440_v0 = vsel %vm1439_vm6, %v1438_v43, 2147483648 }
0x4df5   :  { %v1442_v32 = vshra.s32 %v1440_v0, 16  ;;  %v1441_v14 = vand.u32 65535, %v1440_v0 }
0x4df7   :  { %v1444_v8 = vcvt.s32.f32 %v1442_v32  ;;  %v1443_v50 = vcvt.s32.f32 %v1441_v14 }
0x4df9   :  { %v6822_v4 = vpop.eup %6821 }
0x4dfa   :  { %5449 = vrot.lane.b32.xlu0 %v6822_v4, %s7024_s19 }
0x4dfb   :  { %v6824_v9 = vpop.eup %6823 }
0x4dfc   :  { %v5443_v26 = vadd.f32 1.0, %v6824_v9 }
0x4dfe   :  { %1886 = vperm.xlu0 %6612, %v1883_v41   ;;  %6825 = vrcp.f32 %v5443_v26 }
0x4e0b   :  { %v8419_v13 = vpop.eup %6825 }
0x4e0c   :  { %v5447_v27 = vmul.f32 %v8419_v13, %v8327_v11 }
0x4e1d   :  { %1445 = vmax.xlane.f32.xlu0 %v1444_v8 }
0x4e6c   :  { %v5450_v19 = vpop.permute.xlu0 %5449 }
0x4e6d   :  { %v5452_v61 = vmul.f32 %v8419_v13, %v5450_v19 }
0x4e6f   :  { %5454 = vrot.lane.b32.xlu1 %v5452_v61, %s7025_s22 }
0x4e79   :  { %v1887_v6 = vpop.permute.xlu0 %1886 }
0x4e7a   :  { %v1889_v63 = vsel %vm1415_vm13, %v1887_v6, -1e+30  ;;  %vm5497_vm13 = vcmask 1045504  }
0x4e7b   :  { %v1891_v35 = vrot.slane %v1889_v63, 7 }
0x4e7d   :  { %v1893_v62 = vsel %vm1422_vm14, %v1887_v6, %v1891_v35  ;;  %vm5499_vm14 = vcmask 1046528  }
0x4e7e   :  { %v1898_v17 = vadd.f32 %v1896_v40, %v1893_v62  ;;  %v5523_v51 = vsel %vm1389_vm2, %v5503_v38, %v1893_v62 }
0x4e7f   :  { %v5524_v54 = vsel %vm3668_vm11, %v5523_v51, %v5506_v55 }
0x4e80   :  { %vm1900_vm15 = vcmp.lt.s32.totalorder %v1898_v17, 0  ;;  %v1901_v29 = vxor.u32 2147483647, %v1898_v17  ;;  %v5525_v12 = vsel %vm5491_vm9, %v5524_v54, %v5509_v21 }
0x4e81   :  { %v5526_v52 = vsel %vm5493_vm10, %v5525_v12, %v5512_v48 }
0x4e82   :  { %v1902_v45 = vsel %vm1900_vm15, %v1901_v29, %v1898_v17  ;;  %v5527_v3 = vsel %vm5495_vm12, %v5526_v52, %v5515_v10 }
0x4e83   :  { %v1903_v25 = vand.u32 4294967168, %v1902_v45  ;;  %v5528_v46 = vsel %vm5497_vm13, %v5527_v3, %v5518_v31 }
0x4e84   :  { %v5529_v60 = vsel %vm5499_vm14, %v5528_v46, %v5521_v2 }
0x4e85   :  { %5530 = vst [vmem:[%s8495_s14] sm:$0xff] %v5529_v60  ;;  %v1904_v56 = vor.u32 %v1903_v25, %v7639_v22  ;;  %s7027_s14 = smov 96  }
0x4e87   :  { %v1905_v15 = vsel %vm1439_vm6, %v1904_v56, 2147483648 }
0x4e88   :  { %v1907_v1 = vshra.s32 %v1905_v15, 16  ;;  %v1906_v41 = vand.u32 65535, %v1905_v15 }
0x4e8a   :  { %v1909_v42 = vcvt.s32.f32 %v1907_v1  ;;  %v1908_v7 = vcvt.s32.f32 %v1906_v41 }
0x4e93   :  { %1910 = vmax.xlane.f32.xlu1 %v1909_v42 }
0x4ea6   :  { %v1446_v49 = vpop.xlane.xlu0 %1445 }
0x4ea7   :  { %vm1447_vm4 = vcmp.eq.f32.partialorder %v1444_v8, %v1446_v49 }
0x4ea8   :  { %v1448_v57 = vsel %vm1447_vm4, %v1443_v50, -inf }
0x4ea9   :  { %1449 = vmax.xlane.f32.xlu1 %v1448_v57 }
0x4ee1   :  { %v5455_v34 = vpop.permute.xlu1 %5454 }
0x4ee2   :  { %v5457_v4 = vadd.f32 %v5455_v34, %v5447_v27 }
0x4ee4   :  { %6827 = vtanh.f32 %v5457_v4  ;;  %v5474_v18 = vrot.slane %v5457_v4, 7 }
0x4ee6   :  { %v5476_v22 = vsel %vm1389_vm2, %v8381_v37, %v5474_v18 }
0x4ef1   :  { %v6828_v39 = vpop.eup %6827 }
0x4ef2   :  { %5460 = vrot.lane.b32.xlu0 %v6828_v39, %s7024_s19  ;;  %s6966_s19 = scalar_lea.vmem %s5548_s27, 32 }
0x4ef3   :  { %p6967_p6 = scmp.ne.s32.totalorder %s5548_s27, %s6966_s19  ;;  %p6972_p8 = scmp.lt.s32.totalorder %s6966_s19, %s6966_s19 }
0x4ef5   :  { %p6973_p9 = por %p6972_p8, %p6971_p7 }
0x4ef6   :  { %5478 = vrot.lane.b32.xlu0 %v5476_v22, %s7027_s14 }
0x4ef7   :  { %p6974_p10 = pnand %p6973_p9, %p6967_p6 }
0x4f1c   :  { %v1911_v36 = vpop.xlane.xlu1 %1910 }
0x4f1d   :  { %vm1912_vm5 = vcmp.eq.f32.partialorder %v1909_v42, %v1911_v36 }
0x4f1e   :  { %v1913_v5 = vsel %vm1912_vm5, %v1908_v7, -inf }
0x4f1f   :  { %1914 = vmax.xlane.f32.xlu1 %v1913_v5 }
0x4f64   :  { %v5461_v20 = vpop.permute.xlu0 %5460 }
0x4f65   :  { %v5463_v11 = vmul.f32 %v8419_v13, %v5461_v20 }
0x4f67   :  { %v5465_v58 = vrot.slane %v5463_v11, 7 }
0x4f68   :  { %v5479_v28 = vpop.permute.xlu0 %5478 }
0x4f69   :  { %5481 = vst.msk [vmem:[#allocation11] sm:$0x3] %vm1402_vm0, %v5479_v28  ;;  %v5467_v37 = vsel %vm1389_vm2, %v8395_v23, %v5465_v58 }
0x4f6a   :  { %5469 = vrot.lane.b32.xlu1 %v5467_v37, %s7025_s22 }
0x4f6b   :  { %6977 = shalt.err (!%p6974_p10)
}
0x4f6c   :  { %5550 = dma.vmem_to_hbm [thread:$0]  %s5548_s27, 32, %s8493_s12, [#allocation12]   ;;  %v1450_v43 = vpop.xlane.xlu1 %1449  ;;  %v1452_v0 = vcvt.f32.s32 %v1446_v49  ;;  %v1917_v9 = vcvt.f32.s32 %v1911_v36  ;;  %v5483_v35 = vrot.slane %v7648_v53, 6  ;;  %v5484_v38 = vrot.slane %v7780_v24, 5 }
0x4f6d   :  { %v1451_v32 = vcvt.f32.s32 %v1450_v43  ;;  %v5485_v62 = vrot.slane %v8006_v44, 6  ;;  %v5486_v17 = vrot.slane %v8135_v16, 5  ;;  %v5487_v48 = vrot.slane %v8266_v47, 2  ;;  %s7029_s29 = smov [#allocation10]  }
0x4f6e   :  { %v1453_v8 = vshll.u32 %v1452_v0, 16  ;;  %v1918_v13 = vshll.u32 %v1917_v9, 16  ;;  %v5488_v54 = vrot.slane %v8359_v33, 1  ;;  %s5537_s30 = sshll.u32 %s7029_s29, 4  ;;  %s5538_s30 = int_to_ptr.vmem [resolvable:$true] %s5537_s30 }
0x4f6f   :  { %s6986_s15 = scalar_lea.vmem %s5538_s30, 32  ;;  %p6991_p12 = scmp.lt.s32.totalorder %s5538_s30, %s5538_s30 }
0x4f70   :  { %v1454_v59 = vadd.s32 %v1453_v8, %v1451_v32  ;;  %p6987_p11 = scmp.ne.s32.totalorder %s5538_s30, %s6986_s15  ;;  %p6992_p13 = scmp.lt.s32.totalorder %s6986_s15, %s6986_s15 }
0x4f72   :  { %v1455_v23 = vand.u32 127, %v1454_v59  ;;  %p6993_p0 = por %p6992_p13, %p6991_p12 }
0x4f74   :  { %v1456_v61 = vsub.s32 127, %v1455_v23  ;;  %p6994_p1 = pnand %p6993_p0, %p6987_p11 }
0x4f76   :  { %v5482_v40 = vrot.slane %v1456_v61, 1 }
0x4fa8   :  { %v1915_v26 = vpop.xlane.xlu1 %1914 }
0x4fa9   :  { %v1916_v19 = vcvt.f32.s32 %v1915_v26 }
0x4fab   :  { %v1919_v30 = vadd.s32 %v1918_v13, %v1916_v19 }
0x4fad   :  { %v1920_v6 = vand.u32 127, %v1919_v30 }
0x4faf   :  { %v1921_v63 = vsub.s32 127, %v1920_v6 }
0x4fb1   :  { %v5489_v55 = vsel %vm1389_vm2, %v5482_v40, %v1921_v63 }
0x4fb2   :  { %v5490_v21 = vsel %vm3668_vm11, %v5489_v55, %v5483_v35 }
0x4fb3   :  { %v5492_v51 = vsel %vm5491_vm9, %v5490_v21, %v5484_v38 }
0x4fb4   :  { %v5494_v10 = vsel %vm5493_vm10, %v5492_v51, %v5485_v62 }
0x4fb5   :  { %v5496_v53 = vsel %vm5495_vm12, %v5494_v10, %v5486_v17 }
0x4fb6   :  { %v5498_v24 = vsel %vm5497_vm13, %v5496_v53, %v5487_v48 }
0x4fb7   :  { %v5500_v29 = vsel %vm5499_vm14, %v5498_v24, %v5488_v54 }
0x4fb8   :  { %5501 = vst [vmem:[%s8494_s13] sm:$0xff] %v5500_v29 }
0x4fdc   :  { %v5470_v44 = vpop.permute.xlu1 %5469 }
0x4fdd   :  { %5472 = vst.msk [vmem:[#allocation10] sm:$0x3] %vm1402_vm0, %v5470_v44 }
0x4fde   :  { %6997 = shalt.err (!%p6994_p1)
}
0x4fdf   :  { %5540 = dma.vmem_to_hbm [thread:$0]  %s5538_s30, 32, %s8492_s11, [#allocation4]  }
0x4fe0   :  { %7012 = dma.done.wait [#allocation4], 32  }
0x4fe1   :  { %7013 = vsyncadd [#allocation4], 4294967264 }
0x4fe2   :  { %7014 = dma.done.wait [#allocation12], 32  }
0x4fe3   :  { %7015 = vsyncadd [#allocation12], 4294967264 }
0x4fe4   :  { %5565 = vsyncpa [#allocation3], 1 }
0x4fe5   :  { %5566 = vsyncpa [#allocation6], 1 }
0x4fe6   :  { %5567 = vsyncpa [#allocation9], 1 }
0x4fe7   :  { %5568 = vsyncpa [#allocation4], 1 }
0x4fe8   :  { %5569 = vsyncpa [#allocation12], 1 }

</bundles_post_ra>
